<compile_context>
chip_gen: v5e
topology: v5e:2x2
jax: 0.10.0
libtpu: 0.0.40
codegen_flags: <defaults>
</compile_context>

<pallas_src>
import functools

import jax
import jax.numpy as jnp
from jax.experimental import pallas as pl
from jax.experimental.pallas import tpu as pltpu

IN_FEATURES = 1024
HIDDEN = 100          # as in the PyTorch module
HIDDEN_PAD = 128      # lane-padded hidden width
LANE = 128
BN_EPS = 1e-5
NUM_DOMAINS = 2
NEG_INF = -1e30


def _round_up(x, m):
    return (x + m - 1) // m * m


def _pick_tm(n):
    """Row tile: big for large batches (fewer feat_w re-streams), small otherwise."""
    n8 = _round_up(max(n, 1), 8)
    if n8 < 128:
        return n8                     # tiny batch: one small tile
    for cand in (512, 256):
        if n8 >= 2 * cand:            # keep >= 2 M tiles (v7x has 2 TCs)
            return cand
    return 128


def _pick_tk(chw_pad, max_tk=2048):
    """Largest lane-multiple K tile <= max_tk that divides chw_pad exactly."""
    n_lanes = chw_pad // LANE
    best = 1
    for mult in range(1, n_lanes + 1):
        if mult * LANE > max_tk:
            break
        if n_lanes % mult == 0:
            best = mult
    return best * LANE


def _pick_vmem_limit():
    try:
        phys = int(pltpu.get_tpu_info().vmem_capacity_bytes)
    except Exception:
        phys = 64 * 1024 * 1024       # conservative (v7x-sized) fallback
    return max(32 * 1024 * 1024, min(phys * 85 // 100, 100 * 1024 * 1024))


# ----------------------------------------------------------------------------
# Fused kernel
# ----------------------------------------------------------------------------
def _log_softmax(logits):
    # Padding columns carry a -1e30 bias (baked in prepare_params), so no
    # iota/compare/select mask is needed here.
    m = jnp.max(logits, axis=1, keepdims=True)
    z = logits - m
    lse = jnp.log(jnp.sum(jnp.exp(z), axis=1, keepdims=True))
    return z - lse


def _dann_fused_kernel(
    x_ref, fw_ref, fb_ref,                     # feature extractor (tiled over K)
    hw1_ref, hb1_ref,                          # [class_fc1 | domain_fc1] fused, BN folded
    cw2_ref, cb2_ref, cw3_ref, cb3_ref,        # class head (BN folded, lane padded)
    dw2_ref, db2_ref,                          # domain head (lane padded)
    cls_ref, dom_ref,                          # outputs (lane padded)
    acc_ref,                                   # (TM, 1024) f32 feature accumulator
):
    k = pl.program_id(1)

    @pl.when(k == 0)
    def _():
        # Seed the accumulator with the feature bias (saves an epilogue add pass).
        acc_ref[...] = jnp.broadcast_to(fb_ref[...], acc_ref.shape)

    # bf16 x bf16 -> f32 accumulate on the MXU; K is the reduction grid axis.
    acc_ref[...] += jnp.dot(x_ref[...], fw_ref[...],
                            preferred_element_type=jnp.float32)

    @pl.when(k == pl.num_programs(1) - 1)
    def _():
        # "ViT" feature (stays in VMEM; never written back to HBM).
        feat = acc_ref[...]                                     # (TM, 1024) f32

        # Fused first layer of both heads: 256 output lanes in one bf16 matmul.
        h1 = jnp.dot(feat.astype(jnp.bfloat16), hw1_ref[...],
                     preferred_element_type=jnp.float32)
        h1 = jnp.maximum(h1 + hb1_ref[...], 0.0)                # relu (dropout=id)
        hc = h1[:, :HIDDEN_PAD]                                 # class branch
        hd = h1[:, HIDDEN_PAD:]                                 # domain branch

        # class head: fc2 (+BN folded) + relu -> fc3 -> log-softmax
        h2 = jnp.dot(hc.astype(jnp.bfloat16), cw2_ref[...],
                     preferred_element_type=jnp.float32)
        h2 = jnp.maximum(h2 + cb2_ref[...], 0.0)
        cl = jnp.dot(h2.astype(jnp.bfloat16), cw3_ref[...],
                     preferred_element_type=jnp.float32)
        cls_ref[...] = _log_softmax(cl + cb3_ref[...])

        # domain head (gradient reversal is identity in forward): fc2 -> log-softmax
        dl = jnp.dot(hd.astype(jnp.bfloat16), dw2_ref[...],
                     preferred_element_type=jnp.float32)
        dom_ref[...] = _log_softmax(dl + db2_ref[...])


# ----------------------------------------------------------------------------
# Wrappers
# ----------------------------------------------------------------------------
def dann_forward(input_data, alpha, kparams, *, tm=None, interpret=False):
    """input_data: (N, C, H, W) float32 (NCHW).  alpha unused in forward."""
    del alpha  # ReverseLayerF forward is identity; alpha only affects backward.
    n = input_data.shape[0]
    x_flat = input_data.reshape(n, -1)

    chw = kparams["chw"]
    chw_pad = kparams["chw_pad"]
    tk = kparams["tk"]
    num_classes = kparams["num_classes"]
    nc_pad = kparams["nc_pad"]
    assert x_flat.shape[1] == chw, "input C*H*W does not match the parameters"

    if tm is None:
        tm = _pick_tm(n)
    n_pad = _round_up(max(n, 1), tm)

    # Cast to bf16 and pad only what is actually needed (no full zero+scatter).
    x_bf = x_flat.astype(jnp.bfloat16)
    if (n_pad - n) or (chw_pad - chw):
        x_bf = jnp.pad(x_bf, ((0, n_pad - n), (0, chw_pad - chw)))

    k_steps = chw_pad // tk
    grid = (n_pad // tm, k_steps)

    small = [kparams["feat_b"], kparams["hw1"], kparams["hb1"],
             kparams["cw2"], kparams["cb2"], kparams["cw3"], kparams["cb3"],
             kparams["dw2"], kparams["db2"]]

    # feat_w is the dominant HBM stream; deepen its pipeline on long K grids.
    if k_steps >= 3:
        fw_spec = pl.BlockSpec((tk, IN_FEATURES), lambda i, k: (k, 0),
                               pipeline_mode=pl.Buffered(3))
    else:
        fw_spec = pl.BlockSpec((tk, IN_FEATURES), lambda i, k: (k, 0))

    in_specs = (
        [pl.BlockSpec((tm, tk), lambda i, k: (i, k)),            # x tile
         fw_spec]                                                # feat_w tile (bf16)
        + [pl.BlockSpec(a.shape, lambda i, k: (0, 0)) for a in small]
    )
    out_specs = [
        pl.BlockSpec((tm, nc_pad), lambda i, k: (i, 0)),
        pl.BlockSpec((tm, LANE), lambda i, k: (i, 0)),
    ]

    m_tiles = n_pad // tm
    flops = 2 * n_pad * chw_pad * IN_FEATURES + 2 * n_pad * (
        IN_FEATURES * 2 * HIDDEN_PAD
        + HIDDEN_PAD * HIDDEN_PAD
        + HIDDEN_PAD * nc_pad
        + HIDDEN_PAD * LANE)
    bytes_accessed = (int(x_bf.size) * 2                              # bf16 activations
                      + m_tiles * int(kparams["feat_w"].size) * 2     # weight re-streams
                      + sum(int(a.size) * a.dtype.itemsize for a in small)
                      + n_pad * (nc_pad + LANE) * 4)                  # outputs
    cost = pl.CostEstimate(flops=int(flops),
                           transcendentals=int(n_pad * (nc_pad + LANE)),
                           bytes_accessed=int(bytes_accessed))

    cls_pad, dom_pad = pl.pallas_call(
        _dann_fused_kernel,
        out_shape=(jax.ShapeDtypeStruct((n_pad, nc_pad), jnp.float32),
                   jax.ShapeDtypeStruct((n_pad, LANE), jnp.float32)),
        grid_spec=pltpu.PrefetchScalarGridSpec(
            num_scalar_prefetch=0,
            grid=grid,
            in_specs=in_specs,
            out_specs=out_specs,
            scratch_shapes=[pltpu.VMEM((tm, IN_FEATURES), jnp.float32)],
        ),
        compiler_params=pltpu.CompilerParams(
            dimension_semantics=("parallel", "arbitrary"),
            vmem_limit_bytes=_pick_vmem_limit(),
        ),
        cost_estimate=cost,
        interpret=interpret,
    )(x_bf, kparams["feat_w"], *small)

    return cls_pad[:n, :num_classes], dom_pad[:n, :NUM_DOMAINS]


# ----------------------------------------------------------------------------
# Parameter preparation: BN fold (eval), lane padding, head concat, bf16 weights,
# masking baked into -1e30 padded bias columns.
# ----------------------------------------------------------------------------
def prepare_params(raw, *, max_tk=2048):
    chw = raw["feat_w"].shape[0]
    chw_pad = _round_up(chw, LANE)
    tk = _pick_tk(chw_pad, max_tk)
    num_classes = raw["num_classes"]
    nc_pad = _round_up(num_classes, LANE)

    def fold_bn(w, b, gamma, beta, mean, var):
        scale = gamma * jax.lax.rsqrt(var + BN_EPS)   # (1, dim)
        return w * scale, (b - mean) * scale + beta

    def pad2(a, rows, cols, fill=0.0):
        out = jnp.full((rows, cols), fill, jnp.float32)
        return out.at[: a.shape[0], : a.shape[1]].set(a.astype(jnp.float32))

    # Feature projection: bf16 in HBM (halves the dominant weight traffic).
    feat_w = pad2(raw["feat_w"], chw_pad, IN_FEATURES).astype(jnp.bfloat16)
    feat_b = raw["feat_b"].astype(jnp.float32)

    (c_w1, c_b1, c_g1, c_be1, c_m1, c_v1,
     c_w2, c_b2, c_g2, c_be2, c_m2, c_v2,
     c_w3, c_b3) = raw["class"]
    (d_w1, d_b1, d_g1, d_be1, d_m1, d_v1, d_w2, d_b2) = raw["domain"]

    cw1f, cb1f = fold_bn(c_w1, c_b1, c_g1, c_be1, c_m1, c_v1)
    cw2f, cb2f = fold_bn(c_w2, c_b2, c_g2, c_be2, c_m2, c_v2)
    dw1f, db1f = fold_bn(d_w1, d_b1, d_g1, d_be1, d_m1, d_v1)

    # Concatenate first layers of both heads: (1024, 256) / (1, 256).
    hw1 = jnp.concatenate([pad2(cw1f, IN_FEATURES, HIDDEN_PAD),
                           pad2(dw1f, IN_FEATURES, HIDDEN_PAD)], axis=1)
    hb1 = jnp.concatenate([pad2(cb1f, 1, HIDDEN_PAD),
                           pad2(db1f, 1, HIDDEN_PAD)], axis=1)

    return {
        "tk": tk, "chw": chw, "chw_pad": chw_pad,
        "num_classes": num_classes, "nc_pad": nc_pad,
        "feat_w": feat_w, "feat_b": feat_b,
        "hw1": hw1.astype(jnp.bfloat16), "hb1": hb1,
        "cw2": pad2(cw2f, HIDDEN_PAD, HIDDEN_PAD).astype(jnp.bfloat16),
        "cb2": pad2(cb2f, 1, HIDDEN_PAD),
        "cw3": pad2(c_w3, HIDDEN_PAD, nc_pad).astype(jnp.bfloat16),
        "cb3": pad2(c_b3, 1, nc_pad, fill=NEG_INF),   # mask baked into the bias
        "dw2": pad2(d_w2, HIDDEN_PAD, LANE).astype(jnp.bfloat16),
        "db2": pad2(d_b2, 1, LANE, fill=NEG_INF),     # mask baked into the bias
    }


# Pure-JAX reference on the prepared (folded/padded) parameters.
def dann_reference(input_data, kparams):
    n = input_data.shape[0]
    chw = kparams["chw"]
    hp = jax.lax.Precision.HIGHEST

    def bf(a):  # emulate the kernel's bf16 activation rounding
        return a.astype(jnp.bfloat16).astype(jnp.float32)

    x = bf(input_data.reshape(n, -1))
    fw = kparams["feat_w"][:chw].astype(jnp.float32)
    feat = jnp.dot(x, fw, precision=hp) + kparams["feat_b"]
    h1 = jnp.maximum(jnp.dot(bf(feat), kparams["hw1"].astype(jnp.float32),
                             precision=hp) + kparams["hb1"], 0.0)
    hc, hd = h1[:, :HIDDEN_PAD], h1[:, HIDDEN_PAD:]
    h2 = jnp.maximum(jnp.dot(bf(hc), kparams["cw2"].astype(jnp.float32),
                             precision=hp) + kparams["cb2"], 0.0)
    cl = jnp.dot(bf(h2), kparams["cw3"].astype(jnp.float32), precision=hp) + kparams["cb3"]
    dl = jnp.dot(bf(hd), kparams["dw2"].astype(jnp.float32), precision=hp) + kparams["db2"]
    nc = kparams["num_classes"]
    return (jax.nn.log_softmax(cl[:, :nc], axis=1),
            jax.nn.log_softmax(dl[:, :NUM_DOMAINS], axis=1))


# ----------------------------------------------------------------------------
# Deterministic parameter init (synthetic; shapes from the module __init__)
# ----------------------------------------------------------------------------
def init_params(key, chw, num_classes):
    ks = list(jax.random.split(key, 16))

    def w(k, shape, scale=0.02):
        return (scale * jax.random.normal(k, shape)).astype(jnp.float32)

    def bn(k, dim):
        k1, k2, k3, k4 = jax.random.split(k, 4)
        gamma = (1.0 + 0.01 * jax.random.normal(k1, (1, dim))).astype(jnp.float32)
        beta = (0.01 * jax.random.normal(k2, (1, dim))).astype(jnp.float32)
        mean = (0.01 * jax.random.normal(k3, (1, dim))).astype(jnp.float32)
        var = (1.0 + 0.1 * jnp.abs(jax.random.normal(k4, (1, dim)))).astype(jnp.float32)
        return gamma, beta, mean, var

    feat_w = w(ks[0], (chw, IN_FEATURES))
    feat_b = jnp.zeros((1, IN_FEATURES), jnp.float32)

    c_w1 = w(ks[1], (IN_FEATURES, HIDDEN))
    c_b1 = jnp.zeros((1, HIDDEN), jnp.float32)
    c_bn1 = bn(ks[2], HIDDEN)
    c_w2 = w(ks[3], (HIDDEN, HIDDEN))
    c_b2 = jnp.zeros((1, HIDDEN), jnp.float32)
    c_bn2 = bn(ks[4], HIDDEN)
    c_w3 = w(ks[5], (HIDDEN, num_classes))
    c_b3 = jnp.zeros((1, num_classes), jnp.float32)

    d_w1 = w(ks[6], (IN_FEATURES, HIDDEN))
    d_b1 = jnp.zeros((1, HIDDEN), jnp.float32)
    d_bn1 = bn(ks[7], HIDDEN)
    d_w2 = w(ks[8], (HIDDEN, NUM_DOMAINS))
    d_b2 = jnp.zeros((1, NUM_DOMAINS), jnp.float32)

    return {
        "feat_w": feat_w,
        "feat_b": feat_b,
        "class": (c_w1, c_b1, *c_bn1, c_w2, c_b2, *c_bn2, c_w3, c_b3),
        "domain": (d_w1, d_b1, *d_bn1, d_w2, d_b2),
        "num_classes": num_classes,
    }


# ----------------------------------------------------------------------------
if __name__ == "__main__":
    key = jax.random.PRNGKey(0)
    k_x, k_p = jax.random.split(key)

    N, C, H, W = 2, 4, 16, 16          # C*H*W = 1024 -> projected to IN_FEATURES
    NUM_CLASSES = 10
    alpha = 0.1

    x = jax.random.normal(k_x, (N, C, H, W), dtype=jnp.float32)
    raw_params = init_params(k_p, C * H * W, NUM_CLASSES)
    kparams = prepare_params(raw_params)      # tk auto-picked (=1024 here)

    class_out, domain_out = dann_forward(x, alpha, kparams)
    class_out = jax.block_until_ready(class_out)
    domain_out = jax.block_until_ready(domain_out)

    assert class_out.shape == (N, NUM_CLASSES)
    assert domain_out.shape == (N, NUM_DOMAINS)
    # log-softmax rows must logsumexp to ~0
    assert bool(jnp.all(jnp.abs(jax.nn.logsumexp(class_out, axis=1)) < 1e-3))
    assert bool(jnp.all(jnp.abs(jax.nn.logsumexp(domain_out, axis=1)) < 1e-3))
    assert bool(jnp.all(jnp.isfinite(class_out)))
    assert bool(jnp.all(jnp.isfinite(domain_out)))

    # compare against a pure-JAX reference on the same prepared parameters
    ref_cls, ref_dom = dann_reference(x, kparams)
    assert bool(jnp.all(jnp.abs(class_out - ref_cls) < 2e-2))
    assert bool(jnp.all(jnp.abs(domain_out - ref_dom) < 2e-2))

    print("KERNEL_OK")
</pallas_src>

<mosaic_0001>
module attributes {stable_mosaic.version = 11 : i64} {
  func.func @_dann_fused_kernel(%arg0: i32, %arg1: i32, %arg2: memref<8x1024xbf16, #tpu.memory_space<vmem>>, %arg3: memref<1024x1024xbf16, #tpu.memory_space<vmem>>, %arg4: memref<1x1024xf32, #tpu.memory_space<vmem>>, %arg5: memref<1024x256xbf16, #tpu.memory_space<vmem>>, %arg6: memref<1x256xf32, #tpu.memory_space<vmem>>, %arg7: memref<128x128xbf16, #tpu.memory_space<vmem>>, %arg8: memref<1x128xf32, #tpu.memory_space<vmem>>, %arg9: memref<128x128xbf16, #tpu.memory_space<vmem>>, %arg10: memref<1x128xf32, #tpu.memory_space<vmem>>, %arg11: memref<128x128xbf16, #tpu.memory_space<vmem>>, %arg12: memref<1x128xf32, #tpu.memory_space<vmem>>, %arg13: memref<8x128xf32, #tpu.memory_space<vmem>>, %arg14: memref<8x128xf32, #tpu.memory_space<vmem>>, %arg15: memref<8x1024xf32, #tpu.memory_space<vmem>>) attributes {dimension_semantics = [#tpu.dimension_semantics<parallel>, #tpu.dimension_semantics<arbitrary>], iteration_bounds = array<i64: 1, 1>, scalar_prefetch = 0 : i64, scratch_operands = 1 : i64, tpu.core_type = #tpu.core_type<tc>, window_params = [{transform_indices = @transform_0, window_bounds = array<i64: 8, 1024>}, {transform_indices = @transform_1, window_bounds = array<i64: 1024, 1024>}, {pipeline_mode = #tpu.pipeline_mode<synchronous>, transform_indices = @transform_2, window_bounds = array<i64: 1, 1024>}, {pipeline_mode = #tpu.pipeline_mode<synchronous>, transform_indices = @transform_3, window_bounds = array<i64: 1024, 256>}, {pipeline_mode = #tpu.pipeline_mode<synchronous>, transform_indices = @transform_4, window_bounds = array<i64: 1, 256>}, {pipeline_mode = #tpu.pipeline_mode<synchronous>, transform_indices = @transform_5, window_bounds = array<i64: 128, 128>}, {pipeline_mode = #tpu.pipeline_mode<synchronous>, transform_indices = @transform_6, window_bounds = array<i64: 1, 128>}, {pipeline_mode = #tpu.pipeline_mode<synchronous>, transform_indices = @transform_7, window_bounds = array<i64: 128, 128>}, {pipeline_mode = #tpu.pipeline_mode<synchronous>, transform_indices = @transform_8, window_bounds = array<i64: 1, 128>}, {pipeline_mode = #tpu.pipeline_mode<synchronous>, transform_indices = @transform_9, window_bounds = array<i64: 128, 128>}, {pipeline_mode = #tpu.pipeline_mode<synchronous>, transform_indices = @transform_10, window_bounds = array<i64: 1, 128>}, {transform_indices = @transform_11, window_bounds = array<i64: 8, 128>}, {transform_indices = @transform_12, window_bounds = array<i64: 8, 128>}]} {
    %c0_i32 = arith.constant 0 : i32
    %0 = arith.cmpi eq, %arg1, %c0_i32 : i32
    %1 = arith.extui %0 : i1 to i32
    %c0_i32_0 = arith.constant 0 : i32
    %2 = arith.cmpi ne, %1, %c0_i32_0 : i32
    scf.if %2 {
      %c0_10 = arith.constant 0 : index
      %c0_11 = arith.constant 0 : index
      %12 = vector.load %arg4[%c0_10, %c0_11] : memref<1x1024xf32, #tpu.memory_space<vmem>>, vector<1x1024xf32>
      %13 = vector.shape_cast %12 : vector<1x1024xf32> to vector<1x1024xf32>
      %14 = vector.broadcast %13 : vector<1x1024xf32> to vector<8x1024xf32>
      %c0_12 = arith.constant 0 : index
      %c0_13 = arith.constant 0 : index
      %15 = vector.load %arg15[%c0_12, %c0_13] : memref<8x1024xf32, #tpu.memory_space<vmem>>, vector<8x1024xf32>
      tpu.vector_store %arg15[%c0_12, %c0_13], %14 {strides = array<i32>} : memref<8x1024xf32, #tpu.memory_space<vmem>>, vector<8x1024xf32>,
    } else {
    }
    %c0 = arith.constant 0 : index
    %c0_1 = arith.constant 0 : index
    %3 = vector.load %arg15[%c0, %c0_1] : memref<8x1024xf32, #tpu.memory_space<vmem>>, vector<8x1024xf32>
    %c0_2 = arith.constant 0 : index
    %c0_3 = arith.constant 0 : index
    %4 = vector.load %arg2[%c0_2, %c0_3] : memref<8x1024xbf16, #tpu.memory_space<vmem>>, vector<8x1024xbf16>
    %c0_4 = arith.constant 0 : index
    %c0_5 = arith.constant 0 : index
    %5 = vector.load %arg3[%c0_4, %c0_5] : memref<1024x1024xbf16, #tpu.memory_space<vmem>>, vector<1024x1024xbf16>
    %cst = arith.constant dense<0.000000e+00> : vector<8x1024xf32>
    %6 = tpu.matmul %4, %5, %cst {dimension_numbers = #tpu.dot_dimension_numbers<[1], [0], [0], [1], [0, 0, 1, 1], [], []>} : vector<8x1024xbf16>, vector<1024x1024xbf16>, vector<8x1024xf32> -> vector<8x1024xf32>
    %7 = arith.addf %3, %6 : vector<8x1024xf32>
    %c0_6 = arith.constant 0 : index
    %c0_7 = arith.constant 0 : index
    %8 = vector.load %arg15[%c0_6, %c0_7] : memref<8x1024xf32, #tpu.memory_space<vmem>>, vector<8x1024xf32>
    tpu.vector_store %arg15[%c0_6, %c0_7], %7 {strides = array<i32>} : memref<8x1024xf32, #tpu.memory_space<vmem>>, vector<8x1024xf32>,
    %c0_i32_8 = arith.constant 0 : i32
    %9 = arith.cmpi eq, %arg1, %c0_i32_8 : i32
    %10 = arith.extui %9 : i1 to i32
    %c0_i32_9 = arith.constant 0 : i32
    %11 = arith.cmpi ne, %10, %c0_i32_9 : i32
    scf.if %11 {
      %c0_10 = arith.constant 0 : index
      %c0_11 = arith.constant 0 : index
      %12 = vector.load %arg15[%c0_10, %c0_11] : memref<8x1024xf32, #tpu.memory_space<vmem>>, vector<8x1024xf32>
      %13 = arith.truncf %12 : vector<8x1024xf32> to vector<8x1024xbf16>
      %c0_12 = arith.constant 0 : index
      %c0_13 = arith.constant 0 : index
      %14 = vector.load %arg5[%c0_12, %c0_13] : memref<1024x256xbf16, #tpu.memory_space<vmem>>, vector<1024x256xbf16>
      %cst_14 = arith.constant dense<0.000000e+00> : vector<8x256xf32>
      %15 = tpu.matmul %13, %14, %cst_14 {dimension_numbers = #tpu.dot_dimension_numbers<[1], [0], [0], [1], [0, 0, 1, 1], [], []>} : vector<8x1024xbf16>, vector<1024x256xbf16>, vector<8x256xf32> -> vector<8x256xf32>
      %c0_15 = arith.constant 0 : index
      %c0_16 = arith.constant 0 : index
      %16 = vector.load %arg6[%c0_15, %c0_16] : memref<1x256xf32, #tpu.memory_space<vmem>>, vector<1x256xf32>
      %17 = vector.broadcast %16 : vector<1x256xf32> to vector<8x256xf32>
      %18 = arith.addf %15, %17 : vector<8x256xf32>
      %cst_17 = arith.constant 0.000000e+00 : f32
      %19 = vector.broadcast %cst_17 : f32 to vector<8x256xf32>
      %20 = arith.maximumf %18, %19 : vector<8x256xf32>
      %21 = vector.extract_strided_slice %20 {offsets = [0, 0], sizes = [8, 128], strides = [1, 1]} : vector<8x256xf32> to vector<8x128xf32>
      %22 = vector.extract_strided_slice %20 {offsets = [0, 128], sizes = [8, 128], strides = [1, 1]} : vector<8x256xf32> to vector<8x128xf32>
      %23 = arith.truncf %21 : vector<8x128xf32> to vector<8x128xbf16>
      %c0_18 = arith.constant 0 : index
      %c0_19 = arith.constant 0 : index
      %24 = vector.load %arg7[%c0_18, %c0_19] : memref<128x128xbf16, #tpu.memory_space<vmem>>, vector<128x128xbf16>
      %cst_20 = arith.constant dense<0.000000e+00> : vector<8x128xf32>
      %25 = tpu.matmul %23, %24, %cst_20 {dimension_numbers = #tpu.dot_dimension_numbers<[1], [0], [0], [1], [0, 0, 1, 1], [], []>} : vector<8x128xbf16>, vector<128x128xbf16>, vector<8x128xf32> -> vector<8x128xf32>
      %c0_21 = arith.constant 0 : index
      %c0_22 = arith.constant 0 : index
      %26 = vector.load %arg8[%c0_21, %c0_22] : memref<1x128xf32, #tpu.memory_space<vmem>>, vector<1x128xf32>
      %27 = vector.broadcast %26 : vector<1x128xf32> to vector<8x128xf32>
      %28 = arith.addf %25, %27 : vector<8x128xf32>
      %cst_23 = arith.constant 0.000000e+00 : f32
      %29 = vector.broadcast %cst_23 : f32 to vector<8x128xf32>
      %30 = arith.maximumf %28, %29 : vector<8x128xf32>
      %31 = arith.truncf %30 : vector<8x128xf32> to vector<8x128xbf16>
      %c0_24 = arith.constant 0 : index
      %c0_25 = arith.constant 0 : index
      %32 = vector.load %arg9[%c0_24, %c0_25] : memref<128x128xbf16, #tpu.memory_space<vmem>>, vector<128x128xbf16>
      %cst_26 = arith.constant dense<0.000000e+00> : vector<8x128xf32>
      %33 = tpu.matmul %31, %32, %cst_26 {dimension_numbers = #tpu.dot_dimension_numbers<[1], [0], [0], [1], [0, 0, 1, 1], [], []>} : vector<8x128xbf16>, vector<128x128xbf16>, vector<8x128xf32> -> vector<8x128xf32>
      %c0_27 = arith.constant 0 : index
      %c0_28 = arith.constant 0 : index
      %34 = vector.load %arg10[%c0_27, %c0_28] : memref<1x128xf32, #tpu.memory_space<vmem>>, vector<1x128xf32>
      %35 = vector.broadcast %34 : vector<1x128xf32> to vector<8x128xf32>
      %36 = arith.addf %33, %35 : vector<8x128xf32>
      %cst_29 = arith.constant dense<0xFF800000> : vector<8xf32>
      %37 = vector.multi_reduction <maximumf>, %36, %cst_29 [1] : vector<8x128xf32> to vector<8xf32>
      %38 = vector.shape_cast %37 : vector<8xf32> to vector<8x1xf32>
      %39 = vector.broadcast %38 : vector<8x1xf32> to vector<8x128xf32>
      %40 = arith.subf %36, %39 : vector<8x128xf32>
      %41 = math.exp %40 : vector<8x128xf32>
      %cst_30 = arith.constant dense<0.000000e+00> : vector<8xf32>
      %42 = vector.multi_reduction <add>, %41, %cst_30 [1] : vector<8x128xf32> to vector<8xf32>
      %43 = vector.shape_cast %42 : vector<8xf32> to vector<8x1xf32>
      %44 = math.log %43 : vector<8x1xf32>
      %45 = vector.broadcast %44 : vector<8x1xf32> to vector<8x128xf32>
      %46 = arith.subf %40, %45 : vector<8x128xf32>
      %c0_31 = arith.constant 0 : index
      %c0_32 = arith.constant 0 : index
      %47 = vector.load %arg13[%c0_31, %c0_32] : memref<8x128xf32, #tpu.memory_space<vmem>>, vector<8x128xf32>
      tpu.vector_store %arg13[%c0_31, %c0_32], %46 {strides = array<i32>} : memref<8x128xf32, #tpu.memory_space<vmem>>, vector<8x128xf32>,
      %48 = arith.truncf %22 : vector<8x128xf32> to vector<8x128xbf16>
      %c0_33 = arith.constant 0 : index
      %c0_34 = arith.constant 0 : index
      %49 = vector.load %arg11[%c0_33, %c0_34] : memref<128x128xbf16, #tpu.memory_space<vmem>>, vector<128x128xbf16>
      %cst_35 = arith.constant dense<0.000000e+00> : vector<8x128xf32>
      %50 = tpu.matmul %48, %49, %cst_35 {dimension_numbers = #tpu.dot_dimension_numbers<[1], [0], [0], [1], [0, 0, 1, 1], [], []>} : vector<8x128xbf16>, vector<128x128xbf16>, vector<8x128xf32> -> vector<8x128xf32>
      %c0_36 = arith.constant 0 : index
      %c0_37 = arith.constant 0 : index
      %51 = vector.load %arg12[%c0_36, %c0_37] : memref<1x128xf32, #tpu.memory_space<vmem>>, vector<1x128xf32>
      %52 = vector.broadcast %51 : vector<1x128xf32> to vector<8x128xf32>
      %53 = arith.addf %50, %52 : vector<8x128xf32>
      %cst_38 = arith.constant dense<0xFF800000> : vector<8xf32>
      %54 = vector.multi_reduction <maximumf>, %53, %cst_38 [1] : vector<8x128xf32> to vector<8xf32>
      %55 = vector.shape_cast %54 : vector<8xf32> to vector<8x1xf32>
      %56 = vector.broadcast %55 : vector<8x1xf32> to vector<8x128xf32>
      %57 = arith.subf %53, %56 : vector<8x128xf32>
      %58 = math.exp %57 : vector<8x128xf32>
      %cst_39 = arith.constant dense<0.000000e+00> : vector<8xf32>
      %59 = vector.multi_reduction <add>, %58, %cst_39 [1] : vector<8x128xf32> to vector<8xf32>
      %60 = vector.shape_cast %59 : vector<8xf32> to vector<8x1xf32>
      %61 = math.log %60 : vector<8x1xf32>
      %62 = vector.broadcast %61 : vector<8x1xf32> to vector<8x128xf32>
      %63 = arith.subf %57, %62 : vector<8x128xf32>
      %c0_40 = arith.constant 0 : index
      %c0_41 = arith.constant 0 : index
      %64 = vector.load %arg14[%c0_40, %c0_41] : memref<8x128xf32, #tpu.memory_space<vmem>>, vector<8x128xf32>
      tpu.vector_store %arg14[%c0_40, %c0_41], %63 {strides = array<i32>} : memref<8x128xf32, #tpu.memory_space<vmem>>, vector<8x128xf32>,
    } else {
    }
    return
  }
  func.func @transform_0(%arg0: i32, %arg1: i32) -> (i32, i32) {
    %c0_i32 = arith.constant 0 : i32
    return %arg0, %arg1 : i32, i32
  }
  func.func @transform_1(%arg0: i32, %arg1: i32) -> (i32, i32) {
    %c0_i32 = arith.constant 0 : i32
    %c0_i32_0 = arith.constant 0 : i32
    return %arg1, %c0_i32 : i32, i32
  }
  func.func @transform_2(%arg0: i32, %arg1: i32) -> (i32, i32) {
    %c0_i32 = arith.constant 0 : i32
    %c0_i32_0 = arith.constant 0 : i32
    %c0_i32_1 = arith.constant 0 : i32
    return %c0_i32, %c0_i32_0 : i32, i32
  }
  func.func @transform_3(%arg0: i32, %arg1: i32) -> (i32, i32) {
    %c0_i32 = arith.constant 0 : i32
    %c0_i32_0 = arith.constant 0 : i32
    %c0_i32_1 = arith.constant 0 : i32
    return %c0_i32, %c0_i32_0 : i32, i32
  }
  func.func @transform_4(%arg0: i32, %arg1: i32) -> (i32, i32) {
    %c0_i32 = arith.constant 0 : i32
    %c0_i32_0 = arith.constant 0 : i32
    %c0_i32_1 = arith.constant 0 : i32
    return %c0_i32, %c0_i32_0 : i32, i32
  }
  func.func @transform_5(%arg0: i32, %arg1: i32) -> (i32, i32) {
    %c0_i32 = arith.constant 0 : i32
    %c0_i32_0 = arith.constant 0 : i32
    %c0_i32_1 = arith.constant 0 : i32
    return %c0_i32, %c0_i32_0 : i32, i32
  }
  func.func @transform_6(%arg0: i32, %arg1: i32) -> (i32, i32) {
    %c0_i32 = arith.constant 0 : i32
    %c0_i32_0 = arith.constant 0 : i32
    %c0_i32_1 = arith.constant 0 : i32
    return %c0_i32, %c0_i32_0 : i32, i32
  }
  func.func @transform_7(%arg0: i32, %arg1: i32) -> (i32, i32) {
    %c0_i32 = arith.constant 0 : i32
    %c0_i32_0 = arith.constant 0 : i32
    %c0_i32_1 = arith.constant 0 : i32
    return %c0_i32, %c0_i32_0 : i32, i32
  }
  func.func @transform_8(%arg0: i32, %arg1: i32) -> (i32, i32) {
    %c0_i32 = arith.constant 0 : i32
    %c0_i32_0 = arith.constant 0 : i32
    %c0_i32_1 = arith.constant 0 : i32
    return %c0_i32, %c0_i32_0 : i32, i32
  }
  func.func @transform_9(%arg0: i32, %arg1: i32) -> (i32, i32) {
    %c0_i32 = arith.constant 0 : i32
    %c0_i32_0 = arith.constant 0 : i32
    %c0_i32_1 = arith.constant 0 : i32
    return %c0_i32, %c0_i32_0 : i32, i32
  }
  func.func @transform_10(%arg0: i32, %arg1: i32) -> (i32, i32) {
    %c0_i32 = arith.constant 0 : i32
    %c0_i32_0 = arith.constant 0 : i32
    %c0_i32_1 = arith.constant 0 : i32
    return %c0_i32, %c0_i32_0 : i32, i32
  }
  func.func @transform_11(%arg0: i32, %arg1: i32) -> (i32, i32) {
    %c0_i32 = arith.constant 0 : i32
    %c0_i32_0 = arith.constant 0 : i32
    return %arg0, %c0_i32 : i32, i32
  }
  func.func @transform_12(%arg0: i32, %arg1: i32) -> (i32, i32) {
    %c0_i32 = arith.constant 0 : i32
    %c0_i32_0 = arith.constant 0 : i32
    return %arg0, %c0_i32 : i32, i32
  }
}

</mosaic_0001>

<bundles_post_ra>
// kernel: tpu_custom_call.1
= control target key start
LH: loop header
LB: loop body
LE: loop exit
PB: predicated region body
PF: predicated region fallthrough
CT: control target
= control target key end

     0   :  { %18 = vsyncpa [#allocation4], 0  ;;  %s9489_s0 = inlined_call_operand.hbm [shape: bf16[8,1024], index: 0, kind: input, shape index: {}]   ;;  %s9490_s1 = inlined_call_operand.hbm [shape: bf16[1024,1024], index: 1, kind: input, shape index: {}]   ;;  %s9491_s2 = inlined_call_operand.hbm [shape: f32[1,1024], index: 2, kind: input, shape index: {}]   ;;  %s9492_s3 = inlined_call_operand.hbm [shape: bf16[1024,256], index: 3, kind: input, shape index: {}]   ;;  %s9493_s4 = inlined_call_operand.hbm [shape: f32[1,256], index: 4, kind: input, shape index: {}]   ;;  %s9494_s5 = inlined_call_operand.hbm [shape: bf16[128,128], index: 5, kind: input, shape index: {}]   ;;  %s9495_s6 = inlined_call_operand.hbm [shape: f32[1,128], index: 6, kind: input, shape index: {}]   ;;  %s9496_s7 = inlined_call_operand.hbm [shape: bf16[128,128], index: 7, kind: input, shape index: {}]   ;;  %s9497_s8 = inlined_call_operand.hbm [shape: f32[1,128], index: 8, kind: input, shape index: {}]   ;;  %s9498_s9 = inlined_call_operand.hbm [shape: bf16[128,128], index: 9, kind: input, shape index: {}]   ;;  %s9499_s10 = inlined_call_operand.hbm [shape: f32[1,128], index: 10, kind: input, shape index: {}]   ;;  %s9500_s11 = inlined_call_operand.hbm [shape: f32[8,128], index: 11, kind: output, shape index: {0}]   ;;  %s9501_s12 = inlined_call_operand.hbm [shape: f32[8,128], index: 12, kind: output, shape index: {1}]  }
   0x1   :  { %19 = vsyncpa [#allocation7], 0 }
   0x2   :  { %20 = vsyncpa [#allocation10], 0 }
   0x3   :  { %21 = vsyncpa [#allocation13], 0 }
   0x4   :  { %22 = vsyncpa [#allocation16], 0 }
   0x5   :  { %23 = vsyncpa [#allocation19], 0 }
   0x6   :  { %24 = vsyncpa [#allocation5], 0  ;;  %s41_s23 = sshll.u32 %s9490_s1, 4  ;;  %s42_s23 = int_to_ptr.hbm [resolvable:$true] %s41_s23 }
   0x7   :  { %25 = vsyncpa [#allocation23], 0  ;;  %s9179_s24 = smov [#allocation6]   ;;  %s65_s28 = sshll.u32 %s9492_s3, 4  ;;  %s66_s28 = int_to_ptr.hbm [resolvable:$true] %s65_s28 }
   0x8   :  { %s43_s25 = sshll.u32 %s9179_s24, 4  ;;  %s9180_s29 = smov 512   ;;  %s44_s25 = int_to_ptr.vmem [resolvable:$true] %s43_s25 }
   0x9   :  { %s9181_s30 = smov 32   ;;  %s9182_s13 = smov [#allocation9]  }
   0xa   :  { %49 = dma.hbm_to_vmem [thread:$0]  %s42_s23, 65536, %s44_s25, [#allocation7], %s9180_s29, %s9180_s29, %s9181_s30  }
   0xb   :  { %s67_s14 = sshll.u32 %s9182_s13, 4  ;;  %s9183_s15 = smov 128   ;;  %s68_s14 = int_to_ptr.vmem [resolvable:$true] %s67_s14 }
   0xc   :  { %s9184_s16 = smov 8   ;;  %s89_s18 = sshll.u32 %s9494_s5, 4  ;;  %s90_s18 = int_to_ptr.hbm [resolvable:$true] %s89_s18 }
   0xd   :  { %73 = dma.hbm_to_vmem [thread:$0]  %s66_s28, 16384, %s68_s14, [#allocation10], %s9183_s15, %s9183_s15, %s9184_s16  }
   0xe   :  { %s9185_s19 = smov [#allocation12]   ;;  %s113_s22 = sshll.u32 %s9496_s7, 4  ;;  %s114_s22 = int_to_ptr.hbm [resolvable:$true] %s113_s22 }
   0xf   :  { %s91_s20 = sshll.u32 %s9185_s19, 4  ;;  %s9186_s23 = smov 64   ;;  %s92_s20 = int_to_ptr.vmem [resolvable:$true] %s91_s20 }
  0x10   :  { %s9187_s24 = smov 4   ;;  %s9188_s25 = smov [#allocation15]  }
  0x11   :  { %97 = dma.hbm_to_vmem [thread:$0]  %s90_s18, 1024, %s92_s20, [#allocation13], %s9186_s23, %s9186_s23, %s9187_s24  }
  0x12   :  { %s115_s26 = sshll.u32 %s9188_s25, 4  ;;  %s137_s29 = sshll.u32 %s9498_s9, 4  ;;  %s116_s26 = int_to_ptr.vmem [resolvable:$true] %s115_s26  ;;  %s138_s29 = int_to_ptr.hbm [resolvable:$true] %s137_s29 }
  0x13   :  { %121 = dma.hbm_to_vmem [thread:$0]  %s114_s22, 1024, %s116_s26, [#allocation16], %s9186_s23, %s9186_s23, %s9187_s24  }
  0x14   :  { %s31_s13 = sshll.u32 %s9489_s0, 4  ;;  %s9189_s14 = smov [#allocation18]   ;;  %s32_s13 = int_to_ptr.hbm [resolvable:$true] %s31_s13 }
  0x15   :  { %s139_s15 = sshll.u32 %s9189_s14, 4  ;;  %s9190_s7 = smov [#allocation3]   ;;  %s140_s15 = int_to_ptr.vmem [resolvable:$true] %s139_s15 }
  0x16   :  { %145 = dma.hbm_to_vmem [thread:$0]  %s138_s29, 1024, %s140_s15, [#allocation19], %s9186_s23, %s9186_s23, %s9187_s24  }
  0x17   :  { %s33_s16 = sshll.u32 %s9190_s7, 4  ;;  %s55_s18 = sshll.u32 %s9491_s2, 4  ;;  %s34_s16 = int_to_ptr.vmem [resolvable:$true] %s33_s16  ;;  %s56_s18 = int_to_ptr.hbm [resolvable:$true] %s55_s18 }
  0x18   :  { %36 = dma.hbm_to_vmem [thread:$0]  %s32_s13, 512, %s34_s16, [#allocation4]  }
  0x19   :  { %s79_s20 = sshll.u32 %s9493_s4, 4  ;;  %s9191_s21 = smov [#allocation8]   ;;  %s80_s20 = int_to_ptr.hbm [resolvable:$true] %s79_s20 }
  0x1a   :  { %s57_s0 = sshll.u32 %s9191_s21, 4  ;;  %s9192_s3 = smov [#allocation11]   ;;  %s58_s0 = int_to_ptr.vmem [resolvable:$true] %s57_s0 }
  0x1b   :  { %60 = dma.hbm_to_vmem [thread:$0]  %s56_s18, 128, %s58_s0, [#allocation7]  }
  0x1c   :  { %s81_s22 = sshll.u32 %s9192_s3, 4  ;;  %s103_s25 = sshll.u32 %s9495_s6, 4  ;;  %s82_s22 = int_to_ptr.vmem [resolvable:$true] %s81_s22  ;;  %s104_s25 = int_to_ptr.hbm [resolvable:$true] %s103_s25 }
  0x1d   :  { %84 = dma.hbm_to_vmem [thread:$0]  %s80_s20, 32, %s82_s22, [#allocation10]  }
  0x1e   :  { %s127_s27 = sshll.u32 %s9497_s8, 4  ;;  %s9193_s28 = smov [#allocation14]   ;;  %s128_s27 = int_to_ptr.hbm [resolvable:$true] %s127_s27 }
  0x1f   :  { %s105_s4 = sshll.u32 %s9193_s28, 4  ;;  %s9194_s29 = smov [#allocation17]   ;;  %s106_s4 = int_to_ptr.vmem [resolvable:$true] %s105_s4 }
  0x20   :  { %108 = dma.hbm_to_vmem [thread:$0]  %s104_s25, 16, %s106_s4, [#allocation13]  }
  0x21   :  { %s129_s5 = sshll.u32 %s9194_s29, 4  ;;  %s151_s14 = sshll.u32 %s9499_s10, 4  ;;  %s130_s5 = int_to_ptr.vmem [resolvable:$true] %s129_s5  ;;  %s152_s14 = int_to_ptr.hbm [resolvable:$true] %s151_s14 }
  0x22   :  { %132 = dma.hbm_to_vmem [thread:$0]  %s128_s27, 16, %s130_s5, [#allocation16]  }
  0x23   :  { %s9195_s6 = smov [#allocation20]  }
  0x24   :  { %s153_s15 = sshll.u32 %s9195_s6, 4  ;;  %s154_s15 = int_to_ptr.vmem [resolvable:$true] %s153_s15 }
  0x25   :  { %156 = dma.hbm_to_vmem [thread:$0]  %s152_s14, 16, %s154_s15, [#allocation19]  }
  0x26   :  { %9163 = dma.done.wait [#allocation4], 512  }
  0x27   :  { %9164 = vsyncadd [#allocation4], 4294966784 }
  0x28   :  { %9165 = dma.done.wait [#allocation7], 65664  }
  0x29   :  { %9166 = vsyncadd [#allocation7], 4294901632 }
  0x2a   :  { %9167 = dma.done.wait [#allocation10], 16416  }
  0x2b   :  { %9168 = vsyncadd [#allocation10], 4294950880 }
  0x2c   :  { %9169 = dma.done.wait [#allocation13], 1040  }
  0x2d   :  { %9170 = vsyncadd [#allocation13], 4294966256 }
  0x2e   :  { %9171 = dma.done.wait [#allocation16], 1040  }
  0x2f   :  { %9172 = vsyncadd [#allocation16], 4294966256 }
  0x30   :  { %9173 = dma.done.wait [#allocation19], 1040  }
  0x31   :  { %9174 = vsyncadd [#allocation19], 4294966256  ;;  %v5727_v0 = vld [vmem:[#allocation6 + $0x1c0] sm:$0xf]  ;;  %s9196_s8 = smov [#allocation21]   ;;  %s5470_s1 = sshll.u32 %s9500_s11, 4  ;;  %s5471_s1 = int_to_ptr.hbm [resolvable:$true] %s5470_s1 }
  0x32   :  { %v8217_v1 = vld [vmem:[#allocation6 + $0x1dc] sm:$0xf0]  ;;  %s5468_s10 = sshll.u32 %s9196_s8, 4  ;;  %s9197_s17 = smov [#allocation22]   ;;  %s5469_s10 = int_to_ptr.vmem [resolvable:$true] %s5468_s10 }
  0x33   :  { %v5983_v2 = vld [vmem:[#allocation6 + $0x3c0] sm:$0xf]  ;;  %v5728_v3 = vor.u32 %v8217_v1, %v5727_v0  ;;  %s5479_s18 = sshll.u32 %s9197_s17, 4  ;;  %s5481_s20 = sshll.u32 %s9501_s12, 4  ;;  %s5480_s18 = int_to_ptr.vmem [resolvable:$true] %s5479_s18  ;;  %s5482_s20 = int_to_ptr.hbm [resolvable:$true] %s5481_s20 }
  0x34   :  { %v8281_v4 = vld [vmem:[#allocation6 + $0x3dc] sm:$0xf0] }
  0x35   :  { %v6239_v5 = vld [vmem:[#allocation6 + $0x5c0] sm:$0xf]  ;;  %v5984_v7 = vor.u32 %v8281_v4, %v5983_v2  ;;  %3343 = vmatpush.bf16.msra.mxu0 %v5728_v3 }
  0x36   :  { %v8345_v6 = vld [vmem:[#allocation6 + $0x5dc] sm:$0xf0] }
  0x37   :  { %v6240_v8 = vor.u32 %v8345_v6, %v6239_v5  ;;  %v6495_v9 = vld [vmem:[#allocation6 + $0x7c0] sm:$0xf]  ;;  %3356 = vmatpush.bf16.msra.mxu1 %v5984_v7 }
  0x38   :  { %v8409_v10 = vld [vmem:[#allocation6 + $0x7dc] sm:$0xf0] }
  0x39   :  { %v5695_v11 = vld [vmem:[#allocation6 + $0x180] sm:$0xf]  ;;  %v6496_v12 = vor.u32 %v8409_v10, %v6495_v9  ;;  %3369 = vmatpush.bf16.msra.mxu2 %v6240_v8 }
  0x3a   :  { %v8209_v13 = vld [vmem:[#allocation6 + $0x19c] sm:$0xf0] }
  0x3b   :  { %v5951_v14 = vld [vmem:[#allocation6 + $0x380] sm:$0xf]  ;;  %v5696_v16 = vor.u32 %v8209_v13, %v5695_v11  ;;  %3382 = vmatpush.bf16.msra.mxu3 %v6496_v12 }
  0x3c   :  { %v8273_v15 = vld [vmem:[#allocation6 + $0x39c] sm:$0xf0] }
  0x3d   :  { %v5952_v17 = vor.u32 %v8273_v15, %v5951_v14  ;;  %v6207_v18 = vld [vmem:[#allocation6 + $0x580] sm:$0xf]  ;;  %3344 = vmatpush.bf16.msra.mxu0 %v5696_v16 }
  0x3e   :  { %v8337_v19 = vld [vmem:[#allocation6 + $0x59c] sm:$0xf0] }
  0x3f   :  { %v6463_v20 = vld [vmem:[#allocation6 + $0x780] sm:$0xf]  ;;  %v6208_v21 = vor.u32 %v8337_v19, %v6207_v18  ;;  %3357 = vmatpush.bf16.msra.mxu1 %v5952_v17 }
  0x40   :  { %v8401_v22 = vld [vmem:[#allocation6 + $0x79c] sm:$0xf0] }
  0x41   :  { %v5663_v23 = vld [vmem:[#allocation6 + $0x140] sm:$0xf]  ;;  %v6464_v25 = vor.u32 %v8401_v22, %v6463_v20  ;;  %3370 = vmatpush.bf16.msra.mxu2 %v6208_v21 }
  0x42   :  { %v8201_v24 = vld [vmem:[#allocation6 + $0x15c] sm:$0xf0] }
  0x43   :  { %v5919_v26 = vld [vmem:[#allocation6 + $0x340] sm:$0xf]  ;;  %v5664_v29 = vor.u32 %v8201_v24, %v5663_v23  ;;  %3383 = vmatpush.bf16.msra.mxu3 %v6464_v25 }
  0x44   :  { %v8265_v27 = vld [vmem:[#allocation6 + $0x35c] sm:$0xf0] }
  0x45   :  { %v6175_v28 = vld [vmem:[#allocation6 + $0x540] sm:$0xf]  ;;  %v5920_v33 = vor.u32 %v8265_v27, %v5919_v26  ;;  %3345 = vmatpush.bf16.msra.mxu0 %v5664_v29 }
  0x46   :  { %v8329_v30 = vld [vmem:[#allocation6 + $0x55c] sm:$0xf0] }
  0x47   :  { %v6431_v31 = vld [vmem:[#allocation6 + $0x740] sm:$0xf]  ;;  %v6176_v34 = vor.u32 %v8329_v30, %v6175_v28  ;;  %3358 = vmatpush.bf16.msra.mxu1 %v5920_v33 }
  0x48   :  { %v8393_v32 = vld [vmem:[#allocation6 + $0x75c] sm:$0xf0] }
  0x49   :  { %v5631_v35 = vld [vmem:[#allocation6 + $0x100] sm:$0xf]  ;;  %v6432_v38 = vor.u32 %v8393_v32, %v6431_v31  ;;  %3371 = vmatpush.bf16.msra.mxu2 %v6176_v34 }
  0x4a   :  { %v8193_v36 = vld [vmem:[#allocation6 + $0x11c] sm:$0xf0] }
  0x4b   :  { %v5887_v37 = vld [vmem:[#allocation6 + $0x300] sm:$0xf]  ;;  %v5632_v44 = vor.u32 %v8193_v36, %v5631_v35  ;;  %3384 = vmatpush.bf16.msra.mxu3 %v6432_v38 }
  0x4c   :  { %v8257_v39 = vld [vmem:[#allocation6 + $0x31c] sm:$0xf0] }
  0x4d   :  { %v6143_v40 = vld [vmem:[#allocation6 + $0x500] sm:$0xf]  ;;  %v5888_v45 = vor.u32 %v8257_v39, %v5887_v37  ;;  %3346 = vmatpush.bf16.msra.mxu0 %v5632_v44 }
  0x4e   :  { %v8321_v41 = vld [vmem:[#allocation6 + $0x51c] sm:$0xf0] }
  0x4f   :  { %v6399_v42 = vld [vmem:[#allocation6 + $0x700] sm:$0xf]  ;;  %v6144_v46 = vor.u32 %v8321_v41, %v6143_v40  ;;  %3359 = vmatpush.bf16.msra.mxu1 %v5888_v45 }
  0x50   :  { %v8385_v43 = vld [vmem:[#allocation6 + $0x71c] sm:$0xf0] }
  0x51   :  { %v5599_v47 = vld [vmem:[#allocation6 + $0xc0] sm:$0xf]  ;;  %v6400_v50 = vor.u32 %v8385_v43, %v6399_v42  ;;  %3372 = vmatpush.bf16.msra.mxu2 %v6144_v46 }
  0x52   :  { %v8185_v48 = vld [vmem:[#allocation6 + $0xdc] sm:$0xf0] }
  0x53   :  { %v5855_v49 = vld [vmem:[#allocation6 + $0x2c0] sm:$0xf]  ;;  %v5600_v56 = vor.u32 %v8185_v48, %v5599_v47  ;;  %3385 = vmatpush.bf16.msra.mxu3 %v6400_v50 }
  0x54   :  { %v8249_v51 = vld [vmem:[#allocation6 + $0x2dc] sm:$0xf0] }
  0x55   :  { %v6111_v52 = vld [vmem:[#allocation6 + $0x4c0] sm:$0xf]  ;;  %v5856_v57 = vor.u32 %v8249_v51, %v5855_v49  ;;  %3347 = vmatpush.bf16.msra.mxu0 %v5600_v56 }
  0x56   :  { %v8313_v53 = vld [vmem:[#allocation6 + $0x4dc] sm:$0xf0] }
  0x57   :  { %v6367_v54 = vld [vmem:[#allocation6 + $0x6c0] sm:$0xf]  ;;  %v6112_v58 = vor.u32 %v8313_v53, %v6111_v52  ;;  %3360 = vmatpush.bf16.msra.mxu1 %v5856_v57 }
  0x58   :  { %v8377_v55 = vld [vmem:[#allocation6 + $0x6dc] sm:$0xf0] }
  0x59   :  { %v5567_v59 = vld [vmem:[#allocation6 + $0x80] sm:$0xf]  ;;  %v6368_v62 = vor.u32 %v8377_v55, %v6367_v54  ;;  %3373 = vmatpush.bf16.msra.mxu2 %v6112_v58  ;;  %v240_v58 = vld [vmem:[#allocation3 + $0x8] sm:$0xff] }
  0x5a   :  { %v8177_v60 = vld [vmem:[#allocation6 + $0x9c] sm:$0xf0] }
  0x5b   :  { %v5823_v61 = vld [vmem:[#allocation6 + $0x280] sm:$0xf]  ;;  %v5568_v4 = vor.u32 %v8177_v60, %v5567_v59  ;;  %3386 = vmatpush.bf16.msra.mxu3 %v6368_v62 }
  0x5c   :  { %v8241_v63 = vld [vmem:[#allocation6 + $0x29c] sm:$0xf0] }
  0x5d   :  { %v6079_v0 = vld [vmem:[#allocation6 + $0x480] sm:$0xf]  ;;  %v5824_v5 = vor.u32 %v8241_v63, %v5823_v61  ;;  %3348 = vmatpush.bf16.msra.mxu0 %v5568_v4  ;;  %v761_v63 = vunpack.c.l.b16 %v240_v58 }
  0x5e   :  { %v8305_v1 = vld [vmem:[#allocation6 + $0x49c] sm:$0xf0] }
  0x5f   :  { %v6335_v2 = vld [vmem:[#allocation6 + $0x680] sm:$0xf]  ;;  %v6080_v6 = vor.u32 %v8305_v1, %v6079_v0  ;;  %3361 = vmatpush.bf16.msra.mxu1 %v5824_v5  ;;  %v762_v0 = vunpack.c.h.b16 %v240_v58  ;;  %v9296_v4 = vpack.c.b16 %v761_v63, %v761_v63 }
  0x60   :  { %v8369_v3 = vld [vmem:[#allocation6 + $0x69c] sm:$0xf0] }
  0x61   :  { %v5535_v7 = vld [vmem:[#allocation6 + $0x40] sm:$0xf]  ;;  %v6336_v10 = vor.u32 %v8369_v3, %v6335_v2  ;;  %3374 = vmatpush.bf16.msra.mxu2 %v6080_v6  ;;  %v9298_v6 = vpack.c.b16 %v762_v0, %v762_v0 }
  0x62   :  { %v8169_v8 = vld [vmem:[#allocation6 + $0x5c] sm:$0xf0] }
  0x63   :  { %v5791_v9 = vld [vmem:[#allocation6 + $0x240] sm:$0xf]  ;;  %v5536_v16 = vor.u32 %v8169_v8, %v5535_v7  ;;  %3387 = vmatpush.bf16.msra.mxu3 %v6336_v10 }
  0x64   :  { %v8233_v11 = vld [vmem:[#allocation6 + $0x25c] sm:$0xf0] }
  0x65   :  { %v6047_v12 = vld [vmem:[#allocation6 + $0x440] sm:$0xf]  ;;  %v5792_v19 = vor.u32 %v8233_v11, %v5791_v9  ;;  %3349 = vmatpush.bf16.msra.mxu0 %v5536_v16 }
  0x66   :  { %v8297_v13 = vld [vmem:[#allocation6 + $0x45c] sm:$0xf0] }
  0x67   :  { %v6303_v14 = vld [vmem:[#allocation6 + $0x640] sm:$0xf]  ;;  %v6048_v20 = vor.u32 %v8297_v13, %v6047_v12  ;;  %3362 = vmatpush.bf16.msra.mxu1 %v5792_v19 }
  0x68   :  { %v8361_v15 = vld [vmem:[#allocation6 + $0x65c] sm:$0xf0] }
  0x69   :  { %v5503_v17 = vld [vmem:[#allocation6] sm:$0xf]  ;;  %v6304_v24 = vor.u32 %v8361_v15, %v6303_v14  ;;  %3375 = vmatpush.bf16.msra.mxu2 %v6048_v20 }
  0x6a   :  { %v8161_v18 = vld [vmem:[#allocation6 + $0x1c] sm:$0xf0] }
  0x6b   :  { %v5759_v21 = vld [vmem:[#allocation6 + $0x200] sm:$0xf]  ;;  %v5504_v31 = vor.u32 %v8161_v18, %v5503_v17  ;;  %3388 = vmatpush.bf16.msra.mxu3 %v6304_v24 }
  0x6c   :  { %v8225_v22 = vld [vmem:[#allocation6 + $0x21c] sm:$0xf0] }
  0x6d   :  { %v6015_v23 = vld [vmem:[#allocation6 + $0x400] sm:$0xf]  ;;  %v5760_v35 = vor.u32 %v8225_v22, %v5759_v21  ;;  %3350 = vmatpush.bf16.msra.mxu0 %v5504_v31 }
  0x6e   :  { %v8289_v25 = vld [vmem:[#allocation6 + $0x41c] sm:$0xf0] }
  0x6f   :  { %v6271_v26 = vld [vmem:[#allocation6 + $0x600] sm:$0xf]  ;;  %v6016_v36 = vor.u32 %v8289_v25, %v6015_v23  ;;  %3363 = vmatpush.bf16.msra.mxu1 %v5760_v35 }
  0x70   :  { %v8353_v27 = vld [vmem:[#allocation6 + $0x61c] sm:$0xf0] }
  0x71   :  { %v6751_v28 = vld [vmem:[#allocation6 + $0x9c0] sm:$0xf]  ;;  %v6272_v39 = vor.u32 %v8353_v27, %v6271_v26  ;;  %3376 = vmatpush.bf16.msra.mxu2 %v6016_v36 }
  0x72   :  { %v8473_v29 = vld [vmem:[#allocation6 + $0x9dc] sm:$0xf0] }
  0x73   :  { %v7007_v30 = vld [vmem:[#allocation6 + $0xbc0] sm:$0xf]  ;;  %v6752_v40 = vor.u32 %v8473_v29, %v6751_v28  ;;  %3389 = vmatpush.bf16.msra.mxu3 %v6272_v39 }
  0x74   :  { %v8537_v32 = vld [vmem:[#allocation6 + $0xbdc] sm:$0xf0]  ;;  %3377 = vmatmul.bf16.vlgmr.msra.gmra.mxu2 %v9296_v4 }
  0x75   :  { %v7263_v33 = vld [vmem:[#allocation6 + $0xdc0] sm:$0xf]  ;;  %v7008_v41 = vor.u32 %v8537_v32, %v7007_v30  ;;  %3395 = vmatpush.bf16.msrb.mxu0 %v6752_v40 }
  0x76   :  { %v8601_v34 = vld [vmem:[#allocation6 + $0xddc] sm:$0xf0]  ;;  %3390 = vmatmul.bf16.vlgmr.msra.gmra.mxu3 %v9298_v6 }
  0x77   :  { %v7519_v37 = vld [vmem:[#allocation6 + $0xfc0] sm:$0xf]  ;;  %v7264_v42 = vor.u32 %v8601_v34, %v7263_v33  ;;  %3408 = vmatpush.bf16.msrb.mxu1 %v7008_v41 }
  0x78   :  { %v8665_v38 = vld [vmem:[#allocation6 + $0xfdc] sm:$0xf0] }
  0x79   :  { %v6719_v43 = vld [vmem:[#allocation6 + $0x980] sm:$0xf]  ;;  %v7520_v46 = vor.u32 %v8665_v38, %v7519_v37  ;;  %3421 = vmatpush.bf16.msrb.mxu2 %v7264_v42 }
  0x7a   :  { %v8465_v44 = vld [vmem:[#allocation6 + $0x99c] sm:$0xf0] }
  0x7b   :  { %v6975_v45 = vld [vmem:[#allocation6 + $0xb80] sm:$0xf]  ;;  %v6720_v52 = vor.u32 %v8465_v44, %v6719_v43  ;;  %3434 = vmatpush.bf16.msrb.mxu3 %v7520_v46 }
  0x7c   :  { %v8529_v47 = vld [vmem:[#allocation6 + $0xb9c] sm:$0xf0] }
  0x7d   :  { %v7231_v48 = vld [vmem:[#allocation6 + $0xd80] sm:$0xf]  ;;  %v6976_v54 = vor.u32 %v8529_v47, %v6975_v45  ;;  %3396 = vmatpush.bf16.msrb.mxu0 %v6720_v52 }
  0x7e   :  { %v8593_v49 = vld [vmem:[#allocation6 + $0xd9c] sm:$0xf0] }
  0x7f   :  { %v7487_v50 = vld [vmem:[#allocation6 + $0xf80] sm:$0xf]  ;;  %v7232_v55 = vor.u32 %v8593_v49, %v7231_v48  ;;  %3409 = vmatpush.bf16.msrb.mxu1 %v6976_v54 }
  0x80   :  { %v8657_v51 = vld [vmem:[#allocation6 + $0xf9c] sm:$0xf0] }
  0x81   :  { %v6687_v53 = vld [vmem:[#allocation6 + $0x940] sm:$0xf]  ;;  %v7488_v59 = vor.u32 %v8657_v51, %v7487_v50  ;;  %3422 = vmatpush.bf16.msrb.mxu2 %v7232_v55 }
  0x82   :  { %v8457_v56 = vld [vmem:[#allocation6 + $0x95c] sm:$0xf0] }
  0x83   :  { %v6943_v57 = vld [vmem:[#allocation6 + $0xb40] sm:$0xf]  ;;  %v6688_v3 = vor.u32 %v8457_v56, %v6687_v53  ;;  %3435 = vmatpush.bf16.msrb.mxu3 %v7488_v59 }
  0x84   :  { %v8521_v60 = vld [vmem:[#allocation6 + $0xb5c] sm:$0xf0] }
  0x85   :  { %v7199_v61 = vld [vmem:[#allocation6 + $0xd40] sm:$0xf]  ;;  %v6944_v7 = vor.u32 %v8521_v60, %v6943_v57  ;;  %3397 = vmatpush.bf16.msrb.mxu0 %v6688_v3  ;;  %v242_v3 = vld [vmem:[#allocation3 + $0x18] sm:$0xff] }
  0x86   :  { %v8585_v62 = vld [vmem:[#allocation6 + $0xd5c] sm:$0xf0] }
  0x87   :  { %v7455_v1 = vld [vmem:[#allocation6 + $0xf40] sm:$0xf]  ;;  %v7200_v8 = vor.u32 %v8585_v62, %v7199_v61  ;;  %3410 = vmatpush.bf16.msrb.mxu1 %v6944_v7 }
  0x88   :  { %v8649_v2 = vld [vmem:[#allocation6 + $0xf5c] sm:$0xf0] }
  0x89   :  { %v239_v5 = vld [vmem:[#allocation3] sm:$0xff]  ;;  %v7456_v14 = vor.u32 %v8649_v2, %v7455_v1  ;;  %3423 = vmatpush.bf16.msrb.mxu2 %v7200_v8 }
  0x8a   :  { %v6655_v9 = vld [vmem:[#allocation6 + $0x900] sm:$0xf]  ;;  %v759_v12 = vunpack.c.l.b16 %v239_v5  ;;  %v760_v13 = vunpack.c.h.b16 %v239_v5 }
  0x8b   :  { %v8449_v10 = vld [vmem:[#allocation6 + $0x91c] sm:$0xf0]  ;;  %3436 = vmatpush.bf16.msrb.mxu3 %v7456_v14  ;;  %v5985_v14 = vld [vmem:[#allocation6 + $0x3e0] sm:$0xf0] }
  0x8c   :  { %v6911_v11 = vld [vmem:[#allocation6 + $0xb00] sm:$0xf]  ;;  %v9301_v20 = vpack.c.b16 %v759_v12, %v759_v12  ;;  %v9304_v21 = vpack.c.b16 %v760_v13, %v760_v13  ;;  %v6656_v22 = vor.u32 %v8449_v10, %v6655_v9  ;;  %v241_v9 = vld [vmem:[#allocation3 + $0x10] sm:$0xff]  ;;  %v8213_v10 = vld [vmem:[#allocation6 + $0x1c4] sm:$0xf] }
  0x8d   :  { %v8513_v15 = vld [vmem:[#allocation6 + $0xb1c] sm:$0xf0]  ;;  %v8277_v12 = vld [vmem:[#allocation6 + $0x3c4] sm:$0xf] }
  0x8e   :  { %v7167_v16 = vld [vmem:[#allocation6 + $0xd00] sm:$0xf]  ;;  %v6912_v23 = vor.u32 %v8513_v15, %v6911_v11  ;;  %3351 = vmatmul.bf16.vlgmr.msra.gmra.mxu0 %v9301_v20  ;;  %3364 = vmatmul.bf16.vlgmr.msra.gmra.mxu1 %v9304_v21  ;;  %v5729_v11 = vld [vmem:[#allocation6 + $0x1e0] sm:$0xf0] }
  0x8f   :  { %v8577_v17 = vld [vmem:[#allocation6 + $0xd1c] sm:$0xf0]  ;;  %3398 = vmatpush.bf16.msrb.mxu0 %v6656_v22  ;;  %v8341_v15 = vld [vmem:[#allocation6 + $0x5c4] sm:$0xf] }
  0x90   :  { %v7423_v18 = vld [vmem:[#allocation6 + $0xf00] sm:$0xf]  ;;  %v7168_v24 = vor.u32 %v8577_v17, %v7167_v16  ;;  %3411 = vmatpush.bf16.msrb.mxu1 %v6912_v23  ;;  %v6241_v16 = vld [vmem:[#allocation6 + $0x5e0] sm:$0xf0]  ;;  %v765_v17 = vunpack.c.l.b16 %v242_v3 }
  0x91   :  { %v8641_v19 = vld [vmem:[#allocation6 + $0xf1c] sm:$0xf0]  ;;  %v8405_v22 = vld [vmem:[#allocation6 + $0x7c4] sm:$0xf] }
  0x92   :  { %v6623_v25 = vld [vmem:[#allocation6 + $0x8c0] sm:$0xf]  ;;  %v7424_v28 = vor.u32 %v8641_v19, %v7423_v18  ;;  %3424 = vmatpush.bf16.msrb.mxu2 %v7168_v24  ;;  %v6497_v23 = vld [vmem:[#allocation6 + $0x7e0] sm:$0xf0]  ;;  %v763_v24 = vunpack.c.l.b16 %v241_v9 }
  0x93   :  { %v8441_v26 = vld [vmem:[#allocation6 + $0x8dc] sm:$0xf0] }
  0x94   :  { %v6879_v27 = vld [vmem:[#allocation6 + $0xac0] sm:$0xf]  ;;  %v6624_v34 = vor.u32 %v8441_v26, %v6623_v25  ;;  %3437 = vmatpush.bf16.msrb.mxu3 %v7424_v28  ;;  %v766_v25 = vunpack.c.h.b16 %v242_v3  ;;  %v764_v28 = vunpack.c.h.b16 %v241_v9  ;;  %v6401_v3 = vld [vmem:[#allocation6 + $0x720] sm:$0xf0] }
  0x95   :  { %v8505_v29 = vld [vmem:[#allocation6 + $0xadc] sm:$0xf0]  ;;  %v8181_v9 = vld [vmem:[#allocation6 + $0xc4] sm:$0xf] }
  0x96   :  { %v7135_v30 = vld [vmem:[#allocation6 + $0xcc0] sm:$0xf]  ;;  %v6880_v35 = vor.u32 %v8505_v29, %v6879_v27  ;;  %3399 = vmatpush.bf16.msrb.mxu0 %v6624_v34  ;;  %v5732_v27 = vor.u32 %v8213_v10, %v5729_v11  ;;  %v5988_v29 = vor.u32 %v8277_v12, %v5985_v14  ;;  %v6500_v34 = vor.u32 %v8405_v22, %v6497_v23  ;;  %v5601_v10 = vld [vmem:[#allocation6 + $0xe0] sm:$0xf0] }
  0x97   :  { %v8569_v31 = vld [vmem:[#allocation6 + $0xcdc] sm:$0xf0]  ;;  %v8245_v11 = vld [vmem:[#allocation6 + $0x2c4] sm:$0xf] }
  0x98   :  { %v7391_v32 = vld [vmem:[#allocation6 + $0xec0] sm:$0xf]  ;;  %v7136_v36 = vor.u32 %v8569_v31, %v7135_v30  ;;  %3412 = vmatpush.bf16.msrb.mxu1 %v6880_v35  ;;  %v6244_v30 = vor.u32 %v8341_v15, %v6241_v16  ;;  %v8205_v31 = vld [vmem:[#allocation6 + $0x184] sm:$0xf] }
  0x99   :  { %v8633_v33 = vld [vmem:[#allocation6 + $0xedc] sm:$0xf0]  ;;  %v5953_v35 = vld [vmem:[#allocation6 + $0x3a0] sm:$0xf0] }
  0x9a   :  { %v6591_v37 = vld [vmem:[#allocation6 + $0x880] sm:$0xf]  ;;  %v7392_v40 = vor.u32 %v8633_v33, %v7391_v32  ;;  %3425 = vmatpush.bf16.msrb.mxu2 %v7136_v36  ;;  %v5697_v32 = vld [vmem:[#allocation6 + $0x1a0] sm:$0xf0] }
  0x9b   :  { %v8433_v38 = vld [vmem:[#allocation6 + $0x89c] sm:$0xf0]  ;;  %v8269_v33 = vld [vmem:[#allocation6 + $0x384] sm:$0xf] }
  0x9c   :  { %v6847_v39 = vld [vmem:[#allocation6 + $0xa80] sm:$0xf]  ;;  %v6592_v46 = vor.u32 %v8433_v38, %v6591_v37  ;;  %3438 = vmatpush.bf16.msrb.mxu3 %v7392_v40  ;;  %v8333_v36 = vld [vmem:[#allocation6 + $0x584] sm:$0xf]  ;;  %v9308_v38 = vpack.c.b16 %v765_v17, %v765_v17 }
  0x9d   :  { %v8497_v41 = vld [vmem:[#allocation6 + $0xa9c] sm:$0xf0]  ;;  %v6209_v37 = vld [vmem:[#allocation6 + $0x5a0] sm:$0xf0] }
  0x9e   :  { %v7103_v42 = vld [vmem:[#allocation6 + $0xc80] sm:$0xf]  ;;  %v6848_v47 = vor.u32 %v8497_v41, %v6847_v39  ;;  %3400 = vmatpush.bf16.msrb.mxu0 %v6592_v46  ;;  %v8397_v39 = vld [vmem:[#allocation6 + $0x784] sm:$0xf]  ;;  %v9310_v41 = vpack.c.b16 %v763_v24, %v763_v24  ;;  %v6212_v46 = vor.u32 %v8333_v36, %v6209_v37 }
  0x9f   :  { %v8561_v43 = vld [vmem:[#allocation6 + $0xc9c] sm:$0xf0]  ;;  %v6465_v40 = vld [vmem:[#allocation6 + $0x7a0] sm:$0xf0] }
  0xa0   :  { %v7359_v44 = vld [vmem:[#allocation6 + $0xe80] sm:$0xf]  ;;  %v7104_v48 = vor.u32 %v8561_v43, %v7103_v42  ;;  %3413 = vmatpush.bf16.msrb.mxu1 %v6848_v47  ;;  %v9312_v42 = vpack.c.b16 %v766_v25, %v766_v25  ;;  %v5700_v43 = vor.u32 %v8205_v31, %v5697_v32  ;;  %v8197_v47 = vld [vmem:[#allocation6 + $0x144] sm:$0xf] }
  0xa1   :  { %v8625_v45 = vld [vmem:[#allocation6 + $0xe9c] sm:$0xf0]  ;;  %v8309_v14 = vld [vmem:[#allocation6 + $0x4c4] sm:$0xf] }
  0xa2   :  { %v6559_v49 = vld [vmem:[#allocation6 + $0x840] sm:$0xf]  ;;  %v7360_v52 = vor.u32 %v8625_v45, %v7359_v44  ;;  %3426 = vmatpush.bf16.msrb.mxu2 %v7104_v48  ;;  %v9314_v44 = vpack.c.b16 %v764_v28, %v764_v28  ;;  %v5956_v45 = vor.u32 %v8269_v33, %v5953_v35  ;;  %v5665_v48 = vld [vmem:[#allocation6 + $0x160] sm:$0xf0] }
  0xa3   :  { %v8425_v50 = vld [vmem:[#allocation6 + $0x85c] sm:$0xf0]  ;;  %v6113_v15 = vld [vmem:[#allocation6 + $0x4e0] sm:$0xf0] }
  0xa4   :  { %v6815_v51 = vld [vmem:[#allocation6 + $0xa40] sm:$0xf]  ;;  %v6560_v59 = vor.u32 %v8425_v50, %v6559_v49  ;;  %3439 = vmatpush.bf16.msrb.mxu3 %v7360_v52  ;;  %v8261_v49 = vld [vmem:[#allocation6 + $0x344] sm:$0xf]  ;;  %v6468_v50 = vor.u32 %v8397_v39, %v6465_v40  ;;  %v6116_v22 = vor.u32 %v8309_v14, %v6113_v15 }
  0xa5   :  { %v8489_v53 = vld [vmem:[#allocation6 + $0xa5c] sm:$0xf0]  ;;  %v8325_v52 = vld [vmem:[#allocation6 + $0x544] sm:$0xf] }
  0xa6   :  { %v7071_v54 = vld [vmem:[#allocation6 + $0xc40] sm:$0xf]  ;;  %v6816_v63 = vor.u32 %v8489_v53, %v6815_v51  ;;  %3401 = vmatpush.bf16.msrb.mxu0 %v6560_v59  ;;  %v5921_v51 = vld [vmem:[#allocation6 + $0x360] sm:$0xf0] }
  0xa7   :  { %v8553_v55 = vld [vmem:[#allocation6 + $0xc5c] sm:$0xf0]  ;;  %v6177_v53 = vld [vmem:[#allocation6 + $0x560] sm:$0xf0] }
  0xa8   :  { %v7327_v56 = vld [vmem:[#allocation6 + $0xe40] sm:$0xf]  ;;  %v7072_v0 = vor.u32 %v8553_v55, %v7071_v54  ;;  %3414 = vmatpush.bf16.msrb.mxu1 %v6816_v63  ;;  %v8389_v54 = vld [vmem:[#allocation6 + $0x744] sm:$0xf] }
  0xa9   :  { %v8617_v57 = vld [vmem:[#allocation6 + $0xe5c] sm:$0xf0]  ;;  %v6433_v55 = vld [vmem:[#allocation6 + $0x760] sm:$0xf0] }
  0xaa   :  { %v6527_v58 = vld [vmem:[#allocation6 + $0x800] sm:$0xf]  ;;  %v7328_v5 = vor.u32 %v8617_v57, %v7327_v56  ;;  %3427 = vmatpush.bf16.msrb.mxu2 %v7072_v0  ;;  %v5668_v56 = vor.u32 %v8197_v47, %v5665_v48  ;;  %v5924_v57 = vor.u32 %v8261_v49, %v5921_v51  ;;  %v8189_v59 = vld [vmem:[#allocation6 + $0x104] sm:$0xf] }
  0xab   :  { %v8417_v60 = vld [vmem:[#allocation6 + $0x81c] sm:$0xf0]  ;;  %v5889_v63 = vld [vmem:[#allocation6 + $0x320] sm:$0xf0] }
  0xac   :  { %v6783_v61 = vld [vmem:[#allocation6 + $0xa00] sm:$0xf]  ;;  %v6528_v13 = vor.u32 %v8417_v60, %v6527_v58  ;;  %3440 = vmatpush.bf16.msrb.mxu3 %v7328_v5  ;;  %v6180_v58 = vor.u32 %v8325_v52, %v6177_v53  ;;  %v5633_v60 = vld [vmem:[#allocation6 + $0x120] sm:$0xf0] }
  0xad   :  { %v8481_v62 = vld [vmem:[#allocation6 + $0xa1c] sm:$0xf0]  ;;  %v8317_v0 = vld [vmem:[#allocation6 + $0x504] sm:$0xf]  ;;  %v5636_v5 = vor.u32 %v8189_v59, %v5633_v60 }
  0xae   :  { %v7039_v1 = vld [vmem:[#allocation6 + $0xc00] sm:$0xf]  ;;  %v6784_v18 = vor.u32 %v8481_v62, %v6783_v61  ;;  %3402 = vmatpush.bf16.msrb.mxu0 %v6528_v13  ;;  %v8253_v61 = vld [vmem:[#allocation6 + $0x304] sm:$0xf]  ;;  %v6436_v62 = vor.u32 %v8389_v54, %v6433_v55 }
  0xaf   :  { %v8545_v2 = vld [vmem:[#allocation6 + $0xc1c] sm:$0xf0]  ;;  %v5857_v13 = vld [vmem:[#allocation6 + $0x2e0] sm:$0xf0] }
  0xb0   :  { %v7295_v7 = vld [vmem:[#allocation6 + $0xe00] sm:$0xf]  ;;  %v7040_v19 = vor.u32 %v8545_v2, %v7039_v1  ;;  %3415 = vmatpush.bf16.msrb.mxu1 %v6784_v18  ;;  %v6145_v1 = vld [vmem:[#allocation6 + $0x520] sm:$0xf0]  ;;  %v5604_v18 = vor.u32 %v8181_v9, %v5601_v10 }
  0xb1   :  { %v8609_v8 = vld [vmem:[#allocation6 + $0xe1c] sm:$0xf0]  ;;  %3403 = vmatmul.bf16.vlgmr.msrb.gmra.mxu0 %v9310_v41  ;;  %v8381_v2 = vld [vmem:[#allocation6 + $0x704] sm:$0xf] }
  0xb2   :  { %v7296_v26 = vor.u32 %v8609_v8, %v7295_v7  ;;  %3428 = vmatpush.bf16.msrb.mxu2 %v7040_v19  ;;  %3447 = vmatpush.bf16.msra.mxu0 %v5732_v27  ;;  %v5892_v7 = vor.u32 %v8253_v61, %v5889_v63  ;;  %v6148_v8 = vor.u32 %v8317_v0, %v6145_v1  ;;  %v8373_v16 = vld [vmem:[#allocation6 + $0x6c4] sm:$0xf] }
  0xb3   :  { %3416 = vmatmul.bf16.vlgmr.msrb.gmra.mxu1 %v9314_v44  ;;  %v6404_v12 = vor.u32 %v8381_v2, %v6401_v3  ;;  %v6369_v17 = vld [vmem:[#allocation6 + $0x6e0] sm:$0xf0]  ;;  %v5860_v19 = vor.u32 %v8245_v11, %v5857_v13 }
  0xb4   :  { %3441 = vmatpush.bf16.msrb.mxu3 %v7296_v26  ;;  %3460 = vmatpush.bf16.msra.mxu1 %v5988_v29  ;;  %v8173_v23 = vld [vmem:[#allocation6 + $0x84] sm:$0xf]  ;;  %v6372_v26 = vor.u32 %v8373_v16, %v6369_v17 }
  0xb5   :  { %3429 = vmatmul.bf16.vlgmr.msrb.gmra.mxu2 %v9308_v38  ;;  %v5569_v24 = vld [vmem:[#allocation6 + $0xa0] sm:$0xf0] }
  0xb6   :  { %3473 = vmatpush.bf16.msra.mxu2 %v6244_v30  ;;  %3448 = vmatpush.bf16.msra.mxu0 %v5700_v43  ;;  %v8237_v25 = vld [vmem:[#allocation6 + $0x284] sm:$0xf]  ;;  %v5572_v32 = vor.u32 %v8173_v23, %v5569_v24 }
  0xb7   :  { %3442 = vmatmul.bf16.vlgmr.msrb.gmra.mxu3 %v9312_v42  ;;  %v5825_v27 = vld [vmem:[#allocation6 + $0x2a0] sm:$0xf0] }
  0xb8   :  { %3486 = vmatpush.bf16.msra.mxu3 %v6500_v34  ;;  %3461 = vmatpush.bf16.msra.mxu1 %v5956_v45  ;;  %v8301_v28 = vld [vmem:[#allocation6 + $0x484] sm:$0xf]  ;;  %v5828_v33 = vor.u32 %v8237_v25, %v5825_v27 }
  0xb9   :  { %v6081_v29 = vld [vmem:[#allocation6 + $0x4a0] sm:$0xf0] }
  0xba   :  { %3474 = vmatpush.bf16.msra.mxu2 %v6212_v46  ;;  %3449 = vmatpush.bf16.msra.mxu0 %v5668_v56  ;;  %v8365_v30 = vld [vmem:[#allocation6 + $0x684] sm:$0xf]  ;;  %v6084_v34 = vor.u32 %v8301_v28, %v6081_v29 }
  0xbb   :  { %v6337_v31 = vld [vmem:[#allocation6 + $0x6a0] sm:$0xf0] }
  0xbc   :  { %3487 = vmatpush.bf16.msra.mxu3 %v6468_v50  ;;  %3462 = vmatpush.bf16.msra.mxu1 %v5924_v57  ;;  %v8165_v35 = vld [vmem:[#allocation6 + $0x44] sm:$0xf]  ;;  %v6340_v39 = vor.u32 %v8365_v30, %v6337_v31 }
  0xbd   :  { %v5537_v36 = vld [vmem:[#allocation6 + $0x60] sm:$0xf0] }
  0xbe   :  { %3475 = vmatpush.bf16.msra.mxu2 %v6180_v58  ;;  %3450 = vmatpush.bf16.msra.mxu0 %v5636_v5  ;;  %v8229_v37 = vld [vmem:[#allocation6 + $0x244] sm:$0xf]  ;;  %v5540_v48 = vor.u32 %v8165_v35, %v5537_v36 }
  0xbf   :  { %v5793_v40 = vld [vmem:[#allocation6 + $0x260] sm:$0xf0] }
  0xc0   :  { %3488 = vmatpush.bf16.msra.mxu3 %v6436_v62  ;;  %3463 = vmatpush.bf16.msra.mxu1 %v5892_v7  ;;  %v8293_v43 = vld [vmem:[#allocation6 + $0x444] sm:$0xf]  ;;  %v5796_v51 = vor.u32 %v8229_v37, %v5793_v40 }
  0xc1   :  { %v6049_v45 = vld [vmem:[#allocation6 + $0x460] sm:$0xf0] }
  0xc2   :  { %3476 = vmatpush.bf16.msra.mxu2 %v6148_v8  ;;  %3451 = vmatpush.bf16.msra.mxu0 %v5604_v18  ;;  %v8357_v46 = vld [vmem:[#allocation6 + $0x644] sm:$0xf]  ;;  %v6052_v52 = vor.u32 %v8293_v43, %v6049_v45 }
  0xc3   :  { %v6305_v47 = vld [vmem:[#allocation6 + $0x660] sm:$0xf0] }
  0xc4   :  { %3489 = vmatpush.bf16.msra.mxu3 %v6404_v12  ;;  %3464 = vmatpush.bf16.msra.mxu1 %v5860_v19  ;;  %v8157_v49 = vld [vmem:[#allocation6 + $0x4] sm:$0xf]  ;;  %v6308_v56 = vor.u32 %v8357_v46, %v6305_v47 }
  0xc5   :  { %v5505_v50 = vld [vmem:[#allocation6 + $0x20] sm:$0xf0] }
  0xc6   :  { %3477 = vmatpush.bf16.msra.mxu2 %v6116_v22  ;;  %3452 = vmatpush.bf16.msra.mxu0 %v5572_v32  ;;  %v8221_v53 = vld [vmem:[#allocation6 + $0x204] sm:$0xf]  ;;  %v5508_v63 = vor.u32 %v8157_v49, %v5505_v50 }
  0xc7   :  { %v5761_v54 = vld [vmem:[#allocation6 + $0x220] sm:$0xf0] }
  0xc8   :  { %3490 = vmatpush.bf16.msra.mxu3 %v6372_v26  ;;  %3465 = vmatpush.bf16.msra.mxu1 %v5828_v33  ;;  %v8285_v55 = vld [vmem:[#allocation6 + $0x404] sm:$0xf]  ;;  %v5764_v3 = vor.u32 %v8221_v53, %v5761_v54 }
  0xc9   :  { %v6017_v57 = vld [vmem:[#allocation6 + $0x420] sm:$0xf0] }
  0xca   :  { %3478 = vmatpush.bf16.msra.mxu2 %v6084_v34  ;;  %v8349_v58 = vld [vmem:[#allocation6 + $0x604] sm:$0xf]  ;;  %3453 = vmatpush.bf16.msra.mxu0 %v5540_v48  ;;  %v6020_v5 = vor.u32 %v8285_v55, %v6017_v57 }
  0xcb   :  { %v6273_v59 = vld [vmem:[#allocation6 + $0x620] sm:$0xf0] }
  0xcc   :  { %3491 = vmatpush.bf16.msra.mxu3 %v6340_v39  ;;  %v8469_v60 = vld [vmem:[#allocation6 + $0x9c4] sm:$0xf]  ;;  %3466 = vmatpush.bf16.msra.mxu1 %v5796_v51  ;;  %v6276_v9 = vor.u32 %v8349_v58, %v6273_v59 }
  0xcd   :  { %v6753_v61 = vld [vmem:[#allocation6 + $0x9e0] sm:$0xf0] }
  0xce   :  { %v8533_v62 = vld [vmem:[#allocation6 + $0xbc4] sm:$0xf]  ;;  %3479 = vmatpush.bf16.msra.mxu2 %v6052_v52  ;;  %v6756_v10 = vor.u32 %v8469_v60, %v6753_v61  ;;  %3454 = vmatpush.bf16.msra.mxu0 %v5508_v63 }
  0xcf   :  { %v7009_v0 = vld [vmem:[#allocation6 + $0xbe0] sm:$0xf0] }
  0xd0   :  { %v8597_v1 = vld [vmem:[#allocation6 + $0xdc4] sm:$0xf]  ;;  %3492 = vmatpush.bf16.msra.mxu3 %v6308_v56  ;;  %v7012_v11 = vor.u32 %v8533_v62, %v7009_v0  ;;  %3467 = vmatpush.bf16.msra.mxu1 %v5764_v3 }
  0xd1   :  { %v7265_v2 = vld [vmem:[#allocation6 + $0xde0] sm:$0xf0]  ;;  %3455 = vmatmul.bf16.vlgmr.msra.gmra.mxu0 %v9301_v20 }
  0xd2   :  { %v8661_v7 = vld [vmem:[#allocation6 + $0xfc4] sm:$0xf]  ;;  %v7268_v12 = vor.u32 %v8597_v1, %v7265_v2  ;;  %3480 = vmatpush.bf16.msra.mxu2 %v6020_v5  ;;  %3499 = vmatpush.bf16.msrb.mxu0 %v6756_v10 }
  0xd3   :  { %v7521_v8 = vld [vmem:[#allocation6 + $0xfe0] sm:$0xf0]  ;;  %3468 = vmatmul.bf16.vlgmr.msra.gmra.mxu1 %v9304_v21 }
  0xd4   :  { %v8461_v13 = vld [vmem:[#allocation6 + $0x984] sm:$0xf]  ;;  %v7524_v16 = vor.u32 %v8661_v7, %v7521_v8  ;;  %3493 = vmatpush.bf16.msra.mxu3 %v6276_v9  ;;  %3512 = vmatpush.bf16.msrb.mxu1 %v7012_v11 }
  0xd5   :  { %v6721_v14 = vld [vmem:[#allocation6 + $0x9a0] sm:$0xf0]  ;;  %3481 = vmatmul.bf16.vlgmr.msra.gmra.mxu2 %v9296_v4 }
  0xd6   :  { %v8525_v15 = vld [vmem:[#allocation6 + $0xb84] sm:$0xf]  ;;  %v6724_v24 = vor.u32 %v8461_v13, %v6721_v14  ;;  %3525 = vmatpush.bf16.msrb.mxu2 %v7268_v12 }
  0xd7   :  { %v6977_v17 = vld [vmem:[#allocation6 + $0xba0] sm:$0xf0]  ;;  %3494 = vmatmul.bf16.vlgmr.msra.gmra.mxu3 %v9298_v6 }
  0xd8   :  { %v8589_v18 = vld [vmem:[#allocation6 + $0xd84] sm:$0xf]  ;;  %v6980_v25 = vor.u32 %v8525_v15, %v6977_v17  ;;  %3538 = vmatpush.bf16.msrb.mxu3 %v7524_v16  ;;  %3500 = vmatpush.bf16.msrb.mxu0 %v6724_v24 }
  0xd9   :  { %v7233_v19 = vld [vmem:[#allocation6 + $0xda0] sm:$0xf0] }
  0xda   :  { %v8653_v22 = vld [vmem:[#allocation6 + $0xf84] sm:$0xf]  ;;  %v7236_v26 = vor.u32 %v8589_v18, %v7233_v19  ;;  %3513 = vmatpush.bf16.msrb.mxu1 %v6980_v25 }
  0xdb   :  { %v7489_v23 = vld [vmem:[#allocation6 + $0xfa0] sm:$0xf0] }
  0xdc   :  { %v8453_v27 = vld [vmem:[#allocation6 + $0x944] sm:$0xf]  ;;  %v7492_v30 = vor.u32 %v8653_v22, %v7489_v23  ;;  %3526 = vmatpush.bf16.msrb.mxu2 %v7236_v26 }
  0xdd   :  { %v6689_v28 = vld [vmem:[#allocation6 + $0x960] sm:$0xf0] }
  0xde   :  { %v8517_v29 = vld [vmem:[#allocation6 + $0xb44] sm:$0xf]  ;;  %v6692_v36 = vor.u32 %v8453_v27, %v6689_v28  ;;  %3539 = vmatpush.bf16.msrb.mxu3 %v7492_v30 }
  0xdf   :  { %v6945_v31 = vld [vmem:[#allocation6 + $0xb60] sm:$0xf0] }
  0xe0   :  { %v8581_v32 = vld [vmem:[#allocation6 + $0xd44] sm:$0xf]  ;;  %v6948_v37 = vor.u32 %v8517_v29, %v6945_v31  ;;  %3501 = vmatpush.bf16.msrb.mxu0 %v6692_v36 }
  0xe1   :  { %v7201_v33 = vld [vmem:[#allocation6 + $0xd60] sm:$0xf0] }
  0xe2   :  { %v8645_v34 = vld [vmem:[#allocation6 + $0xf44] sm:$0xf]  ;;  %v7204_v39 = vor.u32 %v8581_v32, %v7201_v33  ;;  %3514 = vmatpush.bf16.msrb.mxu1 %v6948_v37 }
  0xe3   :  { %v7457_v35 = vld [vmem:[#allocation6 + $0xf60] sm:$0xf0] }
  0xe4   :  { %v8445_v40 = vld [vmem:[#allocation6 + $0x904] sm:$0xf]  ;;  %v7460_v46 = vor.u32 %v8645_v34, %v7457_v35  ;;  %3527 = vmatpush.bf16.msrb.mxu2 %v7204_v39 }
  0xe5   :  { %v6657_v43 = vld [vmem:[#allocation6 + $0x920] sm:$0xf0] }
  0xe6   :  { %v8509_v45 = vld [vmem:[#allocation6 + $0xb04] sm:$0xf]  ;;  %v6660_v52 = vor.u32 %v8445_v40, %v6657_v43  ;;  %3540 = vmatpush.bf16.msrb.mxu3 %v7460_v46  ;;  %v5735_v43 = vld [vmem:[#allocation6 + $0x1c8] sm:$0xf] }
  0xe7   :  { %v6913_v47 = vld [vmem:[#allocation6 + $0xb20] sm:$0xf0]  ;;  %v5991_v46 = vld [vmem:[#allocation6 + $0x3c8] sm:$0xf] }
  0xe8   :  { %v8573_v48 = vld [vmem:[#allocation6 + $0xd04] sm:$0xf]  ;;  %v6916_v53 = vor.u32 %v8509_v45, %v6913_v47  ;;  %3502 = vmatpush.bf16.msrb.mxu0 %v6660_v52  ;;  %v8218_v45 = vld [vmem:[#allocation6 + $0x1e4] sm:$0xf0] }
  0xe9   :  { %v7169_v49 = vld [vmem:[#allocation6 + $0xd20] sm:$0xf0] }
  0xea   :  { %v8637_v50 = vld [vmem:[#allocation6 + $0xf04] sm:$0xf]  ;;  %v7172_v54 = vor.u32 %v8573_v48, %v7169_v49  ;;  %3515 = vmatpush.bf16.msrb.mxu1 %v6916_v53  ;;  %v8282_v48 = vld [vmem:[#allocation6 + $0x3e4] sm:$0xf0] }
  0xeb   :  { %v7425_v51 = vld [vmem:[#allocation6 + $0xf20] sm:$0xf0]  ;;  %v6247_v49 = vld [vmem:[#allocation6 + $0x5c8] sm:$0xf] }
  0xec   :  { %v8437_v55 = vld [vmem:[#allocation6 + $0x8c4] sm:$0xf]  ;;  %v7428_v58 = vor.u32 %v8637_v50, %v7425_v51  ;;  %3528 = vmatpush.bf16.msrb.mxu2 %v7172_v54  ;;  %v8346_v50 = vld [vmem:[#allocation6 + $0x5e4] sm:$0xf0] }
  0xed   :  { %v6625_v56 = vld [vmem:[#allocation6 + $0x8e0] sm:$0xf0]  ;;  %v6503_v53 = vld [vmem:[#allocation6 + $0x7c8] sm:$0xf] }
  0xee   :  { %v8501_v57 = vld [vmem:[#allocation6 + $0xac4] sm:$0xf]  ;;  %v6628_v0 = vor.u32 %v8437_v55, %v6625_v56  ;;  %3541 = vmatpush.bf16.msrb.mxu3 %v7428_v58  ;;  %v8410_v54 = vld [vmem:[#allocation6 + $0x7e4] sm:$0xf0]  ;;  %v5736_v56 = vor.u32 %v8218_v45, %v5735_v43  ;;  %v6248_v58 = vor.u32 %v8346_v50, %v6247_v49 }
  0xef   :  { %v6881_v59 = vld [vmem:[#allocation6 + $0xae0] sm:$0xf0]  ;;  %v6119_v43 = vld [vmem:[#allocation6 + $0x4c8] sm:$0xf] }
  0xf0   :  { %v8565_v60 = vld [vmem:[#allocation6 + $0xcc4] sm:$0xf]  ;;  %v6884_v1 = vor.u32 %v8501_v57, %v6881_v59  ;;  %3503 = vmatpush.bf16.msrb.mxu0 %v6628_v0  ;;  %v5992_v57 = vor.u32 %v8282_v48, %v5991_v46  ;;  %v5703_v59 = vld [vmem:[#allocation6 + $0x188] sm:$0xf] }
  0xf1   :  { %v7137_v61 = vld [vmem:[#allocation6 + $0xce0] sm:$0xf0]  ;;  %v6215_v0 = vld [vmem:[#allocation6 + $0x588] sm:$0xf] }
  0xf2   :  { %v8629_v62 = vld [vmem:[#allocation6 + $0xec4] sm:$0xf]  ;;  %v7140_v2 = vor.u32 %v8565_v60, %v7137_v61  ;;  %3516 = vmatpush.bf16.msrb.mxu1 %v6884_v1  ;;  %v8210_v60 = vld [vmem:[#allocation6 + $0x1a4] sm:$0xf0] }
  0xf3   :  { %v7393_v63 = vld [vmem:[#allocation6 + $0xee0] sm:$0xf0]  ;;  %v5959_v61 = vld [vmem:[#allocation6 + $0x388] sm:$0xf] }
  0xf4   :  { %v8429_v3 = vld [vmem:[#allocation6 + $0x884] sm:$0xf]  ;;  %v7396_v8 = vor.u32 %v8629_v62, %v7393_v63  ;;  %3529 = vmatpush.bf16.msrb.mxu2 %v7140_v2  ;;  %v6504_v62 = vor.u32 %v8410_v54, %v6503_v53  ;;  %v8274_v63 = vld [vmem:[#allocation6 + $0x3a4] sm:$0xf0] }
  0xf5   :  { %v6593_v5 = vld [vmem:[#allocation6 + $0x8a0] sm:$0xf0]  ;;  %v8338_v1 = vld [vmem:[#allocation6 + $0x5a4] sm:$0xf0] }
  0xf6   :  { %v8493_v7 = vld [vmem:[#allocation6 + $0xa84] sm:$0xf]  ;;  %v6596_v14 = vor.u32 %v8429_v3, %v6593_v5  ;;  %3542 = vmatpush.bf16.msrb.mxu3 %v7396_v8  ;;  %v6471_v2 = vld [vmem:[#allocation6 + $0x788] sm:$0xf]  ;;  %v5704_v5 = vor.u32 %v8210_v60, %v5703_v59  ;;  %v6216_v8 = vor.u32 %v8338_v1, %v6215_v0 }
  0xf7   :  { %v6849_v9 = vld [vmem:[#allocation6 + $0xaa0] sm:$0xf0]  ;;  %v8402_v3 = vld [vmem:[#allocation6 + $0x7a4] sm:$0xf0] }
  0xf8   :  { %v8557_v10 = vld [vmem:[#allocation6 + $0xc84] sm:$0xf]  ;;  %v6852_v15 = vor.u32 %v8493_v7, %v6849_v9  ;;  %3504 = vmatpush.bf16.msrb.mxu0 %v6596_v14  ;;  %v5960_v7 = vor.u32 %v8274_v63, %v5959_v61  ;;  %v5671_v9 = vld [vmem:[#allocation6 + $0x148] sm:$0xf] }
  0xf9   :  { %v7105_v11 = vld [vmem:[#allocation6 + $0xca0] sm:$0xf0]  ;;  %v6183_v14 = vld [vmem:[#allocation6 + $0x548] sm:$0xf] }
  0xfa   :  { %v8621_v12 = vld [vmem:[#allocation6 + $0xe84] sm:$0xf]  ;;  %v7108_v16 = vor.u32 %v8557_v10, %v7105_v11  ;;  %3517 = vmatpush.bf16.msrb.mxu1 %v6852_v15  ;;  %v8202_v10 = vld [vmem:[#allocation6 + $0x164] sm:$0xf0] }
  0xfb   :  { %v7361_v13 = vld [vmem:[#allocation6 + $0xea0] sm:$0xf0]  ;;  %v5927_v11 = vld [vmem:[#allocation6 + $0x348] sm:$0xf] }
  0xfc   :  { %v8421_v17 = vld [vmem:[#allocation6 + $0x844] sm:$0xf]  ;;  %v7364_v22 = vor.u32 %v8621_v12, %v7361_v13  ;;  %3530 = vmatpush.bf16.msrb.mxu2 %v7108_v16  ;;  %v6472_v12 = vor.u32 %v8402_v3, %v6471_v2  ;;  %v8266_v13 = vld [vmem:[#allocation6 + $0x364] sm:$0xf0] }
  0xfd   :  { %v6561_v18 = vld [vmem:[#allocation6 + $0x860] sm:$0xf0]  ;;  %v8330_v15 = vld [vmem:[#allocation6 + $0x564] sm:$0xf0] }
  0xfe   :  { %v8485_v19 = vld [vmem:[#allocation6 + $0xa44] sm:$0xf]  ;;  %v6564_v28 = vor.u32 %v8421_v17, %v6561_v18  ;;  %3543 = vmatpush.bf16.msrb.mxu3 %v7364_v22  ;;  %v6439_v16 = vld [vmem:[#allocation6 + $0x748] sm:$0xf]  ;;  %v5672_v18 = vor.u32 %v8202_v10, %v5671_v9  ;;  %v6184_v22 = vor.u32 %v8330_v15, %v6183_v14 }
  0xff   :  { %v6817_v23 = vld [vmem:[#allocation6 + $0xa60] sm:$0xf0]  ;;  %v8394_v17 = vld [vmem:[#allocation6 + $0x764] sm:$0xf0] }
 0x100   :  { %v8549_v24 = vld [vmem:[#allocation6 + $0xc44] sm:$0xf]  ;;  %v6820_v31 = vor.u32 %v8485_v19, %v6817_v23  ;;  %3505 = vmatpush.bf16.msrb.mxu0 %v6564_v28  ;;  %v5928_v19 = vor.u32 %v8266_v13, %v5927_v11  ;;  %v5639_v23 = vld [vmem:[#allocation6 + $0x108] sm:$0xf] }
 0x101   :  { %v7073_v25 = vld [vmem:[#allocation6 + $0xc60] sm:$0xf0]  ;;  %v6151_v28 = vld [vmem:[#allocation6 + $0x508] sm:$0xf] }
 0x102   :  { %v8613_v26 = vld [vmem:[#allocation6 + $0xe44] sm:$0xf]  ;;  %v7076_v32 = vor.u32 %v8549_v24, %v7073_v25  ;;  %3518 = vmatpush.bf16.msrb.mxu1 %v6820_v31  ;;  %v8194_v24 = vld [vmem:[#allocation6 + $0x124] sm:$0xf0] }
 0x103   :  { %v7329_v27 = vld [vmem:[#allocation6 + $0xe60] sm:$0xf0]  ;;  %v5895_v25 = vld [vmem:[#allocation6 + $0x308] sm:$0xf] }
 0x104   :  { %v8413_v29 = vld [vmem:[#allocation6 + $0x804] sm:$0xf]  ;;  %v7332_v36 = vor.u32 %v8613_v26, %v7329_v27  ;;  %3531 = vmatpush.bf16.msrb.mxu2 %v7076_v32  ;;  %v6440_v26 = vor.u32 %v8394_v17, %v6439_v16  ;;  %v8258_v27 = vld [vmem:[#allocation6 + $0x324] sm:$0xf0]  ;;  %v5640_v32 = vor.u32 %v8194_v24, %v5639_v23 }
 0x105   :  { %v6529_v30 = vld [vmem:[#allocation6 + $0x820] sm:$0xf0]  ;;  %v8386_v31 = vld [vmem:[#allocation6 + $0x724] sm:$0xf0] }
 0x106   :  { %v8477_v33 = vld [vmem:[#allocation6 + $0xa04] sm:$0xf]  ;;  %v6532_v47 = vor.u32 %v8413_v29, %v6529_v30  ;;  %3544 = vmatpush.bf16.msrb.mxu3 %v7332_v36  ;;  %v8322_v29 = vld [vmem:[#allocation6 + $0x524] sm:$0xf0] }
 0x107   :  { %v6785_v34 = vld [vmem:[#allocation6 + $0xa20] sm:$0xf0]  ;;  %v6407_v30 = vld [vmem:[#allocation6 + $0x708] sm:$0xf] }
 0x108   :  { %v8541_v35 = vld [vmem:[#allocation6 + $0xc04] sm:$0xf]  ;;  %v6788_v51 = vor.u32 %v8477_v33, %v6785_v34  ;;  %3506 = vmatpush.bf16.msrb.mxu0 %v6532_v47  ;;  %v5896_v33 = vor.u32 %v8258_v27, %v5895_v25  ;;  %v6152_v34 = vor.u32 %v8322_v29, %v6151_v28  ;;  %v8186_v36 = vld [vmem:[#allocation6 + $0xe4] sm:$0xf0] }
 0x109   :  { %v7041_v37 = vld [vmem:[#allocation6 + $0xc20] sm:$0xf0]  ;;  %v8314_v45 = vld [vmem:[#allocation6 + $0x4e4] sm:$0xf0] }
 0x10a   :  { %v8605_v39 = vld [vmem:[#allocation6 + $0xe04] sm:$0xf]  ;;  %v7044_v52 = vor.u32 %v8541_v35, %v7041_v37  ;;  %3519 = vmatpush.bf16.msrb.mxu1 %v6788_v51  ;;  %v5607_v35 = vld [vmem:[#allocation6 + $0xc8] sm:$0xf]  ;;  %v6120_v50 = vor.u32 %v8314_v45, %v6119_v43 }
 0x10b   :  { %v7297_v40 = vld [vmem:[#allocation6 + $0xe20] sm:$0xf0]  ;;  %3507 = vmatmul.bf16.vlgmr.msrb.gmra.mxu0 %v9310_v41  ;;  %v5863_v37 = vld [vmem:[#allocation6 + $0x2c8] sm:$0xf]  ;;  %v5608_v48 = vor.u32 %v8186_v36, %v5607_v35 }
 0x10c   :  { %v7300_v55 = vor.u32 %v8605_v39, %v7297_v40  ;;  %3532 = vmatpush.bf16.msrb.mxu2 %v7044_v52  ;;  %3551 = vmatpush.bf16.msra.mxu0 %v5736_v56  ;;  %v6408_v39 = vor.u32 %v8386_v31, %v6407_v30  ;;  %v8250_v40 = vld [vmem:[#allocation6 + $0x2e4] sm:$0xf0] }
 0x10d   :  { %3520 = vmatmul.bf16.vlgmr.msrb.gmra.mxu1 %v9314_v44  ;;  %v6375_v46 = vld [vmem:[#allocation6 + $0x6c8] sm:$0xf]  ;;  %v5864_v49 = vor.u32 %v8250_v40, %v5863_v37 }
 0x10e   :  { %3545 = vmatpush.bf16.msrb.mxu3 %v7300_v55  ;;  %3564 = vmatpush.bf16.msra.mxu1 %v5992_v57  ;;  %v8378_v47 = vld [vmem:[#allocation6 + $0x6e4] sm:$0xf0] }
 0x10f   :  { %3533 = vmatmul.bf16.vlgmr.msrb.gmra.mxu2 %v9308_v38  ;;  %v5575_v51 = vld [vmem:[#allocation6 + $0x88] sm:$0xf]  ;;  %v6376_v54 = vor.u32 %v8378_v47, %v6375_v46 }
 0x110   :  { %3577 = vmatpush.bf16.msra.mxu2 %v6248_v58  ;;  %3552 = vmatpush.bf16.msra.mxu0 %v5704_v5  ;;  %v8178_v52 = vld [vmem:[#allocation6 + $0xa4] sm:$0xf0] }
 0x111   :  { %3546 = vmatmul.bf16.vlgmr.msrb.gmra.mxu3 %v9312_v42  ;;  %v5831_v53 = vld [vmem:[#allocation6 + $0x288] sm:$0xf]  ;;  %v5576_v60 = vor.u32 %v8178_v52, %v5575_v51 }
 0x112   :  { %3590 = vmatpush.bf16.msra.mxu3 %v6504_v62  ;;  %3565 = vmatpush.bf16.msra.mxu1 %v5960_v7  ;;  %v8242_v55 = vld [vmem:[#allocation6 + $0x2a4] sm:$0xf0] }
 0x113   :  { %v6087_v56 = vld [vmem:[#allocation6 + $0x488] sm:$0xf]  ;;  %v5832_v61 = vor.u32 %v8242_v55, %v5831_v53 }
 0x114   :  { %3578 = vmatpush.bf16.msra.mxu2 %v6216_v8  ;;  %3553 = vmatpush.bf16.msra.mxu0 %v5672_v18  ;;  %v8306_v57 = vld [vmem:[#allocation6 + $0x4a4] sm:$0xf0] }
 0x115   :  { %v6343_v58 = vld [vmem:[#allocation6 + $0x688] sm:$0xf]  ;;  %v6088_v62 = vor.u32 %v8306_v57, %v6087_v56 }
 0x116   :  { %3591 = vmatpush.bf16.msra.mxu3 %v6472_v12  ;;  %3566 = vmatpush.bf16.msra.mxu1 %v5928_v19  ;;  %v8370_v59 = vld [vmem:[#allocation6 + $0x6a4] sm:$0xf0] }
 0x117   :  { %v5543_v63 = vld [vmem:[#allocation6 + $0x48] sm:$0xf]  ;;  %v6344_v2 = vor.u32 %v8370_v59, %v6343_v58 }
 0x118   :  { %3579 = vmatpush.bf16.msra.mxu2 %v6184_v22  ;;  %3554 = vmatpush.bf16.msra.mxu0 %v5640_v32  ;;  %v8170_v0 = vld [vmem:[#allocation6 + $0x64] sm:$0xf0] }
 0x119   :  { %v5799_v1 = vld [vmem:[#allocation6 + $0x248] sm:$0xf]  ;;  %v5544_v10 = vor.u32 %v8170_v0, %v5543_v63 }
 0x11a   :  { %3592 = vmatpush.bf16.msra.mxu3 %v6440_v26  ;;  %3567 = vmatpush.bf16.msra.mxu1 %v5896_v33  ;;  %v8234_v3 = vld [vmem:[#allocation6 + $0x264] sm:$0xf0] }
 0x11b   :  { %v6055_v5 = vld [vmem:[#allocation6 + $0x448] sm:$0xf]  ;;  %v5800_v13 = vor.u32 %v8234_v3, %v5799_v1 }
 0x11c   :  { %3580 = vmatpush.bf16.msra.mxu2 %v6152_v34  ;;  %3555 = vmatpush.bf16.msra.mxu0 %v5608_v48  ;;  %v8298_v7 = vld [vmem:[#allocation6 + $0x464] sm:$0xf0] }
 0x11d   :  { %v6311_v8 = vld [vmem:[#allocation6 + $0x648] sm:$0xf]  ;;  %v6056_v14 = vor.u32 %v8298_v7, %v6055_v5 }
 0x11e   :  { %3593 = vmatpush.bf16.msra.mxu3 %v6408_v39  ;;  %3568 = vmatpush.bf16.msra.mxu1 %v5864_v49  ;;  %v8362_v9 = vld [vmem:[#allocation6 + $0x664] sm:$0xf0] }
 0x11f   :  { %v5511_v11 = vld [vmem:[#allocation6 + $0x8] sm:$0xf]  ;;  %v6312_v18 = vor.u32 %v8362_v9, %v6311_v8 }
 0x120   :  { %3581 = vmatpush.bf16.msra.mxu2 %v6120_v50  ;;  %3556 = vmatpush.bf16.msra.mxu0 %v5576_v60  ;;  %v8162_v12 = vld [vmem:[#allocation6 + $0x24] sm:$0xf0] }
 0x121   :  { %v5767_v15 = vld [vmem:[#allocation6 + $0x208] sm:$0xf]  ;;  %v5512_v27 = vor.u32 %v8162_v12, %v5511_v11 }
 0x122   :  { %3594 = vmatpush.bf16.msra.mxu3 %v6376_v54  ;;  %3569 = vmatpush.bf16.msra.mxu1 %v5832_v61  ;;  %v8226_v16 = vld [vmem:[#allocation6 + $0x224] sm:$0xf0] }
 0x123   :  { %v6023_v17 = vld [vmem:[#allocation6 + $0x408] sm:$0xf]  ;;  %v5768_v31 = vor.u32 %v8226_v16, %v5767_v15 }
 0x124   :  { %3582 = vmatpush.bf16.msra.mxu2 %v6088_v62  ;;  %v8290_v19 = vld [vmem:[#allocation6 + $0x424] sm:$0xf0]  ;;  %3557 = vmatpush.bf16.msra.mxu0 %v5544_v10 }
 0x125   :  { %v6279_v22 = vld [vmem:[#allocation6 + $0x608] sm:$0xf]  ;;  %v6024_v32 = vor.u32 %v8290_v19, %v6023_v17 }
 0x126   :  { %3595 = vmatpush.bf16.msra.mxu3 %v6344_v2  ;;  %v8354_v23 = vld [vmem:[#allocation6 + $0x624] sm:$0xf0]  ;;  %3570 = vmatpush.bf16.msra.mxu1 %v5800_v13 }
 0x127   :  { %v6759_v24 = vld [vmem:[#allocation6 + $0x9c8] sm:$0xf]  ;;  %v6280_v35 = vor.u32 %v8354_v23, %v6279_v22 }
 0x128   :  { %v8474_v25 = vld [vmem:[#allocation6 + $0x9e4] sm:$0xf0]  ;;  %3583 = vmatpush.bf16.msra.mxu2 %v6056_v14  ;;  %3558 = vmatpush.bf16.msra.mxu0 %v5512_v27 }
 0x129   :  { %v7015_v26 = vld [vmem:[#allocation6 + $0xbc8] sm:$0xf]  ;;  %v6760_v36 = vor.u32 %v8474_v25, %v6759_v24 }
 0x12a   :  { %v8538_v28 = vld [vmem:[#allocation6 + $0xbe4] sm:$0xf0]  ;;  %3596 = vmatpush.bf16.msra.mxu3 %v6312_v18  ;;  %3571 = vmatpush.bf16.msra.mxu1 %v5768_v31 }
 0x12b   :  { %v7271_v29 = vld [vmem:[#allocation6 + $0xdc8] sm:$0xf]  ;;  %v7016_v37 = vor.u32 %v8538_v28, %v7015_v26  ;;  %3559 = vmatmul.bf16.vlgmr.msra.gmra.mxu0 %v9301_v20 }
 0x12c   :  { %v8602_v30 = vld [vmem:[#allocation6 + $0xde4] sm:$0xf0]  ;;  %3584 = vmatpush.bf16.msra.mxu2 %v6024_v32  ;;  %3603 = vmatpush.bf16.msrb.mxu0 %v6760_v36 }
 0x12d   :  { %v7527_v33 = vld [vmem:[#allocation6 + $0xfc8] sm:$0xf]  ;;  %v7272_v39 = vor.u32 %v8602_v30, %v7271_v29  ;;  %3572 = vmatmul.bf16.vlgmr.msra.gmra.mxu1 %v9304_v21 }
 0x12e   :  { %v8666_v34 = vld [vmem:[#allocation6 + $0xfe4] sm:$0xf0]  ;;  %3597 = vmatpush.bf16.msra.mxu3 %v6280_v35  ;;  %3616 = vmatpush.bf16.msrb.mxu1 %v7016_v37 }
 0x12f   :  { %v6727_v40 = vld [vmem:[#allocation6 + $0x988] sm:$0xf]  ;;  %v7528_v46 = vor.u32 %v8666_v34, %v7527_v33  ;;  %3585 = vmatmul.bf16.vlgmr.msra.gmra.mxu2 %v9296_v4 }
 0x130   :  { %v8466_v43 = vld [vmem:[#allocation6 + $0x9a4] sm:$0xf0]  ;;  %3629 = vmatpush.bf16.msrb.mxu2 %v7272_v39 }
 0x131   :  { %v6983_v45 = vld [vmem:[#allocation6 + $0xb88] sm:$0xf]  ;;  %v6728_v52 = vor.u32 %v8466_v43, %v6727_v40  ;;  %3598 = vmatmul.bf16.vlgmr.msra.gmra.mxu3 %v9298_v6  ;;  %v3352_v43 = vpop.f32.mrf.mxu0 }
 0x132   :  { %v8530_v47 = vld [vmem:[#allocation6 + $0xba4] sm:$0xf0]  ;;  %3642 = vmatpush.bf16.msrb.mxu3 %v7528_v46  ;;  %v3365_v46 = vpop.f32.mrf.mxu1 }
 0x133   :  { %v7239_v48 = vld [vmem:[#allocation6 + $0xd88] sm:$0xf]  ;;  %v6984_v53 = vor.u32 %v8530_v47, %v6983_v45  ;;  %3604 = vmatpush.bf16.msrb.mxu0 %v6728_v52  ;;  %v3366_v52 = vadd.f32 %v3365_v46, %v3352_v43  ;;  %v6217_v43 = vld [vmem:[#allocation6 + $0x5a8] sm:$0xf0] }
 0x134   :  { %v8594_v49 = vld [vmem:[#allocation6 + $0xda4] sm:$0xf0]  ;;  %v6473_v46 = vld [vmem:[#allocation6 + $0x7a8] sm:$0xf0] }
 0x135   :  { %v7495_v50 = vld [vmem:[#allocation6 + $0xf88] sm:$0xf]  ;;  %v7240_v54 = vor.u32 %v8594_v49, %v7239_v48  ;;  %3617 = vmatpush.bf16.msrb.mxu1 %v6984_v53  ;;  %v3378_v53 = vpop.f32.mrf.mxu2 }
 0x136   :  { %v8658_v51 = vld [vmem:[#allocation6 + $0xfa4] sm:$0xf0] }
 0x137   :  { %v6695_v55 = vld [vmem:[#allocation6 + $0x948] sm:$0xf]  ;;  %v7496_v58 = vor.u32 %v8658_v51, %v7495_v50  ;;  %3630 = vmatpush.bf16.msrb.mxu2 %v7240_v54 }
 0x138   :  { %v8458_v56 = vld [vmem:[#allocation6 + $0x964] sm:$0xf0] }
 0x139   :  { %v6951_v57 = vld [vmem:[#allocation6 + $0xb48] sm:$0xf]  ;;  %v6696_v0 = vor.u32 %v8458_v56, %v6695_v55  ;;  %3643 = vmatpush.bf16.msrb.mxu3 %v7496_v58  ;;  %v3391_v58 = vpop.f32.mrf.mxu3 }
 0x13a   :  { %v8522_v59 = vld [vmem:[#allocation6 + $0xb64] sm:$0xf0] }
 0x13b   :  { %v7207_v60 = vld [vmem:[#allocation6 + $0xd48] sm:$0xf]  ;;  %v6952_v1 = vor.u32 %v8522_v59, %v6951_v57  ;;  %3605 = vmatpush.bf16.msrb.mxu0 %v6696_v0 }
 0x13c   :  { %v8586_v61 = vld [vmem:[#allocation6 + $0xd64] sm:$0xf0] }
 0x13d   :  { %v7463_v62 = vld [vmem:[#allocation6 + $0xf48] sm:$0xf]  ;;  %v7208_v2 = vor.u32 %v8586_v61, %v7207_v60  ;;  %3618 = vmatpush.bf16.msrb.mxu1 %v6952_v1  ;;  %v3379_v61 = vadd.f32 %v3378_v53, %v3366_v52  ;;  %v8262_v52 = vld [vmem:[#allocation6 + $0x34c] sm:$0xf] }
 0x13e   :  { %v8650_v63 = vld [vmem:[#allocation6 + $0xf64] sm:$0xf0] }
 0x13f   :  { %v6663_v3 = vld [vmem:[#allocation6 + $0x908] sm:$0xf]  ;;  %v7464_v8 = vor.u32 %v8650_v63, %v7463_v62  ;;  %3631 = vmatpush.bf16.msrb.mxu2 %v7208_v2 }
 0x140   :  { %v8450_v5 = vld [vmem:[#allocation6 + $0x924] sm:$0xf0] }
 0x141   :  { %v6919_v7 = vld [vmem:[#allocation6 + $0xb08] sm:$0xf]  ;;  %v6664_v14 = vor.u32 %v8450_v5, %v6663_v3  ;;  %3644 = vmatpush.bf16.msrb.mxu3 %v7464_v8  ;;  %v9332_v8 = vadd.f32 %v3391_v58, %v3379_v61  ;;  %v6441_v58 = vld [vmem:[#allocation6 + $0x768] sm:$0xf0] }
 0x142   :  { %v8514_v9 = vld [vmem:[#allocation6 + $0xb24] sm:$0xf0] }
 0x143   :  { %v7175_v10 = vld [vmem:[#allocation6 + $0xd08] sm:$0xf]  ;;  %v6920_v15 = vor.u32 %v8514_v9, %v6919_v7  ;;  %3606 = vmatpush.bf16.msrb.mxu0 %v6664_v14  ;;  %v5737_v14 = vld [vmem:[#allocation6 + $0x1e8] sm:$0xf0] }
 0x144   :  { %v8578_v11 = vld [vmem:[#allocation6 + $0xd24] sm:$0xf0] }
 0x145   :  { %v7431_v12 = vld [vmem:[#allocation6 + $0xf08] sm:$0xf]  ;;  %v7176_v16 = vor.u32 %v8578_v11, %v7175_v10  ;;  %3619 = vmatpush.bf16.msrb.mxu1 %v6920_v15  ;;  %v8278_v15 = vld [vmem:[#allocation6 + $0x3cc] sm:$0xf] }
 0x146   :  { %v8642_v13 = vld [vmem:[#allocation6 + $0xf24] sm:$0xf0] }
 0x147   :  { %v6631_v17 = vld [vmem:[#allocation6 + $0x8c8] sm:$0xf]  ;;  %v7432_v22 = vor.u32 %v8642_v13, %v7431_v12  ;;  %3632 = vmatpush.bf16.msrb.mxu2 %v7176_v16  ;;  %v8214_v13 = vld [vmem:[#allocation6 + $0x1cc] sm:$0xf]  ;;  %v3354_v16 = vpop.f32.mrf.mxu0 }
 0x148   :  { %v8442_v18 = vld [vmem:[#allocation6 + $0x8e4] sm:$0xf0]  ;;  %v8246_v16 = vld [vmem:[#allocation6 + $0x2cc] sm:$0xf] }
 0x149   :  { %v6887_v19 = vld [vmem:[#allocation6 + $0xac8] sm:$0xf]  ;;  %v6632_v28 = vor.u32 %v8442_v18, %v6631_v17  ;;  %3645 = vmatpush.bf16.msrb.mxu3 %v7432_v22  ;;  %v5993_v18 = vld [vmem:[#allocation6 + $0x3e8] sm:$0xf0] }
 0x14a   :  { %v8506_v23 = vld [vmem:[#allocation6 + $0xae4] sm:$0xf0]  ;;  %v6249_v22 = vld [vmem:[#allocation6 + $0x5e8] sm:$0xf0] }
 0x14b   :  { %v7143_v24 = vld [vmem:[#allocation6 + $0xcc8] sm:$0xf]  ;;  %v6888_v29 = vor.u32 %v8506_v23, %v6887_v19  ;;  %3607 = vmatpush.bf16.msrb.mxu0 %v6632_v28  ;;  %v8342_v19 = vld [vmem:[#allocation6 + $0x5cc] sm:$0xf]  ;;  %v3367_v23 = vpop.f32.mrf.mxu1  ;;  %v3380_v28 = vpop.f32.mrf.mxu2 }
 0x14c   :  { %v8570_v25 = vld [vmem:[#allocation6 + $0xce4] sm:$0xf0]  ;;  %v8310_v23 = vld [vmem:[#allocation6 + $0x4cc] sm:$0xf] }
 0x14d   :  { %v7399_v26 = vld [vmem:[#allocation6 + $0xec8] sm:$0xf]  ;;  %v7144_v30 = vor.u32 %v8570_v25, %v7143_v24  ;;  %3620 = vmatpush.bf16.msrb.mxu1 %v6888_v29 }
 0x14e   :  { %v8634_v27 = vld [vmem:[#allocation6 + $0xee4] sm:$0xf0] }
 0x14f   :  { %v6599_v31 = vld [vmem:[#allocation6 + $0x888] sm:$0xf]  ;;  %v7400_v34 = vor.u32 %v8634_v27, %v7399_v26  ;;  %3633 = vmatpush.bf16.msrb.mxu2 %v7144_v30  ;;  %v8406_v26 = vld [vmem:[#allocation6 + $0x7cc] sm:$0xf]  ;;  %v5740_v30 = vor.u32 %v8214_v13, %v5737_v14 }
 0x150   :  { %v8434_v32 = vld [vmem:[#allocation6 + $0x8a4] sm:$0xf0]  ;;  %v6505_v27 = vld [vmem:[#allocation6 + $0x7e8] sm:$0xf0] }
 0x151   :  { %v6855_v33 = vld [vmem:[#allocation6 + $0xa88] sm:$0xf]  ;;  %v6600_v45 = vor.u32 %v8434_v32, %v6599_v31  ;;  %3646 = vmatpush.bf16.msrb.mxu3 %v7400_v34  ;;  %v3393_v31 = vpop.f32.mrf.mxu3  ;;  %v5996_v32 = vor.u32 %v8278_v15, %v5993_v18  ;;  %v8206_v34 = vld [vmem:[#allocation6 + $0x18c] sm:$0xf] }
 0x152   :  { %v8498_v35 = vld [vmem:[#allocation6 + $0xaa4] sm:$0xf0]  ;;  %v8182_v14 = vld [vmem:[#allocation6 + $0xcc] sm:$0xf] }
 0x153   :  { %v7111_v36 = vld [vmem:[#allocation6 + $0xc88] sm:$0xf]  ;;  %v6856_v47 = vor.u32 %v8498_v35, %v6855_v33  ;;  %3608 = vmatpush.bf16.msrb.mxu0 %v6600_v45  ;;  %v6252_v33 = vor.u32 %v8342_v19, %v6249_v22  ;;  %v5705_v35 = vld [vmem:[#allocation6 + $0x1a8] sm:$0xf0]  ;;  %v3417_v18 = vpop.f32.mrf.mxu1 }
 0x154   :  { %v8562_v37 = vld [vmem:[#allocation6 + $0xca4] sm:$0xf0]  ;;  %v8398_v45 = vld [vmem:[#allocation6 + $0x78c] sm:$0xf] }
 0x155   :  { %v7367_v39 = vld [vmem:[#allocation6 + $0xe88] sm:$0xf]  ;;  %v7112_v48 = vor.u32 %v8562_v37, %v7111_v36  ;;  %3621 = vmatpush.bf16.msrb.mxu1 %v6856_v47  ;;  %v8270_v36 = vld [vmem:[#allocation6 + $0x38c] sm:$0xf]  ;;  %v6508_v37 = vor.u32 %v8406_v26, %v6505_v27  ;;  %v5708_v47 = vor.u32 %v8206_v34, %v5705_v35  ;;  %v6476_v53 = vor.u32 %v8398_v45, %v6473_v46  ;;  %v3430_v34 = vpop.f32.mrf.mxu2 }
 0x156   :  { %v8626_v40 = vld [vmem:[#allocation6 + $0xea4] sm:$0xf0]  ;;  %v5609_v15 = vld [vmem:[#allocation6 + $0xe8] sm:$0xf0] }
 0x157   :  { %v6567_v49 = vld [vmem:[#allocation6 + $0x848] sm:$0xf]  ;;  %v7368_v54 = vor.u32 %v8626_v40, %v7367_v39  ;;  %3634 = vmatpush.bf16.msrb.mxu2 %v7112_v48  ;;  %v5961_v39 = vld [vmem:[#allocation6 + $0x3a8] sm:$0xf0]  ;;  %v5612_v28 = vor.u32 %v8182_v14, %v5609_v15 }
 0x158   :  { %v8426_v50 = vld [vmem:[#allocation6 + $0x864] sm:$0xf0]  ;;  %v8334_v40 = vld [vmem:[#allocation6 + $0x58c] sm:$0xf]  ;;  %v5964_v48 = vor.u32 %v8270_v36, %v5961_v39 }
 0x159   :  { %v6823_v51 = vld [vmem:[#allocation6 + $0xa48] sm:$0xf]  ;;  %v6568_v62 = vor.u32 %v8426_v50, %v6567_v49  ;;  %3647 = vmatpush.bf16.msrb.mxu3 %v7368_v54  ;;  %v6220_v49 = vor.u32 %v8334_v40, %v6217_v43  ;;  %v8198_v50 = vld [vmem:[#allocation6 + $0x14c] sm:$0xf]  ;;  %v3443_v40 = vpop.f32.mrf.mxu3 }
 0x15a   :  { %v8490_v55 = vld [vmem:[#allocation6 + $0xa64] sm:$0xf0]  ;;  %v5929_v54 = vld [vmem:[#allocation6 + $0x368] sm:$0xf0] }
 0x15b   :  { %v7079_v56 = vld [vmem:[#allocation6 + $0xc48] sm:$0xf]  ;;  %v6824_v1 = vor.u32 %v8490_v55, %v6823_v51  ;;  %3609 = vmatpush.bf16.msrb.mxu0 %v6568_v62  ;;  %v5673_v51 = vld [vmem:[#allocation6 + $0x168] sm:$0xf0] }
 0x15c   :  { %v8554_v57 = vld [vmem:[#allocation6 + $0xc64] sm:$0xf0]  ;;  %v8326_v55 = vld [vmem:[#allocation6 + $0x54c] sm:$0xf] }
 0x15d   :  { %v7335_v59 = vld [vmem:[#allocation6 + $0xe48] sm:$0xf]  ;;  %v7080_v2 = vor.u32 %v8554_v57, %v7079_v56  ;;  %3622 = vmatpush.bf16.msrb.mxu1 %v6824_v1  ;;  %v6185_v56 = vld [vmem:[#allocation6 + $0x568] sm:$0xf0] }
 0x15e   :  { %v8618_v60 = vld [vmem:[#allocation6 + $0xe64] sm:$0xf0]  ;;  %v8390_v57 = vld [vmem:[#allocation6 + $0x74c] sm:$0xf]  ;;  %v6188_v61 = vor.u32 %v8326_v55, %v6185_v56 }
 0x15f   :  { %v6535_v63 = vld [vmem:[#allocation6 + $0x808] sm:$0xf]  ;;  %v7336_v9 = vor.u32 %v8618_v60, %v7335_v59  ;;  %3635 = vmatpush.bf16.msrb.mxu2 %v7080_v2  ;;  %v5676_v59 = vor.u32 %v8198_v50, %v5673_v51  ;;  %v5932_v60 = vor.u32 %v8262_v52, %v5929_v54  ;;  %v8190_v62 = vld [vmem:[#allocation6 + $0x10c] sm:$0xf]  ;;  %v6444_v1 = vor.u32 %v8390_v57, %v6441_v58  ;;  %v3419_v54 = vpop.f32.mrf.mxu1 }
 0x160   :  { %v8418_v0 = vld [vmem:[#allocation6 + $0x824] sm:$0xf0]  ;;  %v5897_v2 = vld [vmem:[#allocation6 + $0x328] sm:$0xf0] }
 0x161   :  { %v6791_v3 = vld [vmem:[#allocation6 + $0xa08] sm:$0xf]  ;;  %v6536_v17 = vor.u32 %v8418_v0, %v6535_v63  ;;  %3648 = vmatpush.bf16.msrb.mxu3 %v7336_v9  ;;  %v5641_v63 = vld [vmem:[#allocation6 + $0x128] sm:$0xf0] }
 0x162   :  { %v8482_v5 = vld [vmem:[#allocation6 + $0xa24] sm:$0xf0]  ;;  %v8254_v0 = vld [vmem:[#allocation6 + $0x30c] sm:$0xf] }
 0x163   :  { %v7047_v7 = vld [vmem:[#allocation6 + $0xc08] sm:$0xf]  ;;  %v6792_v24 = vor.u32 %v8482_v5, %v6791_v3  ;;  %3610 = vmatpush.bf16.msrb.mxu0 %v6536_v17  ;;  %v8318_v3 = vld [vmem:[#allocation6 + $0x50c] sm:$0xf] }
 0x164   :  { %v8546_v10 = vld [vmem:[#allocation6 + $0xc24] sm:$0xf0]  ;;  %v6153_v5 = vld [vmem:[#allocation6 + $0x528] sm:$0xf0] }
 0x165   :  { %v7303_v11 = vld [vmem:[#allocation6 + $0xe08] sm:$0xf]  ;;  %v7048_v25 = vor.u32 %v8546_v10, %v7047_v7  ;;  %3623 = vmatpush.bf16.msrb.mxu1 %v6792_v24  ;;  %v8382_v7 = vld [vmem:[#allocation6 + $0x70c] sm:$0xf]  ;;  %v5644_v10 = vor.u32 %v8190_v62, %v5641_v63  ;;  %v6156_v13 = vor.u32 %v8318_v3, %v6153_v5 }
 0x166   :  { %v8610_v12 = vld [vmem:[#allocation6 + $0xe24] sm:$0xf0]  ;;  %3611 = vmatmul.bf16.vlgmr.msrb.gmra.mxu0 %v9310_v41  ;;  %v6409_v9 = vld [vmem:[#allocation6 + $0x728] sm:$0xf0] }
 0x167   :  { %v7304_v29 = vor.u32 %v8610_v12, %v7303_v11  ;;  %3636 = vmatpush.bf16.msrb.mxu2 %v7048_v25  ;;  %3655 = vmatpush.bf16.msra.mxu0 %v5740_v30  ;;  %v3404_v11 = vpop.f32.mrf.mxu0  ;;  %v5900_v12 = vor.u32 %v8254_v0, %v5897_v2  ;;  %v6412_v19 = vor.u32 %v8382_v7, %v6409_v9  ;;  %v5865_v22 = vld [vmem:[#allocation6 + $0x2e8] sm:$0xf0]  ;;  %v3432_v7 = vpop.f32.mrf.mxu2 }
 0x168   :  { %3624 = vmatmul.bf16.vlgmr.msrb.gmra.mxu1 %v9314_v44  ;;  %v3405_v17 = vadd.f32 %v3404_v11, %v9332_v8  ;;  %v6121_v24 = vld [vmem:[#allocation6 + $0x4e8] sm:$0xf0] }
 0x169   :  { %3649 = vmatpush.bf16.msrb.mxu3 %v7304_v29  ;;  %3668 = vmatpush.bf16.msra.mxu1 %v5996_v32  ;;  %v8374_v25 = vld [vmem:[#allocation6 + $0x6cc] sm:$0xf]  ;;  %v5868_v29 = vor.u32 %v8246_v16, %v5865_v22  ;;  %v6124_v30 = vor.u32 %v8310_v23, %v6121_v24 }
 0x16a   :  { %3637 = vmatmul.bf16.vlgmr.msrb.gmra.mxu2 %v9308_v38  ;;  %v6377_v26 = vld [vmem:[#allocation6 + $0x6e8] sm:$0xf0]  ;;  %v3418_v27 = vadd.f32 %v3417_v18, %v3405_v17 }
 0x16b   :  { %3681 = vmatpush.bf16.msra.mxu2 %v6252_v33  ;;  %3656 = vmatpush.bf16.msra.mxu0 %v5708_v47  ;;  %v8174_v31 = vld [vmem:[#allocation6 + $0x8c] sm:$0xf]  ;;  %v6380_v8 = vor.u32 %v8374_v25, %v6377_v26 }
 0x16c   :  { %3650 = vmatmul.bf16.vlgmr.msrb.gmra.mxu3 %v9312_v42  ;;  %v5577_v32 = vld [vmem:[#allocation6 + $0xa8] sm:$0xf0]  ;;  %v3431_v39 = vadd.f32 %v3430_v34, %v3418_v27 }
 0x16d   :  { %3694 = vmatpush.bf16.msra.mxu3 %v6508_v37  ;;  %3669 = vmatpush.bf16.msra.mxu1 %v5964_v48  ;;  %v8238_v33 = vld [vmem:[#allocation6 + $0x28c] sm:$0xf]  ;;  %v5580_v46 = vor.u32 %v8174_v31, %v5577_v32 }
 0x16e   :  { %v5833_v35 = vld [vmem:[#allocation6 + $0x2a8] sm:$0xf0]  ;;  %v9339_v47 = vadd.f32 %v3443_v40, %v3431_v39 }
 0x16f   :  { %3682 = vmatpush.bf16.msra.mxu2 %v6220_v49  ;;  %3657 = vmatpush.bf16.msra.mxu0 %v5676_v59  ;;  %v8302_v36 = vld [vmem:[#allocation6 + $0x48c] sm:$0xf]  ;;  %v3406_v48 = vpop.f32.mrf.mxu0  ;;  %v5836_v49 = vor.u32 %v8238_v33, %v5833_v35 }
 0x170   :  { %v6089_v37 = vld [vmem:[#allocation6 + $0x4a8] sm:$0xf0] }
 0x171   :  { %3695 = vmatpush.bf16.msra.mxu3 %v6476_v53  ;;  %3670 = vmatpush.bf16.msra.mxu1 %v5932_v60  ;;  %v8366_v43 = vld [vmem:[#allocation6 + $0x68c] sm:$0xf]  ;;  %v6092_v50 = vor.u32 %v8302_v36, %v6089_v37 }
 0x172   :  { %v6345_v45 = vld [vmem:[#allocation6 + $0x6a8] sm:$0xf0] }
 0x173   :  { %3683 = vmatpush.bf16.msra.mxu2 %v6188_v61  ;;  %3658 = vmatpush.bf16.msra.mxu0 %v5644_v10  ;;  %v8166_v51 = vld [vmem:[#allocation6 + $0x4c] sm:$0xf]  ;;  %v6348_v55 = vor.u32 %v8366_v43, %v6345_v45 }
 0x174   :  { %v5545_v52 = vld [vmem:[#allocation6 + $0x68] sm:$0xf0] }
 0x175   :  { %3696 = vmatpush.bf16.msra.mxu3 %v6444_v1  ;;  %3671 = vmatpush.bf16.msra.mxu1 %v5900_v12  ;;  %v8230_v53 = vld [vmem:[#allocation6 + $0x24c] sm:$0xf]  ;;  %v5548_v61 = vor.u32 %v8166_v51, %v5545_v52 }
 0x176   :  { %v5801_v56 = vld [vmem:[#allocation6 + $0x268] sm:$0xf0] }
 0x177   :  { %3684 = vmatpush.bf16.msra.mxu2 %v6156_v13  ;;  %3659 = vmatpush.bf16.msra.mxu0 %v5612_v28  ;;  %v8294_v57 = vld [vmem:[#allocation6 + $0x44c] sm:$0xf]  ;;  %v5804_v0 = vor.u32 %v8230_v53, %v5801_v56  ;;  %v3445_v13 = vpop.f32.mrf.mxu3  ;;  %v3456_v7 = vpop.f32.mrf.mxu0 }
 0x178   :  { %v6057_v58 = vld [vmem:[#allocation6 + $0x468] sm:$0xf0] }
 0x179   :  { %3697 = vmatpush.bf16.msra.mxu3 %v6412_v19  ;;  %3672 = vmatpush.bf16.msra.mxu1 %v5868_v29  ;;  %v8358_v59 = vld [vmem:[#allocation6 + $0x64c] sm:$0xf]  ;;  %v6060_v1 = vor.u32 %v8294_v57, %v6057_v58 }
 0x17a   :  { %v6313_v60 = vld [vmem:[#allocation6 + $0x668] sm:$0xf0] }
 0x17b   :  { %3685 = vmatpush.bf16.msra.mxu2 %v6124_v30  ;;  %3660 = vmatpush.bf16.msra.mxu0 %v5580_v46  ;;  %v8158_v62 = vld [vmem:[#allocation6 + $0xc] sm:$0xf]  ;;  %v6316_v9 = vor.u32 %v8358_v59, %v6313_v60 }
 0x17c   :  { %v5513_v63 = vld [vmem:[#allocation6 + $0x28] sm:$0xf0] }
 0x17d   :  { %3698 = vmatpush.bf16.msra.mxu3 %v6380_v8  ;;  %3673 = vmatpush.bf16.msra.mxu1 %v5836_v49  ;;  %v8222_v2 = vld [vmem:[#allocation6 + $0x20c] sm:$0xf]  ;;  %v5516_v17 = vor.u32 %v8158_v62, %v5513_v63 }
 0x17e   :  { %v5769_v3 = vld [vmem:[#allocation6 + $0x228] sm:$0xf0] }
 0x17f   :  { %3686 = vmatpush.bf16.msra.mxu2 %v6092_v50  ;;  %v8286_v5 = vld [vmem:[#allocation6 + $0x40c] sm:$0xf]  ;;  %3661 = vmatpush.bf16.msra.mxu0 %v5548_v61  ;;  %v5772_v23 = vor.u32 %v8222_v2, %v5769_v3 }
 0x180   :  { %v6025_v10 = vld [vmem:[#allocation6 + $0x428] sm:$0xf0] }
 0x181   :  { %3699 = vmatpush.bf16.msra.mxu3 %v6348_v55  ;;  %v8350_v11 = vld [vmem:[#allocation6 + $0x60c] sm:$0xf]  ;;  %3674 = vmatpush.bf16.msra.mxu1 %v5804_v0  ;;  %v6028_v24 = vor.u32 %v8286_v5, %v6025_v10 }
 0x182   :  { %v6281_v12 = vld [vmem:[#allocation6 + $0x628] sm:$0xf0] }
 0x183   :  { %v8470_v14 = vld [vmem:[#allocation6 + $0x9cc] sm:$0xf]  ;;  %3687 = vmatpush.bf16.msra.mxu2 %v6060_v1  ;;  %v6284_v27 = vor.u32 %v8350_v11, %v6281_v12  ;;  %3662 = vmatpush.bf16.msra.mxu0 %v5516_v17 }
 0x184   :  { %v6761_v15 = vld [vmem:[#allocation6 + $0x9e8] sm:$0xf0] }
 0x185   :  { %v8534_v16 = vld [vmem:[#allocation6 + $0xbcc] sm:$0xf]  ;;  %3700 = vmatpush.bf16.msra.mxu3 %v6316_v9  ;;  %v6764_v28 = vor.u32 %v8470_v14, %v6761_v15  ;;  %3675 = vmatpush.bf16.msra.mxu1 %v5772_v23  ;;  %v3469_v14 = vpop.f32.mrf.mxu1 }
 0x186   :  { %v7017_v18 = vld [vmem:[#allocation6 + $0xbe8] sm:$0xf0]  ;;  %3663 = vmatmul.bf16.vlgmr.msra.gmra.mxu0 %v9301_v20 }
 0x187   :  { %v8598_v19 = vld [vmem:[#allocation6 + $0xdcc] sm:$0xf]  ;;  %v7020_v29 = vor.u32 %v8534_v16, %v7017_v18  ;;  %3688 = vmatpush.bf16.msra.mxu2 %v6028_v24  ;;  %3707 = vmatpush.bf16.msrb.mxu0 %v6764_v28 }
 0x188   :  { %v7273_v22 = vld [vmem:[#allocation6 + $0xde8] sm:$0xf0]  ;;  %3676 = vmatmul.bf16.vlgmr.msra.gmra.mxu1 %v9304_v21 }
 0x189   :  { %v8662_v25 = vld [vmem:[#allocation6 + $0xfcc] sm:$0xf]  ;;  %v7276_v30 = vor.u32 %v8598_v19, %v7273_v22  ;;  %3701 = vmatpush.bf16.msra.mxu3 %v6284_v27  ;;  %3720 = vmatpush.bf16.msrb.mxu1 %v7020_v29  ;;  %v3470_v19 = vadd.f32 %v3469_v14, %v3456_v7 }
 0x18a   :  { %v7529_v26 = vld [vmem:[#allocation6 + $0xfe8] sm:$0xf0]  ;;  %3689 = vmatmul.bf16.vlgmr.msra.gmra.mxu2 %v9296_v4 }
 0x18b   :  { %v8462_v31 = vld [vmem:[#allocation6 + $0x98c] sm:$0xf]  ;;  %v7532_v34 = vor.u32 %v8662_v25, %v7529_v26  ;;  %3733 = vmatpush.bf16.msrb.mxu2 %v7276_v30  ;;  %v3482_v30 = vpop.f32.mrf.mxu2 }
 0x18c   :  { %v6729_v32 = vld [vmem:[#allocation6 + $0x9a8] sm:$0xf0]  ;;  %3702 = vmatmul.bf16.vlgmr.msra.gmra.mxu3 %v9298_v6 }
 0x18d   :  { %v8526_v33 = vld [vmem:[#allocation6 + $0xb8c] sm:$0xf]  ;;  %v6732_v40 = vor.u32 %v8462_v31, %v6729_v32  ;;  %3746 = vmatpush.bf16.msrb.mxu3 %v7532_v34 }
 0x18e   :  { %v6985_v8 = vld [vmem:[#allocation6 + $0xba8] sm:$0xf0] }
 0x18f   :  { %v8590_v35 = vld [vmem:[#allocation6 + $0xd8c] sm:$0xf]  ;;  %v6988_v43 = vor.u32 %v8526_v33, %v6985_v8  ;;  %3708 = vmatpush.bf16.msrb.mxu0 %v6732_v40  ;;  %v3483_v8 = vadd.f32 %v3482_v30, %v3470_v19  ;;  %v5967_v30 = vld [vmem:[#allocation6 + $0x390] sm:$0xf] }
 0x190   :  { %v7241_v36 = vld [vmem:[#allocation6 + $0xda8] sm:$0xf0] }
 0x191   :  { %v8654_v37 = vld [vmem:[#allocation6 + $0xf8c] sm:$0xf]  ;;  %v7244_v45 = vor.u32 %v8590_v35, %v7241_v36  ;;  %3721 = vmatpush.bf16.msrb.mxu1 %v6988_v43  ;;  %v3495_v35 = vpop.f32.mrf.mxu3  ;;  %v3458_v43 = vpop.f32.mrf.mxu0 }
 0x192   :  { %v7497_v39 = vld [vmem:[#allocation6 + $0xfa8] sm:$0xf0]  ;;  %v9345_v40 = vadd.f32 %v3495_v35, %v3483_v8  ;;  %v6479_v8 = vld [vmem:[#allocation6 + $0x790] sm:$0xf] }
 0x193   :  { %v8454_v46 = vld [vmem:[#allocation6 + $0x94c] sm:$0xf]  ;;  %v7500_v50 = vor.u32 %v8654_v37, %v7497_v39  ;;  %3734 = vmatpush.bf16.msrb.mxu2 %v7244_v45  ;;  %v8403_v35 = vld [vmem:[#allocation6 + $0x7ac] sm:$0xf0] }
 0x194   :  { %v6697_v48 = vld [vmem:[#allocation6 + $0x968] sm:$0xf0]  ;;  %v5679_v43 = vld [vmem:[#allocation6 + $0x150] sm:$0xf] }
 0x195   :  { %v8518_v49 = vld [vmem:[#allocation6 + $0xb4c] sm:$0xf]  ;;  %v6700_v56 = vor.u32 %v8454_v46, %v6697_v48  ;;  %3747 = vmatpush.bf16.msrb.mxu3 %v7500_v50 }
 0x196   :  { %v6953_v51 = vld [vmem:[#allocation6 + $0xb68] sm:$0xf0] }
 0x197   :  { %v8582_v52 = vld [vmem:[#allocation6 + $0xd4c] sm:$0xf]  ;;  %v6956_v57 = vor.u32 %v8518_v49, %v6953_v51  ;;  %3709 = vmatpush.bf16.msrb.mxu0 %v6700_v56  ;;  %v3471_v51 = vpop.f32.mrf.mxu1 }
 0x198   :  { %v7209_v53 = vld [vmem:[#allocation6 + $0xd68] sm:$0xf0]  ;;  %v8331_v51 = vld [vmem:[#allocation6 + $0x56c] sm:$0xf0] }
 0x199   :  { %v8646_v54 = vld [vmem:[#allocation6 + $0xf4c] sm:$0xf]  ;;  %v7212_v58 = vor.u32 %v8582_v52, %v7209_v53  ;;  %3722 = vmatpush.bf16.msrb.mxu1 %v6956_v57 }
 0x19a   :  { %v7465_v55 = vld [vmem:[#allocation6 + $0xf68] sm:$0xf0] }
 0x19b   :  { %v8446_v59 = vld [vmem:[#allocation6 + $0x90c] sm:$0xf]  ;;  %v7468_v62 = vor.u32 %v8646_v54, %v7465_v55  ;;  %3735 = vmatpush.bf16.msrb.mxu2 %v7212_v58 }
 0x19c   :  { %v6665_v60 = vld [vmem:[#allocation6 + $0x928] sm:$0xf0] }
 0x19d   :  { %v8510_v61 = vld [vmem:[#allocation6 + $0xb0c] sm:$0xf]  ;;  %v6668_v5 = vor.u32 %v8446_v59, %v6665_v60  ;;  %3748 = vmatpush.bf16.msrb.mxu3 %v7468_v62 }
 0x19e   :  { %v6921_v63 = vld [vmem:[#allocation6 + $0xb28] sm:$0xf0] }
 0x19f   :  { %v8574_v0 = vld [vmem:[#allocation6 + $0xd0c] sm:$0xf]  ;;  %v6924_v9 = vor.u32 %v8510_v61, %v6921_v63  ;;  %3710 = vmatpush.bf16.msrb.mxu0 %v6668_v5 }
 0x1a0   :  { %v7177_v1 = vld [vmem:[#allocation6 + $0xd28] sm:$0xf0] }
 0x1a1   :  { %v8638_v2 = vld [vmem:[#allocation6 + $0xf0c] sm:$0xf]  ;;  %v7180_v10 = vor.u32 %v8574_v0, %v7177_v1  ;;  %3723 = vmatpush.bf16.msrb.mxu1 %v6924_v9 }
 0x1a2   :  { %v7433_v3 = vld [vmem:[#allocation6 + $0xf28] sm:$0xf0] }
 0x1a3   :  { %v8438_v11 = vld [vmem:[#allocation6 + $0x8cc] sm:$0xf]  ;;  %v7436_v15 = vor.u32 %v8638_v2, %v7433_v3  ;;  %3736 = vmatpush.bf16.msrb.mxu2 %v7180_v10  ;;  %v3484_v2 = vpop.f32.mrf.mxu2  ;;  %v3497_v10 = vpop.f32.mrf.mxu3 }
 0x1a4   :  { %v6633_v12 = vld [vmem:[#allocation6 + $0x8e8] sm:$0xf0]  ;;  %v8187_v10 = vld [vmem:[#allocation6 + $0xec] sm:$0xf0] }
 0x1a5   :  { %v8502_v13 = vld [vmem:[#allocation6 + $0xacc] sm:$0xf]  ;;  %v6636_v24 = vor.u32 %v8438_v11, %v6633_v12  ;;  %3749 = vmatpush.bf16.msrb.mxu3 %v7436_v15  ;;  %v5743_v11 = vld [vmem:[#allocation6 + $0x1d0] sm:$0xf] }
 0x1a6   :  { %v6889_v16 = vld [vmem:[#allocation6 + $0xae8] sm:$0xf0]  ;;  %v8219_v12 = vld [vmem:[#allocation6 + $0x1ec] sm:$0xf0] }
 0x1a7   :  { %v8566_v17 = vld [vmem:[#allocation6 + $0xccc] sm:$0xf]  ;;  %v6892_v25 = vor.u32 %v8502_v13, %v6889_v16  ;;  %3711 = vmatpush.bf16.msrb.mxu0 %v6636_v24  ;;  %v5999_v13 = vld [vmem:[#allocation6 + $0x3d0] sm:$0xf] }
 0x1a8   :  { %v7145_v18 = vld [vmem:[#allocation6 + $0xce8] sm:$0xf0]  ;;  %v8283_v15 = vld [vmem:[#allocation6 + $0x3ec] sm:$0xf0] }
 0x1a9   :  { %v8630_v22 = vld [vmem:[#allocation6 + $0xecc] sm:$0xf]  ;;  %v7148_v26 = vor.u32 %v8566_v17, %v7145_v18  ;;  %3724 = vmatpush.bf16.msrb.mxu1 %v6892_v25  ;;  %v6255_v16 = vld [vmem:[#allocation6 + $0x5d0] sm:$0xf]  ;;  %v5744_v25 = vor.u32 %v8219_v12, %v5743_v11 }
 0x1aa   :  { %v7401_v23 = vld [vmem:[#allocation6 + $0xee8] sm:$0xf0]  ;;  %v8347_v17 = vld [vmem:[#allocation6 + $0x5ec] sm:$0xf0] }
 0x1ab   :  { %v8430_v27 = vld [vmem:[#allocation6 + $0x88c] sm:$0xf]  ;;  %v7404_v31 = vor.u32 %v8630_v22, %v7401_v23  ;;  %3737 = vmatpush.bf16.msrb.mxu2 %v7148_v26  ;;  %v6511_v22 = vld [vmem:[#allocation6 + $0x7d0] sm:$0xf]  ;;  %v6000_v26 = vor.u32 %v8283_v15, %v5999_v13  ;;  %v3521_v13 = vpop.f32.mrf.mxu1 }
 0x1ac   :  { %v6601_v28 = vld [vmem:[#allocation6 + $0x8a8] sm:$0xf0]  ;;  %v8411_v23 = vld [vmem:[#allocation6 + $0x7ec] sm:$0xf0] }
 0x1ad   :  { %v8494_v29 = vld [vmem:[#allocation6 + $0xa8c] sm:$0xf]  ;;  %v6604_v39 = vor.u32 %v8430_v27, %v6601_v28  ;;  %3750 = vmatpush.bf16.msrb.mxu3 %v7404_v31  ;;  %v6256_v27 = vor.u32 %v8347_v17, %v6255_v16  ;;  %v5711_v28 = vld [vmem:[#allocation6 + $0x190] sm:$0xf]  ;;  %v6512_v31 = vor.u32 %v8411_v23, %v6511_v22 }
 0x1ae   :  { %v6857_v32 = vld [vmem:[#allocation6 + $0xaa8] sm:$0xf0]  ;;  %v5871_v11 = vld [vmem:[#allocation6 + $0x2d0] sm:$0xf] }
 0x1af   :  { %v8558_v33 = vld [vmem:[#allocation6 + $0xc8c] sm:$0xf]  ;;  %v6860_v45 = vor.u32 %v8494_v29, %v6857_v32  ;;  %3712 = vmatpush.bf16.msrb.mxu0 %v6604_v39  ;;  %v8211_v29 = vld [vmem:[#allocation6 + $0x1ac] sm:$0xf0] }
 0x1b0   :  { %v7113_v34 = vld [vmem:[#allocation6 + $0xca8] sm:$0xf0]  ;;  %v8275_v32 = vld [vmem:[#allocation6 + $0x3ac] sm:$0xf0] }
 0x1b1   :  { %v8622_v36 = vld [vmem:[#allocation6 + $0xe8c] sm:$0xf]  ;;  %v7116_v46 = vor.u32 %v8558_v33, %v7113_v34  ;;  %3725 = vmatpush.bf16.msrb.mxu1 %v6860_v45  ;;  %v6223_v33 = vld [vmem:[#allocation6 + $0x590] sm:$0xf] }
 0x1b2   :  { %v7369_v37 = vld [vmem:[#allocation6 + $0xea8] sm:$0xf0]  ;;  %v8339_v34 = vld [vmem:[#allocation6 + $0x5ac] sm:$0xf0] }
 0x1b3   :  { %v8422_v48 = vld [vmem:[#allocation6 + $0x84c] sm:$0xf]  ;;  %v7372_v52 = vor.u32 %v8622_v36, %v7369_v37  ;;  %3738 = vmatpush.bf16.msrb.mxu2 %v7116_v46  ;;  %v5712_v36 = vor.u32 %v8211_v29, %v5711_v28  ;;  %v5968_v37 = vor.u32 %v8275_v32, %v5967_v30  ;;  %v6224_v39 = vor.u32 %v8339_v34, %v6223_v33  ;;  %v8203_v45 = vld [vmem:[#allocation6 + $0x16c] sm:$0xf0]  ;;  %v3534_v29 = vpop.f32.mrf.mxu2  ;;  %v3547_v34 = vpop.f32.mrf.mxu3 }
 0x1b4   :  { %v6569_v49 = vld [vmem:[#allocation6 + $0x868] sm:$0xf0]  ;;  %v5935_v46 = vld [vmem:[#allocation6 + $0x350] sm:$0xf] }
 0x1b5   :  { %v8486_v50 = vld [vmem:[#allocation6 + $0xa4c] sm:$0xf]  ;;  %v6572_v58 = vor.u32 %v8422_v48, %v6569_v49  ;;  %3751 = vmatpush.bf16.msrb.mxu3 %v7372_v52  ;;  %v6480_v48 = vor.u32 %v8403_v35, %v6479_v8  ;;  %v8267_v49 = vld [vmem:[#allocation6 + $0x36c] sm:$0xf0] }
 0x1b6   :  { %v6825_v53 = vld [vmem:[#allocation6 + $0xa68] sm:$0xf0]  ;;  %v6447_v52 = vld [vmem:[#allocation6 + $0x750] sm:$0xf] }
 0x1b7   :  { %v8550_v54 = vld [vmem:[#allocation6 + $0xc4c] sm:$0xf]  ;;  %v6828_v61 = vor.u32 %v8486_v50, %v6825_v53  ;;  %3713 = vmatpush.bf16.msrb.mxu0 %v6572_v58  ;;  %v6191_v50 = vld [vmem:[#allocation6 + $0x550] sm:$0xf] }
 0x1b8   :  { %v7081_v55 = vld [vmem:[#allocation6 + $0xc68] sm:$0xf0]  ;;  %v8395_v53 = vld [vmem:[#allocation6 + $0x76c] sm:$0xf0] }
 0x1b9   :  { %v8614_v56 = vld [vmem:[#allocation6 + $0xe4c] sm:$0xf]  ;;  %v7084_v62 = vor.u32 %v8550_v54, %v7081_v55  ;;  %3726 = vmatpush.bf16.msrb.mxu1 %v6828_v61  ;;  %v5680_v54 = vor.u32 %v8203_v45, %v5679_v43  ;;  %v5936_v55 = vor.u32 %v8267_v49, %v5935_v46  ;;  %v8195_v58 = vld [vmem:[#allocation6 + $0x12c] sm:$0xf0] }
 0x1ba   :  { %v7337_v57 = vld [vmem:[#allocation6 + $0xe68] sm:$0xf0]  ;;  %v8259_v61 = vld [vmem:[#allocation6 + $0x32c] sm:$0xf0] }
 0x1bb   :  { %v8414_v59 = vld [vmem:[#allocation6 + $0x80c] sm:$0xf]  ;;  %v7340_v3 = vor.u32 %v8614_v56, %v7337_v57  ;;  %3739 = vmatpush.bf16.msrb.mxu2 %v7084_v62  ;;  %v6192_v56 = vor.u32 %v8331_v51, %v6191_v50  ;;  %v5647_v57 = vld [vmem:[#allocation6 + $0x110] sm:$0xf]  ;;  %v3523_v50 = vpop.f32.mrf.mxu1 }
 0x1bc   :  { %v6537_v60 = vld [vmem:[#allocation6 + $0x828] sm:$0xf0]  ;;  %v6159_v62 = vld [vmem:[#allocation6 + $0x510] sm:$0xf]  ;;  %v5648_v2 = vor.u32 %v8195_v58, %v5647_v57 }
 0x1bd   :  { %v8478_v63 = vld [vmem:[#allocation6 + $0xa0c] sm:$0xf]  ;;  %v6540_v14 = vor.u32 %v8414_v59, %v6537_v60  ;;  %3752 = vmatpush.bf16.msrb.mxu3 %v7340_v3  ;;  %v5903_v59 = vld [vmem:[#allocation6 + $0x310] sm:$0xf]  ;;  %v6448_v60 = vor.u32 %v8395_v53, %v6447_v52  ;;  %v3508_v3 = vpop.f32.mrf.mxu0 }
 0x1be   :  { %v6793_v0 = vld [vmem:[#allocation6 + $0xa28] sm:$0xf0]  ;;  %v3509_v12 = vadd.f32 %v3508_v3, %v9345_v40  ;;  %v8251_v15 = vld [vmem:[#allocation6 + $0x2ec] sm:$0xf0] }
 0x1bf   :  { %v8542_v1 = vld [vmem:[#allocation6 + $0xc0c] sm:$0xf]  ;;  %v6796_v18 = vor.u32 %v8478_v63, %v6793_v0  ;;  %3714 = vmatpush.bf16.msrb.mxu0 %v6540_v14  ;;  %v8323_v63 = vld [vmem:[#allocation6 + $0x52c] sm:$0xf0] }
 0x1c0   :  { %v7049_v5 = vld [vmem:[#allocation6 + $0xc28] sm:$0xf0]  ;;  %v6415_v0 = vld [vmem:[#allocation6 + $0x710] sm:$0xf]  ;;  %v3522_v22 = vadd.f32 %v3521_v13, %v3509_v12 }
 0x1c1   :  { %v8606_v7 = vld [vmem:[#allocation6 + $0xe0c] sm:$0xf]  ;;  %v7052_v19 = vor.u32 %v8542_v1, %v7049_v5  ;;  %3727 = vmatpush.bf16.msrb.mxu1 %v6796_v18  ;;  %v8387_v1 = vld [vmem:[#allocation6 + $0x72c] sm:$0xf0]  ;;  %v5904_v5 = vor.u32 %v8259_v61, %v5903_v59 }
 0x1c2   :  { %v7305_v9 = vld [vmem:[#allocation6 + $0xe28] sm:$0xf0]  ;;  %3715 = vmatmul.bf16.vlgmr.msrb.gmra.mxu0 %v9310_v41  ;;  %v6416_v14 = vor.u32 %v8387_v1, %v6415_v0  ;;  %v6127_v16 = vld [vmem:[#allocation6 + $0x4d0] sm:$0xf]  ;;  %v3535_v33 = vadd.f32 %v3534_v29, %v3522_v22  ;;  %v3536_v1 = vpop.f32.mrf.mxu2 }
 0x1c3   :  { %v7308_v24 = vor.u32 %v8606_v7, %v7305_v9  ;;  %3740 = vmatpush.bf16.msrb.mxu2 %v7052_v19  ;;  %3759 = vmatpush.bf16.msra.mxu0 %v5744_v25  ;;  %v6160_v7 = vor.u32 %v8323_v63, %v6159_v62  ;;  %v5615_v9 = vld [vmem:[#allocation6 + $0xd0] sm:$0xf] }
 0x1c4   :  { %3728 = vmatmul.bf16.vlgmr.msrb.gmra.mxu1 %v9314_v44  ;;  %v8315_v17 = vld [vmem:[#allocation6 + $0x4ec] sm:$0xf0]  ;;  %v5616_v23 = vor.u32 %v8187_v10, %v5615_v9  ;;  %v3549_v9 = vpop.f32.mrf.mxu3 }
 0x1c5   :  { %3753 = vmatpush.bf16.msrb.mxu3 %v7308_v24  ;;  %3772 = vmatpush.bf16.msra.mxu1 %v6000_v26  ;;  %v6383_v18 = vld [vmem:[#allocation6 + $0x6d0] sm:$0xf]  ;;  %v5872_v24 = vor.u32 %v8251_v15, %v5871_v11  ;;  %v6128_v25 = vor.u32 %v8315_v17, %v6127_v16 }
 0x1c6   :  { %3741 = vmatmul.bf16.vlgmr.msrb.gmra.mxu2 %v9308_v38  ;;  %v8379_v19 = vld [vmem:[#allocation6 + $0x6ec] sm:$0xf0] }
 0x1c7   :  { %3785 = vmatpush.bf16.msra.mxu2 %v6256_v27  ;;  %3760 = vmatpush.bf16.msra.mxu0 %v5712_v36  ;;  %v5583_v26 = vld [vmem:[#allocation6 + $0x90] sm:$0xf]  ;;  %v6384_v40 = vor.u32 %v8379_v19, %v6383_v18 }
 0x1c8   :  { %3754 = vmatmul.bf16.vlgmr.msrb.gmra.mxu3 %v9312_v42  ;;  %v8179_v27 = vld [vmem:[#allocation6 + $0xac] sm:$0xf0] }
 0x1c9   :  { %3798 = vmatpush.bf16.msra.mxu3 %v6512_v31  ;;  %3773 = vmatpush.bf16.msra.mxu1 %v5968_v37  ;;  %v5839_v28 = vld [vmem:[#allocation6 + $0x290] sm:$0xf]  ;;  %v5584_v36 = vor.u32 %v8179_v27, %v5583_v26  ;;  %v9352_v37 = vadd.f32 %v3547_v34, %v3535_v33 }
 0x1ca   :  { %v8243_v30 = vld [vmem:[#allocation6 + $0x2ac] sm:$0xf0] }
 0x1cb   :  { %3786 = vmatpush.bf16.msra.mxu2 %v6224_v39  ;;  %3761 = vmatpush.bf16.msra.mxu0 %v5680_v54  ;;  %v6095_v31 = vld [vmem:[#allocation6 + $0x490] sm:$0xf]  ;;  %v3510_v39 = vpop.f32.mrf.mxu0  ;;  %v5840_v43 = vor.u32 %v8243_v30, %v5839_v28 }
 0x1cc   :  { %v8307_v32 = vld [vmem:[#allocation6 + $0x4ac] sm:$0xf0] }
 0x1cd   :  { %3799 = vmatpush.bf16.msra.mxu3 %v6480_v48  ;;  %3774 = vmatpush.bf16.msra.mxu1 %v5936_v55  ;;  %v6351_v8 = vld [vmem:[#allocation6 + $0x690] sm:$0xf]  ;;  %v6096_v45 = vor.u32 %v8307_v32, %v6095_v31 }
 0x1ce   :  { %v8371_v35 = vld [vmem:[#allocation6 + $0x6ac] sm:$0xf0] }
 0x1cf   :  { %3787 = vmatpush.bf16.msra.mxu2 %v6192_v56  ;;  %3762 = vmatpush.bf16.msra.mxu0 %v5648_v2  ;;  %v5551_v46 = vld [vmem:[#allocation6 + $0x50] sm:$0xf]  ;;  %v6352_v51 = vor.u32 %v8371_v35, %v6351_v8 }
 0x1d0   :  { %v8171_v48 = vld [vmem:[#allocation6 + $0x6c] sm:$0xf0] }
 0x1d1   :  { %3800 = vmatpush.bf16.msra.mxu3 %v6448_v60  ;;  %3775 = vmatpush.bf16.msra.mxu1 %v5904_v5  ;;  %v5807_v49 = vld [vmem:[#allocation6 + $0x250] sm:$0xf]  ;;  %v5552_v57 = vor.u32 %v8171_v48, %v5551_v46 }
 0x1d2   :  { %v8235_v52 = vld [vmem:[#allocation6 + $0x26c] sm:$0xf0] }
 0x1d3   :  { %3788 = vmatpush.bf16.msra.mxu2 %v6160_v7  ;;  %3763 = vmatpush.bf16.msra.mxu0 %v5616_v23  ;;  %v6063_v53 = vld [vmem:[#allocation6 + $0x450] sm:$0xf]  ;;  %v5808_v60 = vor.u32 %v8235_v52, %v5807_v49 }
 0x1d4   :  { %v8299_v54 = vld [vmem:[#allocation6 + $0x46c] sm:$0xf0] }
 0x1d5   :  { %3801 = vmatpush.bf16.msra.mxu3 %v6416_v14  ;;  %3776 = vmatpush.bf16.msra.mxu1 %v5872_v24  ;;  %v6319_v55 = vld [vmem:[#allocation6 + $0x650] sm:$0xf]  ;;  %v6064_v61 = vor.u32 %v8299_v54, %v6063_v53 }
 0x1d6   :  { %v8363_v56 = vld [vmem:[#allocation6 + $0x66c] sm:$0xf0] }
 0x1d7   :  { %3789 = vmatpush.bf16.msra.mxu2 %v6128_v25  ;;  %3764 = vmatpush.bf16.msra.mxu0 %v5584_v36  ;;  %v5519_v58 = vld [vmem:[#allocation6 + $0x10] sm:$0xf]  ;;  %v6320_v2 = vor.u32 %v8363_v56, %v6319_v55 }
 0x1d8   :  { %v8163_v59 = vld [vmem:[#allocation6 + $0x2c] sm:$0xf0] }
 0x1d9   :  { %3802 = vmatpush.bf16.msra.mxu3 %v6384_v40  ;;  %3777 = vmatpush.bf16.msra.mxu1 %v5840_v43  ;;  %v5775_v62 = vld [vmem:[#allocation6 + $0x210] sm:$0xf]  ;;  %v5520_v13 = vor.u32 %v8163_v59, %v5519_v58 }
 0x1da   :  { %v8227_v63 = vld [vmem:[#allocation6 + $0x22c] sm:$0xf0] }
 0x1db   :  { %3790 = vmatpush.bf16.msra.mxu2 %v6096_v45  ;;  %v6031_v0 = vld [vmem:[#allocation6 + $0x410] sm:$0xf]  ;;  %3765 = vmatpush.bf16.msra.mxu0 %v5552_v57  ;;  %v5776_v17 = vor.u32 %v8227_v63, %v5775_v62 }
 0x1dc   :  { %v8291_v3 = vld [vmem:[#allocation6 + $0x42c] sm:$0xf0] }
 0x1dd   :  { %3803 = vmatpush.bf16.msra.mxu3 %v6352_v51  ;;  %v6287_v5 = vld [vmem:[#allocation6 + $0x610] sm:$0xf]  ;;  %3778 = vmatpush.bf16.msra.mxu1 %v5808_v60  ;;  %v6032_v18 = vor.u32 %v8291_v3, %v6031_v0 }
 0x1de   :  { %v8355_v7 = vld [vmem:[#allocation6 + $0x62c] sm:$0xf0] }
 0x1df   :  { %v6767_v10 = vld [vmem:[#allocation6 + $0x9d0] sm:$0xf]  ;;  %3791 = vmatpush.bf16.msra.mxu2 %v6064_v61  ;;  %v6288_v23 = vor.u32 %v8355_v7, %v6287_v5  ;;  %3766 = vmatpush.bf16.msra.mxu0 %v5520_v13 }
 0x1e0   :  { %v8475_v11 = vld [vmem:[#allocation6 + $0x9ec] sm:$0xf0] }
 0x1e1   :  { %v7023_v12 = vld [vmem:[#allocation6 + $0xbd0] sm:$0xf]  ;;  %3804 = vmatpush.bf16.msra.mxu3 %v6320_v2  ;;  %v6768_v24 = vor.u32 %v8475_v11, %v6767_v10  ;;  %3779 = vmatpush.bf16.msra.mxu1 %v5776_v17  ;;  %v3560_v2 = vpop.f32.mrf.mxu0  ;;  %v3573_v11 = vpop.f32.mrf.mxu1 }
 0x1e2   :  { %v8539_v14 = vld [vmem:[#allocation6 + $0xbec] sm:$0xf0]  ;;  %3767 = vmatmul.bf16.vlgmr.msra.gmra.mxu0 %v9301_v20 }
 0x1e3   :  { %v7279_v15 = vld [vmem:[#allocation6 + $0xdd0] sm:$0xf]  ;;  %v7024_v25 = vor.u32 %v8539_v14, %v7023_v12  ;;  %3792 = vmatpush.bf16.msra.mxu2 %v6032_v18  ;;  %3811 = vmatpush.bf16.msrb.mxu0 %v6768_v24 }
 0x1e4   :  { %v8603_v16 = vld [vmem:[#allocation6 + $0xdec] sm:$0xf0]  ;;  %3780 = vmatmul.bf16.vlgmr.msra.gmra.mxu1 %v9304_v21 }
 0x1e5   :  { %v7535_v19 = vld [vmem:[#allocation6 + $0xfd0] sm:$0xf]  ;;  %v7280_v26 = vor.u32 %v8603_v16, %v7279_v15  ;;  %3805 = vmatpush.bf16.msra.mxu3 %v6288_v23  ;;  %3824 = vmatpush.bf16.msrb.mxu1 %v7024_v25  ;;  %v3574_v16 = vadd.f32 %v3573_v11, %v3560_v2  ;;  %v8279_v11 = vld [vmem:[#allocation6 + $0x3d4] sm:$0xf] }
 0x1e6   :  { %v8667_v22 = vld [vmem:[#allocation6 + $0xfec] sm:$0xf0]  ;;  %3793 = vmatmul.bf16.vlgmr.msra.gmra.mxu2 %v9296_v4 }
 0x1e7   :  { %v6735_v27 = vld [vmem:[#allocation6 + $0x990] sm:$0xf]  ;;  %v7536_v40 = vor.u32 %v8667_v22, %v7535_v19  ;;  %3837 = vmatpush.bf16.msrb.mxu2 %v7280_v26 }
 0x1e8   :  { %v8467_v28 = vld [vmem:[#allocation6 + $0x9ac] sm:$0xf0]  ;;  %3806 = vmatmul.bf16.vlgmr.msra.gmra.mxu3 %v9298_v6 }
 0x1e9   :  { %v6991_v29 = vld [vmem:[#allocation6 + $0xb90] sm:$0xf]  ;;  %v6736_v8 = vor.u32 %v8467_v28, %v6735_v27  ;;  %3850 = vmatpush.bf16.msrb.mxu3 %v7536_v40  ;;  %v3586_v27 = vpop.f32.mrf.mxu2 }
 0x1ea   :  { %v8531_v30 = vld [vmem:[#allocation6 + $0xbac] sm:$0xf0] }
 0x1eb   :  { %v7247_v31 = vld [vmem:[#allocation6 + $0xd90] sm:$0xf]  ;;  %v6992_v35 = vor.u32 %v8531_v30, %v6991_v29  ;;  %3812 = vmatpush.bf16.msrb.mxu0 %v6736_v8 }
 0x1ec   :  { %v8595_v32 = vld [vmem:[#allocation6 + $0xdac] sm:$0xf0] }
 0x1ed   :  { %v7503_v33 = vld [vmem:[#allocation6 + $0xf90] sm:$0xf]  ;;  %v7248_v36 = vor.u32 %v8595_v32, %v7247_v31  ;;  %3825 = vmatpush.bf16.msrb.mxu1 %v6992_v35  ;;  %v3587_v31 = vadd.f32 %v3586_v27, %v3574_v16  ;;  %v3599_v32 = vpop.f32.mrf.mxu3  ;;  %v5713_v27 = vld [vmem:[#allocation6 + $0x1b0] sm:$0xf0] }
 0x1ee   :  { %v8659_v34 = vld [vmem:[#allocation6 + $0xfac] sm:$0xf0] }
 0x1ef   :  { %v6703_v39 = vld [vmem:[#allocation6 + $0x950] sm:$0xf]  ;;  %v7504_v46 = vor.u32 %v8659_v34, %v7503_v33  ;;  %3838 = vmatpush.bf16.msrb.mxu2 %v7248_v36  ;;  %v9358_v35 = vadd.f32 %v3599_v32, %v3587_v31  ;;  %v3562_v36 = vpop.f32.mrf.mxu0  ;;  %v6225_v31 = vld [vmem:[#allocation6 + $0x5b0] sm:$0xf0] }
 0x1f0   :  { %v8459_v43 = vld [vmem:[#allocation6 + $0x96c] sm:$0xf0]  ;;  %v8399_v32 = vld [vmem:[#allocation6 + $0x794] sm:$0xf] }
 0x1f1   :  { %v6959_v45 = vld [vmem:[#allocation6 + $0xb50] sm:$0xf]  ;;  %v6704_v53 = vor.u32 %v8459_v43, %v6703_v39  ;;  %3851 = vmatpush.bf16.msrb.mxu3 %v7504_v46 }
 0x1f2   :  { %v8523_v48 = vld [vmem:[#allocation6 + $0xb6c] sm:$0xf0] }
 0x1f3   :  { %v7215_v49 = vld [vmem:[#allocation6 + $0xd50] sm:$0xf]  ;;  %v6960_v54 = vor.u32 %v8523_v48, %v6959_v45  ;;  %3813 = vmatpush.bf16.msrb.mxu0 %v6704_v53 }
 0x1f4   :  { %v8587_v50 = vld [vmem:[#allocation6 + $0xd6c] sm:$0xf0] }
 0x1f5   :  { %v7471_v51 = vld [vmem:[#allocation6 + $0xf50] sm:$0xf]  ;;  %v7216_v55 = vor.u32 %v8587_v50, %v7215_v49  ;;  %3826 = vmatpush.bf16.msrb.mxu1 %v6960_v54  ;;  %v3575_v49 = vpop.f32.mrf.mxu1 }
 0x1f6   :  { %v8651_v52 = vld [vmem:[#allocation6 + $0xf6c] sm:$0xf0]  ;;  %v8327_v49 = vld [vmem:[#allocation6 + $0x554] sm:$0xf] }
 0x1f7   :  { %v6671_v56 = vld [vmem:[#allocation6 + $0x910] sm:$0xf]  ;;  %v7472_v59 = vor.u32 %v8651_v52, %v7471_v51  ;;  %3839 = vmatpush.bf16.msrb.mxu2 %v7216_v55 }
 0x1f8   :  { %v8451_v57 = vld [vmem:[#allocation6 + $0x92c] sm:$0xf0] }
 0x1f9   :  { %v6927_v58 = vld [vmem:[#allocation6 + $0xb10] sm:$0xf]  ;;  %v6672_v1 = vor.u32 %v8451_v57, %v6671_v56  ;;  %3852 = vmatpush.bf16.msrb.mxu3 %v7472_v59 }
 0x1fa   :  { %v8515_v60 = vld [vmem:[#allocation6 + $0xb2c] sm:$0xf0] }
 0x1fb   :  { %v7183_v61 = vld [vmem:[#allocation6 + $0xd10] sm:$0xf]  ;;  %v6928_v3 = vor.u32 %v8515_v60, %v6927_v58  ;;  %3814 = vmatpush.bf16.msrb.mxu0 %v6672_v1 }
 0x1fc   :  { %v8579_v62 = vld [vmem:[#allocation6 + $0xd2c] sm:$0xf0] }
 0x1fd   :  { %v7439_v63 = vld [vmem:[#allocation6 + $0xf10] sm:$0xf]  ;;  %v7184_v5 = vor.u32 %v8579_v62, %v7183_v61  ;;  %3827 = vmatpush.bf16.msrb.mxu1 %v6928_v3 }
 0x1fe   :  { %v8643_v0 = vld [vmem:[#allocation6 + $0xf2c] sm:$0xf0] }
 0x1ff   :  { %v6639_v7 = vld [vmem:[#allocation6 + $0x8d0] sm:$0xf]  ;;  %v7440_v12 = vor.u32 %v8643_v0, %v7439_v63  ;;  %3840 = vmatpush.bf16.msrb.mxu2 %v7184_v5  ;;  %v3588_v0 = vpop.f32.mrf.mxu2 }
 0x200   :  { %v8443_v9 = vld [vmem:[#allocation6 + $0x8ec] sm:$0xf0]  ;;  %v6417_v0 = vld [vmem:[#allocation6 + $0x730] sm:$0xf0] }
 0x201   :  { %v6895_v10 = vld [vmem:[#allocation6 + $0xad0] sm:$0xf]  ;;  %v6640_v19 = vor.u32 %v8443_v9, %v6639_v7  ;;  %3853 = vmatpush.bf16.msrb.mxu3 %v7440_v12  ;;  %v3601_v7 = vpop.f32.mrf.mxu3  ;;  %v8215_v9 = vld [vmem:[#allocation6 + $0x1d4] sm:$0xf] }
 0x202   :  { %v8507_v13 = vld [vmem:[#allocation6 + $0xaec] sm:$0xf0]  ;;  %v8183_v7 = vld [vmem:[#allocation6 + $0xd4] sm:$0xf] }
 0x203   :  { %v7151_v14 = vld [vmem:[#allocation6 + $0xcd0] sm:$0xf]  ;;  %v6896_v22 = vor.u32 %v8507_v13, %v6895_v10  ;;  %3815 = vmatpush.bf16.msrb.mxu0 %v6640_v19  ;;  %v5745_v10 = vld [vmem:[#allocation6 + $0x1f0] sm:$0xf0] }
 0x204   :  { %v8571_v15 = vld [vmem:[#allocation6 + $0xcec] sm:$0xf0]  ;;  %v6001_v13 = vld [vmem:[#allocation6 + $0x3f0] sm:$0xf0] }
 0x205   :  { %v7407_v17 = vld [vmem:[#allocation6 + $0xed0] sm:$0xf]  ;;  %v7152_v23 = vor.u32 %v8571_v15, %v7151_v14  ;;  %3828 = vmatpush.bf16.msrb.mxu1 %v6896_v22  ;;  %v8343_v14 = vld [vmem:[#allocation6 + $0x5d4] sm:$0xf] }
 0x206   :  { %v8635_v18 = vld [vmem:[#allocation6 + $0xeec] sm:$0xf0]  ;;  %v6257_v15 = vld [vmem:[#allocation6 + $0x5f0] sm:$0xf0] }
 0x207   :  { %v6607_v24 = vld [vmem:[#allocation6 + $0x890] sm:$0xf]  ;;  %v7408_v28 = vor.u32 %v8635_v18, %v7407_v17  ;;  %3841 = vmatpush.bf16.msrb.mxu2 %v7152_v23  ;;  %v8407_v18 = vld [vmem:[#allocation6 + $0x7d4] sm:$0xf]  ;;  %v5748_v23 = vor.u32 %v8215_v9, %v5745_v10 }
 0x208   :  { %v8435_v25 = vld [vmem:[#allocation6 + $0x8ac] sm:$0xf0]  ;;  %v6513_v19 = vld [vmem:[#allocation6 + $0x7f0] sm:$0xf0] }
 0x209   :  { %v6863_v26 = vld [vmem:[#allocation6 + $0xa90] sm:$0xf]  ;;  %v6608_v8 = vor.u32 %v8435_v25, %v6607_v24  ;;  %3854 = vmatpush.bf16.msrb.mxu3 %v7408_v28  ;;  %v6004_v24 = vor.u32 %v8279_v11, %v6001_v13  ;;  %v6260_v25 = vor.u32 %v8343_v14, %v6257_v15  ;;  %v8271_v28 = vld [vmem:[#allocation6 + $0x394] sm:$0xf] }
 0x20a   :  { %v8499_v29 = vld [vmem:[#allocation6 + $0xaac] sm:$0xf0]  ;;  %v5617_v9 = vld [vmem:[#allocation6 + $0xf0] sm:$0xf0] }
 0x20b   :  { %v7119_v40 = vld [vmem:[#allocation6 + $0xc90] sm:$0xf]  ;;  %v6864_v39 = vor.u32 %v8499_v29, %v6863_v26  ;;  %3816 = vmatpush.bf16.msrb.mxu0 %v6608_v8  ;;  %v8207_v26 = vld [vmem:[#allocation6 + $0x194] sm:$0xf]  ;;  %v6516_v29 = vor.u32 %v8407_v18, %v6513_v19 }
 0x20c   :  { %v8563_v30 = vld [vmem:[#allocation6 + $0xcac] sm:$0xf0]  ;;  %v8247_v10 = vld [vmem:[#allocation6 + $0x2d4] sm:$0xf] }
 0x20d   :  { %v7375_v33 = vld [vmem:[#allocation6 + $0xe90] sm:$0xf]  ;;  %v7120_v43 = vor.u32 %v8563_v30, %v7119_v40  ;;  %3829 = vmatpush.bf16.msrb.mxu1 %v6864_v39  ;;  %v5969_v40 = vld [vmem:[#allocation6 + $0x3b0] sm:$0xf0] }
 0x20e   :  { %v8627_v34 = vld [vmem:[#allocation6 + $0xeac] sm:$0xf0]  ;;  %v8335_v30 = vld [vmem:[#allocation6 + $0x594] sm:$0xf]  ;;  %v5972_v8 = vor.u32 %v8271_v28, %v5969_v40  ;;  %v3638_v28 = vpop.f32.mrf.mxu2 }
 0x20f   :  { %v6575_v45 = vld [vmem:[#allocation6 + $0x850] sm:$0xf]  ;;  %v7376_v50 = vor.u32 %v8627_v34, %v7375_v33  ;;  %3842 = vmatpush.bf16.msrb.mxu2 %v7120_v43  ;;  %v6481_v33 = vld [vmem:[#allocation6 + $0x7b0] sm:$0xf0]  ;;  %v5716_v34 = vor.u32 %v8207_v26, %v5713_v27  ;;  %v6228_v36 = vor.u32 %v8335_v30, %v6225_v31 }
 0x210   :  { %v8427_v46 = vld [vmem:[#allocation6 + $0x86c] sm:$0xf0]  ;;  %v8199_v39 = vld [vmem:[#allocation6 + $0x154] sm:$0xf] }
 0x211   :  { %v6831_v48 = vld [vmem:[#allocation6 + $0xa50] sm:$0xf]  ;;  %v6576_v56 = vor.u32 %v8427_v46, %v6575_v45  ;;  %3855 = vmatpush.bf16.msrb.mxu3 %v7376_v50  ;;  %v5681_v43 = vld [vmem:[#allocation6 + $0x170] sm:$0xf0]  ;;  %v6484_v46 = vor.u32 %v8399_v32, %v6481_v33  ;;  %v3651_v32 = vpop.f32.mrf.mxu3 }
 0x212   :  { %v8491_v51 = vld [vmem:[#allocation6 + $0xa6c] sm:$0xf0]  ;;  %v8263_v45 = vld [vmem:[#allocation6 + $0x354] sm:$0xf] }
 0x213   :  { %v7087_v52 = vld [vmem:[#allocation6 + $0xc50] sm:$0xf]  ;;  %v6832_v59 = vor.u32 %v8491_v51, %v6831_v48  ;;  %3817 = vmatpush.bf16.msrb.mxu0 %v6576_v56  ;;  %v5937_v48 = vld [vmem:[#allocation6 + $0x370] sm:$0xf0] }
 0x214   :  { %v8555_v53 = vld [vmem:[#allocation6 + $0xc6c] sm:$0xf0]  ;;  %v6193_v50 = vld [vmem:[#allocation6 + $0x570] sm:$0xf0] }
 0x215   :  { %v7343_v54 = vld [vmem:[#allocation6 + $0xe50] sm:$0xf]  ;;  %v7088_v60 = vor.u32 %v8555_v53, %v7087_v52  ;;  %3830 = vmatpush.bf16.msrb.mxu1 %v6832_v59  ;;  %v8391_v51 = vld [vmem:[#allocation6 + $0x754] sm:$0xf]  ;;  %v5684_v53 = vor.u32 %v8199_v39, %v5681_v43 }
 0x216   :  { %v8619_v55 = vld [vmem:[#allocation6 + $0xe6c] sm:$0xf0]  ;;  %v6449_v52 = vld [vmem:[#allocation6 + $0x770] sm:$0xf0] }
 0x217   :  { %v6543_v57 = vld [vmem:[#allocation6 + $0x810] sm:$0xf]  ;;  %v7344_v1 = vor.u32 %v8619_v55, %v7343_v54  ;;  %3843 = vmatpush.bf16.msrb.mxu2 %v7088_v60  ;;  %v5940_v54 = vor.u32 %v8263_v45, %v5937_v48  ;;  %v6196_v55 = vor.u32 %v8327_v49, %v6193_v50  ;;  %v8191_v56 = vld [vmem:[#allocation6 + $0x114] sm:$0xf]  ;;  %v6452_v59 = vor.u32 %v8391_v51, %v6449_v52 }
 0x218   :  { %v8419_v58 = vld [vmem:[#allocation6 + $0x82c] sm:$0xf0]  ;;  %v5905_v60 = vld [vmem:[#allocation6 + $0x330] sm:$0xf0] }
 0x219   :  { %v6799_v61 = vld [vmem:[#allocation6 + $0xa10] sm:$0xf]  ;;  %v6544_v12 = vor.u32 %v8419_v58, %v6543_v57  ;;  %3856 = vmatpush.bf16.msrb.mxu3 %v7344_v1  ;;  %v5649_v57 = vld [vmem:[#allocation6 + $0x130] sm:$0xf0] }
 0x21a   :  { %v8483_v62 = vld [vmem:[#allocation6 + $0xa2c] sm:$0xf0]  ;;  %v8255_v58 = vld [vmem:[#allocation6 + $0x314] sm:$0xf]  ;;  %v5652_v1 = vor.u32 %v8191_v56, %v5649_v57 }
 0x21b   :  { %v7055_v63 = vld [vmem:[#allocation6 + $0xc10] sm:$0xf]  ;;  %v6800_v16 = vor.u32 %v8483_v62, %v6799_v61  ;;  %3818 = vmatpush.bf16.msrb.mxu0 %v6544_v12  ;;  %v8319_v61 = vld [vmem:[#allocation6 + $0x514] sm:$0xf]  ;;  %v3625_v12 = vpop.f32.mrf.mxu1 }
 0x21c   :  { %v8547_v2 = vld [vmem:[#allocation6 + $0xc2c] sm:$0xf0]  ;;  %v6161_v62 = vld [vmem:[#allocation6 + $0x530] sm:$0xf0] }
 0x21d   :  { %v7311_v3 = vld [vmem:[#allocation6 + $0xe10] sm:$0xf]  ;;  %v7056_v17 = vor.u32 %v8547_v2, %v7055_v63  ;;  %3831 = vmatpush.bf16.msrb.mxu1 %v6800_v16  ;;  %v8383_v63 = vld [vmem:[#allocation6 + $0x714] sm:$0xf]  ;;  %v3612_v2 = vpop.f32.mrf.mxu0 }
 0x21e   :  { %v8611_v5 = vld [vmem:[#allocation6 + $0xe2c] sm:$0xf0]  ;;  %3819 = vmatmul.bf16.vlgmr.msrb.gmra.mxu0 %v9310_v41  ;;  %v3613_v11 = vadd.f32 %v3612_v2, %v9358_v35  ;;  %v6420_v13 = vor.u32 %v8383_v63, %v6417_v0  ;;  %v5873_v14 = vld [vmem:[#allocation6 + $0x2f0] sm:$0xf0] }
 0x21f   :  { %v7312_v22 = vor.u32 %v8611_v5, %v7311_v3  ;;  %3844 = vmatpush.bf16.msrb.mxu2 %v7056_v17  ;;  %3863 = vmatpush.bf16.msra.mxu0 %v5748_v23  ;;  %v5908_v3 = vor.u32 %v8255_v58, %v5905_v60  ;;  %v6164_v5 = vor.u32 %v8319_v61, %v6161_v62  ;;  %v8311_v15 = vld [vmem:[#allocation6 + $0x4d4] sm:$0xf] }
 0x220   :  { %3832 = vmatmul.bf16.vlgmr.msrb.gmra.mxu1 %v9314_v44  ;;  %v6129_v16 = vld [vmem:[#allocation6 + $0x4f0] sm:$0xf0]  ;;  %v3626_v19 = vadd.f32 %v3625_v12, %v3613_v11  ;;  %v5876_v23 = vor.u32 %v8247_v10, %v5873_v14 }
 0x221   :  { %3857 = vmatpush.bf16.msrb.mxu3 %v7312_v22  ;;  %3876 = vmatpush.bf16.msra.mxu1 %v6004_v24  ;;  %v8375_v17 = vld [vmem:[#allocation6 + $0x6d4] sm:$0xf]  ;;  %v5620_v22 = vor.u32 %v8183_v7, %v5617_v9  ;;  %v6132_v24 = vor.u32 %v8311_v15, %v6129_v16  ;;  %v3653_v9 = vpop.f32.mrf.mxu3 }
 0x222   :  { %3845 = vmatmul.bf16.vlgmr.msrb.gmra.mxu2 %v9308_v38  ;;  %v6385_v18 = vld [vmem:[#allocation6 + $0x6f0] sm:$0xf0]  ;;  %v3639_v31 = vadd.f32 %v3638_v28, %v3626_v19 }
 0x223   :  { %3889 = vmatpush.bf16.msra.mxu2 %v6260_v25  ;;  %3864 = vmatpush.bf16.msra.mxu0 %v5716_v34  ;;  %v8175_v25 = vld [vmem:[#allocation6 + $0x94] sm:$0xf]  ;;  %v6388_v35 = vor.u32 %v8375_v17, %v6385_v18  ;;  %v3627_v50 = vpop.f32.mrf.mxu1 }
 0x224   :  { %3858 = vmatmul.bf16.vlgmr.msrb.gmra.mxu3 %v9312_v42  ;;  %v5585_v26 = vld [vmem:[#allocation6 + $0xb0] sm:$0xf0] }
 0x225   :  { %3902 = vmatpush.bf16.msra.mxu3 %v6516_v29  ;;  %3877 = vmatpush.bf16.msra.mxu1 %v5972_v8  ;;  %v8239_v27 = vld [vmem:[#allocation6 + $0x294] sm:$0xf]  ;;  %v5588_v8 = vor.u32 %v8175_v25, %v5585_v26  ;;  %v3614_v39 = vpop.f32.mrf.mxu0 }
 0x226   :  { %v5841_v29 = vld [vmem:[#allocation6 + $0x2b0] sm:$0xf0] }
 0x227   :  { %3890 = vmatpush.bf16.msra.mxu2 %v6228_v36  ;;  %3865 = vmatpush.bf16.msra.mxu0 %v5684_v53  ;;  %v8303_v40 = vld [vmem:[#allocation6 + $0x494] sm:$0xf]  ;;  %v9365_v36 = vadd.f32 %v3651_v32, %v3639_v31  ;;  %v5844_v43 = vor.u32 %v8239_v27, %v5841_v29 }
 0x228   :  { %v6097_v30 = vld [vmem:[#allocation6 + $0x4b0] sm:$0xf0] }
 0x229   :  { %3903 = vmatpush.bf16.msra.mxu3 %v6484_v46  ;;  %3878 = vmatpush.bf16.msra.mxu1 %v5940_v54  ;;  %v8367_v33 = vld [vmem:[#allocation6 + $0x694] sm:$0xf]  ;;  %v6100_v45 = vor.u32 %v8303_v40, %v6097_v30 }
 0x22a   :  { %v6353_v34 = vld [vmem:[#allocation6 + $0x6b0] sm:$0xf0] }
 0x22b   :  { %3891 = vmatpush.bf16.msra.mxu2 %v6196_v55  ;;  %3866 = vmatpush.bf16.msra.mxu0 %v5652_v1  ;;  %v8167_v46 = vld [vmem:[#allocation6 + $0x54] sm:$0xf]  ;;  %v6356_v51 = vor.u32 %v8367_v33, %v6353_v34  ;;  %v3640_v1 = vpop.f32.mrf.mxu2 }
 0x22c   :  { %v5553_v48 = vld [vmem:[#allocation6 + $0x70] sm:$0xf0] }
 0x22d   :  { %3904 = vmatpush.bf16.msra.mxu3 %v6452_v59  ;;  %3879 = vmatpush.bf16.msra.mxu1 %v5908_v3  ;;  %v8231_v49 = vld [vmem:[#allocation6 + $0x254] sm:$0xf]  ;;  %v5556_v57 = vor.u32 %v8167_v46, %v5553_v48 }
 0x22e   :  { %v5809_v52 = vld [vmem:[#allocation6 + $0x270] sm:$0xf0] }
 0x22f   :  { %3892 = vmatpush.bf16.msra.mxu2 %v6164_v5  ;;  %3867 = vmatpush.bf16.msra.mxu0 %v5620_v22  ;;  %v8295_v53 = vld [vmem:[#allocation6 + $0x454] sm:$0xf]  ;;  %v5812_v60 = vor.u32 %v8231_v49, %v5809_v52 }
 0x230   :  { %v6065_v54 = vld [vmem:[#allocation6 + $0x470] sm:$0xf0] }
 0x231   :  { %3905 = vmatpush.bf16.msra.mxu3 %v6420_v13  ;;  %3880 = vmatpush.bf16.msra.mxu1 %v5876_v23  ;;  %v8359_v55 = vld [vmem:[#allocation6 + $0x654] sm:$0xf]  ;;  %v6068_v61 = vor.u32 %v8295_v53, %v6065_v54 }
 0x232   :  { %v6321_v56 = vld [vmem:[#allocation6 + $0x670] sm:$0xf0] }
 0x233   :  { %3893 = vmatpush.bf16.msra.mxu2 %v6132_v24  ;;  %3868 = vmatpush.bf16.msra.mxu0 %v5588_v8  ;;  %v8159_v58 = vld [vmem:[#allocation6 + $0x14] sm:$0xf]  ;;  %v6324_v2 = vor.u32 %v8359_v55, %v6321_v56 }
 0x234   :  { %v5521_v59 = vld [vmem:[#allocation6 + $0x30] sm:$0xf0] }
 0x235   :  { %3906 = vmatpush.bf16.msra.mxu3 %v6388_v35  ;;  %3881 = vmatpush.bf16.msra.mxu1 %v5844_v43  ;;  %v8223_v62 = vld [vmem:[#allocation6 + $0x214] sm:$0xf]  ;;  %v5524_v13 = vor.u32 %v8159_v58, %v5521_v59 }
 0x236   :  { %v5777_v63 = vld [vmem:[#allocation6 + $0x230] sm:$0xf0] }
 0x237   :  { %3894 = vmatpush.bf16.msra.mxu2 %v6100_v45  ;;  %v8287_v0 = vld [vmem:[#allocation6 + $0x414] sm:$0xf]  ;;  %3869 = vmatpush.bf16.msra.mxu0 %v5556_v57  ;;  %v5780_v17 = vor.u32 %v8223_v62, %v5777_v63 }
 0x238   :  { %v6033_v3 = vld [vmem:[#allocation6 + $0x430] sm:$0xf0] }
 0x239   :  { %3907 = vmatpush.bf16.msra.mxu3 %v6356_v51  ;;  %v8351_v5 = vld [vmem:[#allocation6 + $0x614] sm:$0xf]  ;;  %3882 = vmatpush.bf16.msra.mxu1 %v5812_v60  ;;  %v6036_v18 = vor.u32 %v8287_v0, %v6033_v3  ;;  %v3664_v3 = vpop.f32.mrf.mxu0 }
 0x23a   :  { %v6289_v7 = vld [vmem:[#allocation6 + $0x630] sm:$0xf0] }
 0x23b   :  { %v8471_v10 = vld [vmem:[#allocation6 + $0x9d4] sm:$0xf]  ;;  %3895 = vmatpush.bf16.msra.mxu2 %v6068_v61  ;;  %v6292_v23 = vor.u32 %v8351_v5, %v6289_v7  ;;  %3870 = vmatpush.bf16.msra.mxu0 %v5524_v13 }
 0x23c   :  { %v6769_v11 = vld [vmem:[#allocation6 + $0x9f0] sm:$0xf0] }
 0x23d   :  { %v8535_v12 = vld [vmem:[#allocation6 + $0xbd4] sm:$0xf]  ;;  %3908 = vmatpush.bf16.msra.mxu3 %v6324_v2  ;;  %v6772_v24 = vor.u32 %v8471_v10, %v6769_v11  ;;  %3883 = vmatpush.bf16.msra.mxu1 %v5780_v17 }
 0x23e   :  { %v7025_v14 = vld [vmem:[#allocation6 + $0xbf0] sm:$0xf0]  ;;  %3871 = vmatmul.bf16.vlgmr.msra.gmra.mxu0 %v9301_v20 }
 0x23f   :  { %v8599_v15 = vld [vmem:[#allocation6 + $0xdd4] sm:$0xf]  ;;  %v7028_v25 = vor.u32 %v8535_v12, %v7025_v14  ;;  %3896 = vmatpush.bf16.msra.mxu2 %v6036_v18  ;;  %3915 = vmatpush.bf16.msrb.mxu0 %v6772_v24  ;;  %v3677_v12 = vpop.f32.mrf.mxu1 }
 0x240   :  { %v7281_v16 = vld [vmem:[#allocation6 + $0xdf0] sm:$0xf0]  ;;  %3884 = vmatmul.bf16.vlgmr.msra.gmra.mxu1 %v9304_v21  ;;  %v3678_v17 = vadd.f32 %v3677_v12, %v3664_v3  ;;  %v8220_v12 = vld [vmem:[#allocation6 + $0x1f4] sm:$0xf0] }
 0x241   :  { %v8663_v19 = vld [vmem:[#allocation6 + $0xfd4] sm:$0xf]  ;;  %v7284_v26 = vor.u32 %v8599_v15, %v7281_v16  ;;  %3909 = vmatpush.bf16.msra.mxu3 %v6292_v23  ;;  %3928 = vmatpush.bf16.msrb.mxu1 %v7028_v25 }
 0x242   :  { %v7537_v22 = vld [vmem:[#allocation6 + $0xff0] sm:$0xf0]  ;;  %3897 = vmatmul.bf16.vlgmr.msra.gmra.mxu2 %v9296_v4 }
 0x243   :  { %v8463_v27 = vld [vmem:[#allocation6 + $0x994] sm:$0xf]  ;;  %v7540_v29 = vor.u32 %v8663_v19, %v7537_v22  ;;  %3941 = vmatpush.bf16.msrb.mxu2 %v7284_v26 }
 0x244   :  { %v6737_v28 = vld [vmem:[#allocation6 + $0x9b0] sm:$0xf0]  ;;  %3910 = vmatmul.bf16.vlgmr.msra.gmra.mxu3 %v9298_v6 }
 0x245   :  { %v8527_v35 = vld [vmem:[#allocation6 + $0xb94] sm:$0xf]  ;;  %v6740_v34 = vor.u32 %v8463_v27, %v6737_v28  ;;  %3954 = vmatpush.bf16.msrb.mxu3 %v7540_v29  ;;  %v3690_v28 = vpop.f32.mrf.mxu2 }
 0x246   :  { %v6993_v40 = vld [vmem:[#allocation6 + $0xbb0] sm:$0xf0] }
 0x247   :  { %v8591_v30 = vld [vmem:[#allocation6 + $0xd94] sm:$0xf]  ;;  %v6996_v8 = vor.u32 %v8527_v35, %v6993_v40  ;;  %3916 = vmatpush.bf16.msrb.mxu0 %v6740_v34 }
 0x248   :  { %v7249_v31 = vld [vmem:[#allocation6 + $0xdb0] sm:$0xf0] }
 0x249   :  { %v8655_v32 = vld [vmem:[#allocation6 + $0xf94] sm:$0xf]  ;;  %v7252_v39 = vor.u32 %v8591_v30, %v7249_v31  ;;  %3929 = vmatpush.bf16.msrb.mxu1 %v6996_v8  ;;  %v3691_v31 = vadd.f32 %v3690_v28, %v3678_v17  ;;  %v8348_v17 = vld [vmem:[#allocation6 + $0x5f4] sm:$0xf0] }
 0x24a   :  { %v7505_v33 = vld [vmem:[#allocation6 + $0xfb0] sm:$0xf0]  ;;  %v5719_v28 = vld [vmem:[#allocation6 + $0x198] sm:$0xf] }
 0x24b   :  { %v8455_v43 = vld [vmem:[#allocation6 + $0x954] sm:$0xf]  ;;  %v7508_v48 = vor.u32 %v8655_v32, %v7505_v33  ;;  %3942 = vmatpush.bf16.msrb.mxu2 %v7252_v39  ;;  %v3703_v32 = vpop.f32.mrf.mxu3 }
 0x24c   :  { %v6705_v45 = vld [vmem:[#allocation6 + $0x970] sm:$0xf0]  ;;  %v9371_v39 = vadd.f32 %v3703_v32, %v3691_v31  ;;  %v6231_v31 = vld [vmem:[#allocation6 + $0x598] sm:$0xf] }
 0x24d   :  { %v8519_v46 = vld [vmem:[#allocation6 + $0xb54] sm:$0xf]  ;;  %v6708_v54 = vor.u32 %v8455_v43, %v6705_v45  ;;  %3955 = vmatpush.bf16.msrb.mxu3 %v7508_v48  ;;  %v3666_v43 = vpop.f32.mrf.mxu0  ;;  %v8340_v32 = vld [vmem:[#allocation6 + $0x5b4] sm:$0xf0] }
 0x24e   :  { %v6961_v49 = vld [vmem:[#allocation6 + $0xb70] sm:$0xf0] }
 0x24f   :  { %v8583_v50 = vld [vmem:[#allocation6 + $0xd54] sm:$0xf]  ;;  %v6964_v55 = vor.u32 %v8519_v46, %v6961_v49  ;;  %3917 = vmatpush.bf16.msrb.mxu0 %v6708_v54 }
 0x250   :  { %v7217_v51 = vld [vmem:[#allocation6 + $0xd70] sm:$0xf0] }
 0x251   :  { %v8647_v52 = vld [vmem:[#allocation6 + $0xf54] sm:$0xf]  ;;  %v7220_v56 = vor.u32 %v8583_v50, %v7217_v51  ;;  %3930 = vmatpush.bf16.msrb.mxu1 %v6964_v55  ;;  %v3679_v51 = vpop.f32.mrf.mxu1 }
 0x252   :  { %v7473_v53 = vld [vmem:[#allocation6 + $0xf70] sm:$0xf0]  ;;  %v8268_v51 = vld [vmem:[#allocation6 + $0x374] sm:$0xf0] }
 0x253   :  { %v8447_v57 = vld [vmem:[#allocation6 + $0x914] sm:$0xf]  ;;  %v7476_v60 = vor.u32 %v8647_v52, %v7473_v53  ;;  %3943 = vmatpush.bf16.msrb.mxu2 %v7220_v56 }
 0x254   :  { %v6673_v58 = vld [vmem:[#allocation6 + $0x930] sm:$0xf0] }
 0x255   :  { %v8511_v59 = vld [vmem:[#allocation6 + $0xb14] sm:$0xf]  ;;  %v6676_v2 = vor.u32 %v8447_v57, %v6673_v58  ;;  %3956 = vmatpush.bf16.msrb.mxu3 %v7476_v60 }
 0x256   :  { %v6929_v61 = vld [vmem:[#allocation6 + $0xb30] sm:$0xf0] }
 0x257   :  { %v8575_v62 = vld [vmem:[#allocation6 + $0xd14] sm:$0xf]  ;;  %v6932_v5 = vor.u32 %v8511_v59, %v6929_v61  ;;  %3918 = vmatpush.bf16.msrb.mxu0 %v6676_v2  ;;  %v3692_v2 = vpop.f32.mrf.mxu2 }
 0x258   :  { %v7185_v63 = vld [vmem:[#allocation6 + $0xd30] sm:$0xf0]  ;;  %v6423_v2 = vld [vmem:[#allocation6 + $0x718] sm:$0xf] }
 0x259   :  { %v8639_v0 = vld [vmem:[#allocation6 + $0xf14] sm:$0xf]  ;;  %v7188_v7 = vor.u32 %v8575_v62, %v7185_v63  ;;  %3931 = vmatpush.bf16.msrb.mxu1 %v6932_v5 }
 0x25a   :  { %v7441_v1 = vld [vmem:[#allocation6 + $0xf30] sm:$0xf0] }
 0x25b   :  { %v8439_v9 = vld [vmem:[#allocation6 + $0x8d4] sm:$0xf]  ;;  %v7444_v13 = vor.u32 %v8639_v0, %v7441_v1  ;;  %3944 = vmatpush.bf16.msrb.mxu2 %v7188_v7 }
 0x25c   :  { %v6641_v10 = vld [vmem:[#allocation6 + $0x8f0] sm:$0xf0] }
 0x25d   :  { %v8503_v11 = vld [vmem:[#allocation6 + $0xad4] sm:$0xf]  ;;  %v6644_v22 = vor.u32 %v8439_v9, %v6641_v10  ;;  %3957 = vmatpush.bf16.msrb.mxu3 %v7444_v13  ;;  %v3705_v10 = vpop.f32.mrf.mxu3  ;;  %v6007_v13 = vld [vmem:[#allocation6 + $0x3d8] sm:$0xf] }
 0x25e   :  { %v6897_v14 = vld [vmem:[#allocation6 + $0xaf0] sm:$0xf0] }
 0x25f   :  { %v8567_v15 = vld [vmem:[#allocation6 + $0xcd4] sm:$0xf]  ;;  %v6900_v23 = vor.u32 %v8503_v11, %v6897_v14  ;;  %3919 = vmatpush.bf16.msrb.mxu0 %v6644_v22  ;;  %v5751_v11 = vld [vmem:[#allocation6 + $0x1d8] sm:$0xf] }
 0x260   :  { %v7153_v16 = vld [vmem:[#allocation6 + $0xcf0] sm:$0xf0]  ;;  %v6519_v22 = vld [vmem:[#allocation6 + $0x7d8] sm:$0xf] }
 0x261   :  { %v8631_v18 = vld [vmem:[#allocation6 + $0xed4] sm:$0xf]  ;;  %v7156_v24 = vor.u32 %v8567_v15, %v7153_v16  ;;  %3932 = vmatpush.bf16.msrb.mxu1 %v6900_v23  ;;  %v8284_v15 = vld [vmem:[#allocation6 + $0x3f4] sm:$0xf0] }
 0x262   :  { %v7409_v19 = vld [vmem:[#allocation6 + $0xef0] sm:$0xf0]  ;;  %v6263_v16 = vld [vmem:[#allocation6 + $0x5d8] sm:$0xf] }
 0x263   :  { %v8431_v25 = vld [vmem:[#allocation6 + $0x894] sm:$0xf]  ;;  %v7412_v35 = vor.u32 %v8631_v18, %v7409_v19  ;;  %3945 = vmatpush.bf16.msrb.mxu2 %v7156_v24  ;;  %v8412_v23 = vld [vmem:[#allocation6 + $0x7f4] sm:$0xf0] }
 0x264   :  { %v6609_v26 = vld [vmem:[#allocation6 + $0x8b0] sm:$0xf0] }
 0x265   :  { %v8495_v27 = vld [vmem:[#allocation6 + $0xa94] sm:$0xf]  ;;  %v6612_v8 = vor.u32 %v8431_v25, %v6609_v26  ;;  %3958 = vmatpush.bf16.msrb.mxu3 %v7412_v35  ;;  %v5752_v25 = vor.u32 %v8220_v12, %v5751_v11  ;;  %v6008_v26 = vor.u32 %v8284_v15, %v6007_v13  ;;  %v8212_v35 = vld [vmem:[#allocation6 + $0x1b4] sm:$0xf0]  ;;  %v3729_v15 = vpop.f32.mrf.mxu1 }
 0x266   :  { %v6865_v29 = vld [vmem:[#allocation6 + $0xab0] sm:$0xf0]  ;;  %v5623_v11 = vld [vmem:[#allocation6 + $0xd8] sm:$0xf] }
 0x267   :  { %v8559_v40 = vld [vmem:[#allocation6 + $0xc94] sm:$0xf]  ;;  %v6868_v45 = vor.u32 %v8495_v27, %v6865_v29  ;;  %3920 = vmatpush.bf16.msrb.mxu0 %v6612_v8  ;;  %v6264_v27 = vor.u32 %v8348_v17, %v6263_v16  ;;  %v5975_v29 = vld [vmem:[#allocation6 + $0x398] sm:$0xf]  ;;  %v5720_v8 = vor.u32 %v8212_v35, %v5719_v28 }
 0x268   :  { %v7121_v30 = vld [vmem:[#allocation6 + $0xcb0] sm:$0xf0]  ;;  %v8188_v12 = vld [vmem:[#allocation6 + $0xf4] sm:$0xf0] }
 0x269   :  { %v8623_v33 = vld [vmem:[#allocation6 + $0xe94] sm:$0xf]  ;;  %v7124_v46 = vor.u32 %v8559_v40, %v7121_v30  ;;  %3933 = vmatpush.bf16.msrb.mxu1 %v6868_v45  ;;  %v6520_v40 = vor.u32 %v8412_v23, %v6519_v22  ;;  %v8276_v30 = vld [vmem:[#allocation6 + $0x3b4] sm:$0xf0]  ;;  %v6232_v45 = vor.u32 %v8340_v32, %v6231_v31 }
 0x26a   :  { %v7377_v34 = vld [vmem:[#allocation6 + $0xeb0] sm:$0xf0]  ;;  %v5976_v43 = vor.u32 %v8276_v30, %v5975_v29  ;;  %v5879_v13 = vld [vmem:[#allocation6 + $0x2d8] sm:$0xf] }
 0x26b   :  { %v8423_v48 = vld [vmem:[#allocation6 + $0x854] sm:$0xf]  ;;  %v7380_v52 = vor.u32 %v8623_v33, %v7377_v34  ;;  %3946 = vmatpush.bf16.msrb.mxu2 %v7124_v46  ;;  %v6487_v33 = vld [vmem:[#allocation6 + $0x798] sm:$0xf] }
 0x26c   :  { %v6577_v49 = vld [vmem:[#allocation6 + $0x870] sm:$0xf0]  ;;  %v8404_v34 = vld [vmem:[#allocation6 + $0x7b4] sm:$0xf0] }
 0x26d   :  { %v8487_v50 = vld [vmem:[#allocation6 + $0xa54] sm:$0xf]  ;;  %v6580_v58 = vor.u32 %v8423_v48, %v6577_v49  ;;  %3959 = vmatpush.bf16.msrb.mxu3 %v7380_v52  ;;  %v5687_v46 = vld [vmem:[#allocation6 + $0x158] sm:$0xf] }
 0x26e   :  { %v6833_v53 = vld [vmem:[#allocation6 + $0xa70] sm:$0xf0]  ;;  %v8204_v48 = vld [vmem:[#allocation6 + $0x174] sm:$0xf0] }
 0x26f   :  { %v8551_v54 = vld [vmem:[#allocation6 + $0xc54] sm:$0xf]  ;;  %v6836_v61 = vor.u32 %v8487_v50, %v6833_v53  ;;  %3921 = vmatpush.bf16.msrb.mxu0 %v6580_v58  ;;  %v5943_v49 = vld [vmem:[#allocation6 + $0x358] sm:$0xf]  ;;  %v6488_v50 = vor.u32 %v8404_v34, %v6487_v33  ;;  %v3755_v34 = vpop.f32.mrf.mxu3 }
 0x270   :  { %v7089_v55 = vld [vmem:[#allocation6 + $0xc70] sm:$0xf0]  ;;  %v6199_v52 = vld [vmem:[#allocation6 + $0x558] sm:$0xf] }
 0x271   :  { %v8615_v56 = vld [vmem:[#allocation6 + $0xe54] sm:$0xf]  ;;  %v7092_v62 = vor.u32 %v8551_v54, %v7089_v55  ;;  %3934 = vmatpush.bf16.msrb.mxu1 %v6836_v61  ;;  %v8332_v53 = vld [vmem:[#allocation6 + $0x574] sm:$0xf0] }
 0x272   :  { %v7345_v57 = vld [vmem:[#allocation6 + $0xe70] sm:$0xf0]  ;;  %v6455_v54 = vld [vmem:[#allocation6 + $0x758] sm:$0xf]  ;;  %v6200_v58 = vor.u32 %v8332_v53, %v6199_v52 }
 0x273   :  { %v8415_v59 = vld [vmem:[#allocation6 + $0x814] sm:$0xf]  ;;  %v7348_v3 = vor.u32 %v8615_v56, %v7345_v57  ;;  %3947 = vmatpush.bf16.msrb.mxu2 %v7092_v62  ;;  %v8396_v55 = vld [vmem:[#allocation6 + $0x774] sm:$0xf0]  ;;  %v5688_v56 = vor.u32 %v8204_v48, %v5687_v46  ;;  %v5944_v57 = vor.u32 %v8268_v51, %v5943_v49 }
 0x274   :  { %v6545_v60 = vld [vmem:[#allocation6 + $0x830] sm:$0xf0]  ;;  %v5911_v61 = vld [vmem:[#allocation6 + $0x318] sm:$0xf]  ;;  %v6456_v62 = vor.u32 %v8396_v55, %v6455_v54  ;;  %v3731_v54 = vpop.f32.mrf.mxu1 }
 0x275   :  { %v8479_v63 = vld [vmem:[#allocation6 + $0xa14] sm:$0xf]  ;;  %v6548_v14 = vor.u32 %v8415_v59, %v6545_v60  ;;  %3960 = vmatpush.bf16.msrb.mxu3 %v7348_v3  ;;  %v5655_v59 = vld [vmem:[#allocation6 + $0x118] sm:$0xf] }
 0x276   :  { %v6801_v0 = vld [vmem:[#allocation6 + $0xa30] sm:$0xf0]  ;;  %v8196_v60 = vld [vmem:[#allocation6 + $0x134] sm:$0xf0] }
 0x277   :  { %v8543_v1 = vld [vmem:[#allocation6 + $0xc14] sm:$0xf]  ;;  %v6804_v18 = vor.u32 %v8479_v63, %v6801_v0  ;;  %3922 = vmatpush.bf16.msrb.mxu0 %v6548_v14  ;;  %v8260_v63 = vld [vmem:[#allocation6 + $0x334] sm:$0xf0] }
 0x278   :  { %v7057_v5 = vld [vmem:[#allocation6 + $0xc30] sm:$0xf0]  ;;  %v6167_v0 = vld [vmem:[#allocation6 + $0x518] sm:$0xf] }
 0x279   :  { %v8607_v7 = vld [vmem:[#allocation6 + $0xe14] sm:$0xf]  ;;  %v7060_v19 = vor.u32 %v8543_v1, %v7057_v5  ;;  %3935 = vmatpush.bf16.msrb.mxu1 %v6804_v18  ;;  %v8324_v1 = vld [vmem:[#allocation6 + $0x534] sm:$0xf0]  ;;  %v5656_v5 = vor.u32 %v8196_v60, %v5655_v59 }
 0x27a   :  { %v7313_v9 = vld [vmem:[#allocation6 + $0xe30] sm:$0xf0]  ;;  %3923 = vmatmul.bf16.vlgmr.msrb.gmra.mxu0 %v9310_v41  ;;  %v8388_v3 = vld [vmem:[#allocation6 + $0x734] sm:$0xf0]  ;;  %v6168_v10 = vor.u32 %v8324_v1, %v6167_v0 }
 0x27b   :  { %v7316_v24 = vor.u32 %v8607_v7, %v7313_v9  ;;  %3948 = vmatpush.bf16.msrb.mxu2 %v7060_v19  ;;  %3967 = vmatpush.bf16.msra.mxu0 %v5752_v25  ;;  %v3716_v7 = vpop.f32.mrf.mxu0  ;;  %v5912_v9 = vor.u32 %v8260_v63, %v5911_v61  ;;  %v6424_v16 = vor.u32 %v8388_v3, %v6423_v2  ;;  %v8252_v17 = vld [vmem:[#allocation6 + $0x2f4] sm:$0xf0] }
 0x27c   :  { %3936 = vmatmul.bf16.vlgmr.msrb.gmra.mxu1 %v9314_v44  ;;  %v3717_v14 = vadd.f32 %v3716_v7, %v9371_v39  ;;  %v6135_v18 = vld [vmem:[#allocation6 + $0x4d8] sm:$0xf]  ;;  %v5624_v25 = vor.u32 %v8188_v12, %v5623_v11 }
 0x27d   :  { %3961 = vmatpush.bf16.msrb.mxu3 %v7316_v24  ;;  %3980 = vmatpush.bf16.msra.mxu1 %v6008_v26  ;;  %v8316_v19 = vld [vmem:[#allocation6 + $0x4f4] sm:$0xf0]  ;;  %v5880_v26 = vor.u32 %v8252_v17, %v5879_v13  ;;  %v3757_v13 = vpop.f32.mrf.mxu3 }
 0x27e   :  { %3949 = vmatmul.bf16.vlgmr.msrb.gmra.mxu2 %v9308_v38  ;;  %v6391_v22 = vld [vmem:[#allocation6 + $0x6d8] sm:$0xf]  ;;  %v3730_v24 = vadd.f32 %v3729_v15, %v3717_v14 }
 0x27f   :  { %3993 = vmatpush.bf16.msra.mxu2 %v6264_v27  ;;  %3968 = vmatpush.bf16.msra.mxu0 %v5720_v8  ;;  %v8380_v23 = vld [vmem:[#allocation6 + $0x6f4] sm:$0xf0]  ;;  %v6136_v27 = vor.u32 %v8316_v19, %v6135_v18 }
 0x280   :  { %3962 = vmatmul.bf16.vlgmr.msrb.gmra.mxu3 %v9312_v42  ;;  %v5591_v28 = vld [vmem:[#allocation6 + $0x98] sm:$0xf]  ;;  %v6392_v39 = vor.u32 %v8380_v23, %v6391_v22 }
 0x281   :  { %4006 = vmatpush.bf16.msra.mxu3 %v6520_v40  ;;  %3981 = vmatpush.bf16.msra.mxu1 %v5976_v43  ;;  %v8180_v35 = vld [vmem:[#allocation6 + $0xb4] sm:$0xf0]  ;;  %v3742_v40 = vpop.f32.mrf.mxu2 }
 0x282   :  { %v5847_v29 = vld [vmem:[#allocation6 + $0x298] sm:$0xf]  ;;  %v3743_v33 = vadd.f32 %v3742_v40, %v3730_v24 }
 0x283   :  { %3994 = vmatpush.bf16.msra.mxu2 %v6232_v45  ;;  %3969 = vmatpush.bf16.msra.mxu0 %v5688_v56  ;;  %v8244_v30 = vld [vmem:[#allocation6 + $0x2b4] sm:$0xf0]  ;;  %v5592_v45 = vor.u32 %v8180_v35, %v5591_v28  ;;  %v3718_v48 = vpop.f32.mrf.mxu0 }
 0x284   :  { %v6103_v31 = vld [vmem:[#allocation6 + $0x498] sm:$0xf]  ;;  %v9378_v46 = vadd.f32 %v3755_v34, %v3743_v33  ;;  %v5848_v49 = vor.u32 %v8244_v30, %v5847_v29 }
 0x285   :  { %4007 = vmatpush.bf16.msra.mxu3 %v6488_v50  ;;  %3982 = vmatpush.bf16.msra.mxu1 %v5944_v57  ;;  %v8308_v32 = vld [vmem:[#allocation6 + $0x4b4] sm:$0xf0] }
 0x286   :  { %v6359_v8 = vld [vmem:[#allocation6 + $0x698] sm:$0xf]  ;;  %v6104_v50 = vor.u32 %v8308_v32, %v6103_v31 }
 0x287   :  { %3995 = vmatpush.bf16.msra.mxu2 %v6200_v58  ;;  %3970 = vmatpush.bf16.msra.mxu0 %v5656_v5  ;;  %v8372_v43 = vld [vmem:[#allocation6 + $0x6b4] sm:$0xf0] }
 0x288   :  { %v5559_v51 = vld [vmem:[#allocation6 + $0x58] sm:$0xf]  ;;  %v6360_v55 = vor.u32 %v8372_v43, %v6359_v8 }
 0x289   :  { %4008 = vmatpush.bf16.msra.mxu3 %v6456_v62  ;;  %3983 = vmatpush.bf16.msra.mxu1 %v5912_v9  ;;  %v8172_v52 = vld [vmem:[#allocation6 + $0x74] sm:$0xf0]  ;;  %v3744_v7 = vpop.f32.mrf.mxu2 }
 0x28a   :  { %v5815_v53 = vld [vmem:[#allocation6 + $0x258] sm:$0xf]  ;;  %v5560_v61 = vor.u32 %v8172_v52, %v5559_v51 }
 0x28b   :  { %3996 = vmatpush.bf16.msra.mxu2 %v6168_v10  ;;  %3971 = vmatpush.bf16.msra.mxu0 %v5624_v25  ;;  %v8236_v56 = vld [vmem:[#allocation6 + $0x274] sm:$0xf0] }
 0x28c   :  { %v6071_v57 = vld [vmem:[#allocation6 + $0x458] sm:$0xf]  ;;  %v5816_v0 = vor.u32 %v8236_v56, %v5815_v53 }
 0x28d   :  { %4009 = vmatpush.bf16.msra.mxu3 %v6424_v16  ;;  %3984 = vmatpush.bf16.msra.mxu1 %v5880_v26  ;;  %v8300_v58 = vld [vmem:[#allocation6 + $0x474] sm:$0xf0] }
 0x28e   :  { %v6327_v59 = vld [vmem:[#allocation6 + $0x658] sm:$0xf]  ;;  %v6072_v1 = vor.u32 %v8300_v58, %v6071_v57 }
 0x28f   :  { %3997 = vmatpush.bf16.msra.mxu2 %v6136_v27  ;;  %v8364_v60 = vld [vmem:[#allocation6 + $0x674] sm:$0xf0]  ;;  %3972 = vmatpush.bf16.msra.mxu0 %v5592_v45 }
 0x290   :  { %v5527_v62 = vld [vmem:[#allocation6 + $0x18] sm:$0xf]  ;;  %v6328_v9 = vor.u32 %v8364_v60, %v6327_v59 }
 0x291   :  { %4010 = vmatpush.bf16.msra.mxu3 %v6392_v39  ;;  %v8164_v63 = vld [vmem:[#allocation6 + $0x34] sm:$0xf0]  ;;  %3985 = vmatpush.bf16.msra.mxu1 %v5848_v49 }
 0x292   :  { %v5783_v2 = vld [vmem:[#allocation6 + $0x218] sm:$0xf]  ;;  %v5528_v17 = vor.u32 %v8164_v63, %v5527_v62 }
 0x293   :  { %3998 = vmatpush.bf16.msra.mxu2 %v6104_v50  ;;  %v8228_v3 = vld [vmem:[#allocation6 + $0x234] sm:$0xf0]  ;;  %3973 = vmatpush.bf16.msra.mxu0 %v5560_v61 }
 0x294   :  { %v6039_v5 = vld [vmem:[#allocation6 + $0x418] sm:$0xf]  ;;  %v5784_v23 = vor.u32 %v8228_v3, %v5783_v2 }
 0x295   :  { %4011 = vmatpush.bf16.msra.mxu3 %v6360_v55  ;;  %v8292_v10 = vld [vmem:[#allocation6 + $0x434] sm:$0xf0]  ;;  %3986 = vmatpush.bf16.msra.mxu1 %v5816_v0 }
 0x296   :  { %v6295_v11 = vld [vmem:[#allocation6 + $0x618] sm:$0xf]  ;;  %v6040_v24 = vor.u32 %v8292_v10, %v6039_v5 }
 0x297   :  { %v8356_v12 = vld [vmem:[#allocation6 + $0x634] sm:$0xf0]  ;;  %3999 = vmatpush.bf16.msra.mxu2 %v6072_v1  ;;  %3974 = vmatpush.bf16.msra.mxu0 %v5528_v17  ;;  %v3781_v17 = vpop.f32.mrf.mxu1 }
 0x298   :  { %v6775_v14 = vld [vmem:[#allocation6 + $0x9d8] sm:$0xf]  ;;  %v6296_v27 = vor.u32 %v8356_v12, %v6295_v11  ;;  %v3768_v11 = vpop.f32.mrf.mxu0 }
 0x299   :  { %v8476_v15 = vld [vmem:[#allocation6 + $0x9f4] sm:$0xf0]  ;;  %4012 = vmatpush.bf16.msra.mxu3 %v6328_v9  ;;  %3987 = vmatpush.bf16.msra.mxu1 %v5784_v23 }
 0x29a   :  { %v7031_v16 = vld [vmem:[#allocation6 + $0xbd8] sm:$0xf]  ;;  %v6776_v28 = vor.u32 %v8476_v15, %v6775_v14  ;;  %3975 = vmatmul.bf16.vlgmr.msra.gmra.mxu0 %v9301_v20 }
 0x29b   :  { %v8540_v18 = vld [vmem:[#allocation6 + $0xbf4] sm:$0xf0]  ;;  %4000 = vmatpush.bf16.msra.mxu2 %v6040_v24  ;;  %v3782_v24 = vadd.f32 %v3781_v17, %v3768_v11  ;;  %v8216_v17 = vld [vmem:[#allocation6 + $0x1dc] sm:$0xf] }
 0x29c   :  { %v7287_v19 = vld [vmem:[#allocation6 + $0xdd8] sm:$0xf]  ;;  %v7032_v35 = vor.u32 %v8540_v18, %v7031_v16  ;;  %4019 = vmatpush.bf16.msrb.mxu0 %v6776_v28  ;;  %3988 = vmatmul.bf16.vlgmr.msra.gmra.mxu1 %v9304_v21 }
 0x29d   :  { %v8604_v22 = vld [vmem:[#allocation6 + $0xdf4] sm:$0xf0]  ;;  %4013 = vmatpush.bf16.msra.mxu3 %v6296_v27 }
 0x29e   :  { %v7543_v25 = vld [vmem:[#allocation6 + $0xfd8] sm:$0xf]  ;;  %v7288_v29 = vor.u32 %v8604_v22, %v7287_v19  ;;  %4032 = vmatpush.bf16.msrb.mxu1 %v7032_v35  ;;  %4001 = vmatmul.bf16.vlgmr.msra.gmra.mxu2 %v9296_v4 }
 0x29f   :  { %v8668_v26 = vld [vmem:[#allocation6 + $0xff4] sm:$0xf0] }
 0x2a0   :  { %v6743_v40 = vld [vmem:[#allocation6 + $0x998] sm:$0xf]  ;;  %v7544_v31 = vor.u32 %v8668_v26, %v7543_v25  ;;  %4045 = vmatpush.bf16.msrb.mxu2 %v7288_v29  ;;  %4014 = vmatmul.bf16.vlgmr.msra.gmra.mxu3 %v9298_v6 }
 0x2a1   :  { %v8468_v39 = vld [vmem:[#allocation6 + $0x9b4] sm:$0xf0] }
 0x2a2   :  { %v6999_v30 = vld [vmem:[#allocation6 + $0xb98] sm:$0xf]  ;;  %v6744_v45 = vor.u32 %v8468_v39, %v6743_v40  ;;  %4058 = vmatpush.bf16.msrb.mxu3 %v7544_v31 }
 0x2a3   :  { %v8532_v32 = vld [vmem:[#allocation6 + $0xbb4] sm:$0xf0] }
 0x2a4   :  { %v7255_v33 = vld [vmem:[#allocation6 + $0xd98] sm:$0xf]  ;;  %v7000_v48 = vor.u32 %v8532_v32, %v6999_v30  ;;  %4020 = vmatpush.bf16.msrb.mxu0 %v6744_v45  ;;  %v3794_v30 = vpop.f32.mrf.mxu2 }
 0x2a5   :  { %v8596_v34 = vld [vmem:[#allocation6 + $0xdb4] sm:$0xf0] }
 0x2a6   :  { %v7511_v8 = vld [vmem:[#allocation6 + $0xf98] sm:$0xf]  ;;  %v7256_v49 = vor.u32 %v8596_v34, %v7255_v33  ;;  %4033 = vmatpush.bf16.msrb.mxu1 %v7000_v48 }
 0x2a7   :  { %v8660_v43 = vld [vmem:[#allocation6 + $0xfb4] sm:$0xf0] }
 0x2a8   :  { %v6711_v50 = vld [vmem:[#allocation6 + $0x958] sm:$0xf]  ;;  %v7512_v53 = vor.u32 %v8660_v43, %v7511_v8  ;;  %4046 = vmatpush.bf16.msrb.mxu2 %v7256_v49  ;;  %v3795_v8 = vadd.f32 %v3794_v30, %v3782_v24  ;;  %v3807_v43 = vpop.f32.mrf.mxu3  ;;  %v8344_v24 = vld [vmem:[#allocation6 + $0x5dc] sm:$0xf] }
 0x2a9   :  { %v8460_v51 = vld [vmem:[#allocation6 + $0x974] sm:$0xf0] }
 0x2aa   :  { %v6967_v52 = vld [vmem:[#allocation6 + $0xb58] sm:$0xf]  ;;  %v6712_v59 = vor.u32 %v8460_v51, %v6711_v50  ;;  %4059 = vmatpush.bf16.msrb.mxu3 %v7512_v53  ;;  %v9384_v50 = vadd.f32 %v3807_v43, %v3795_v8  ;;  %v3770_v51 = vpop.f32.mrf.mxu0  ;;  %v5977_v8 = vld [vmem:[#allocation6 + $0x3b8] sm:$0xf0] }
 0x2ab   :  { %v8524_v54 = vld [vmem:[#allocation6 + $0xb74] sm:$0xf0]  ;;  %v8336_v43 = vld [vmem:[#allocation6 + $0x59c] sm:$0xf] }
 0x2ac   :  { %v7223_v55 = vld [vmem:[#allocation6 + $0xd58] sm:$0xf]  ;;  %v6968_v60 = vor.u32 %v8524_v54, %v6967_v52  ;;  %4021 = vmatpush.bf16.msrb.mxu0 %v6712_v59  ;;  %v3796_v11 = vpop.f32.mrf.mxu2 }
 0x2ad   :  { %v8588_v56 = vld [vmem:[#allocation6 + $0xd74] sm:$0xf0]  ;;  %v6169_v11 = vld [vmem:[#allocation6 + $0x538] sm:$0xf0] }
 0x2ae   :  { %v7479_v57 = vld [vmem:[#allocation6 + $0xf58] sm:$0xf]  ;;  %v7224_v61 = vor.u32 %v8588_v56, %v7223_v55  ;;  %4034 = vmatpush.bf16.msrb.mxu1 %v6968_v60 }
 0x2af   :  { %v8652_v58 = vld [vmem:[#allocation6 + $0xf74] sm:$0xf0] }
 0x2b0   :  { %v6679_v62 = vld [vmem:[#allocation6 + $0x918] sm:$0xf]  ;;  %v7480_v1 = vor.u32 %v8652_v58, %v7479_v57  ;;  %4047 = vmatpush.bf16.msrb.mxu2 %v7224_v61  ;;  %v3783_v57 = vpop.f32.mrf.mxu1 }
 0x2b1   :  { %v8452_v63 = vld [vmem:[#allocation6 + $0x934] sm:$0xf0] }
 0x2b2   :  { %v6935_v0 = vld [vmem:[#allocation6 + $0xb18] sm:$0xf]  ;;  %v6680_v10 = vor.u32 %v8452_v63, %v6679_v62  ;;  %4060 = vmatpush.bf16.msrb.mxu3 %v7480_v1 }
 0x2b3   :  { %v8516_v2 = vld [vmem:[#allocation6 + $0xb34] sm:$0xf0] }
 0x2b4   :  { %v7191_v3 = vld [vmem:[#allocation6 + $0xd18] sm:$0xf]  ;;  %v6936_v12 = vor.u32 %v8516_v2, %v6935_v0  ;;  %4022 = vmatpush.bf16.msrb.mxu0 %v6680_v10 }
 0x2b5   :  { %v8580_v5 = vld [vmem:[#allocation6 + $0xd34] sm:$0xf0] }
 0x2b6   :  { %v7447_v7 = vld [vmem:[#allocation6 + $0xf18] sm:$0xf]  ;;  %v7192_v13 = vor.u32 %v8580_v5, %v7191_v3  ;;  %4035 = vmatpush.bf16.msrb.mxu1 %v6936_v12 }
 0x2b7   :  { %v8644_v9 = vld [vmem:[#allocation6 + $0xf34] sm:$0xf0] }
 0x2b8   :  { %v6647_v14 = vld [vmem:[#allocation6 + $0x8d8] sm:$0xf]  ;;  %v7448_v18 = vor.u32 %v8644_v9, %v7447_v7  ;;  %4048 = vmatpush.bf16.msrb.mxu2 %v7192_v13 }
 0x2b9   :  { %v8444_v15 = vld [vmem:[#allocation6 + $0x8f4] sm:$0xf0] }
 0x2ba   :  { %v6903_v16 = vld [vmem:[#allocation6 + $0xad8] sm:$0xf]  ;;  %v6648_v27 = vor.u32 %v8444_v15, %v6647_v14  ;;  %4061 = vmatpush.bf16.msrb.mxu3 %v7448_v18  ;;  %v5753_v18 = vld [vmem:[#allocation6 + $0x1f8] sm:$0xf0] }
 0x2bb   :  { %v8508_v19 = vld [vmem:[#allocation6 + $0xaf4] sm:$0xf0] }
 0x2bc   :  { %v7159_v22 = vld [vmem:[#allocation6 + $0xcd8] sm:$0xf]  ;;  %v6904_v28 = vor.u32 %v8508_v19, %v6903_v16  ;;  %4023 = vmatpush.bf16.msrb.mxu0 %v6648_v27  ;;  %v3809_v16 = vpop.f32.mrf.mxu3  ;;  %v8280_v19 = vld [vmem:[#allocation6 + $0x3dc] sm:$0xf] }
 0x2bd   :  { %v8572_v23 = vld [vmem:[#allocation6 + $0xcf4] sm:$0xf0] }
 0x2be   :  { %v7415_v25 = vld [vmem:[#allocation6 + $0xed8] sm:$0xf]  ;;  %v7160_v35 = vor.u32 %v8572_v23, %v7159_v22  ;;  %4036 = vmatpush.bf16.msrb.mxu1 %v6904_v28  ;;  %v6009_v23 = vld [vmem:[#allocation6 + $0x3f8] sm:$0xf0] }
 0x2bf   :  { %v8636_v26 = vld [vmem:[#allocation6 + $0xef4] sm:$0xf0]  ;;  %v8408_v28 = vld [vmem:[#allocation6 + $0x7dc] sm:$0xf] }
 0x2c0   :  { %v6615_v29 = vld [vmem:[#allocation6 + $0x898] sm:$0xf]  ;;  %v7416_v31 = vor.u32 %v8636_v26, %v7415_v25  ;;  %4049 = vmatpush.bf16.msrb.mxu2 %v7160_v35  ;;  %v6265_v25 = vld [vmem:[#allocation6 + $0x5f8] sm:$0xf0] }
 0x2c1   :  { %v8436_v40 = vld [vmem:[#allocation6 + $0x8b4] sm:$0xf0]  ;;  %v6521_v35 = vld [vmem:[#allocation6 + $0x7f8] sm:$0xf0]  ;;  %v6268_v30 = vor.u32 %v8344_v24, %v6265_v25  ;;  %v3833_v24 = vpop.f32.mrf.mxu1 }
 0x2c2   :  { %v6871_v39 = vld [vmem:[#allocation6 + $0xa98] sm:$0xf]  ;;  %v6616_v49 = vor.u32 %v8436_v40, %v6615_v29  ;;  %4062 = vmatpush.bf16.msrb.mxu3 %v7416_v31  ;;  %v5756_v40 = vor.u32 %v8216_v17, %v5753_v18  ;;  %v8208_v31 = vld [vmem:[#allocation6 + $0x19c] sm:$0xf] }
 0x2c3   :  { %v8500_v32 = vld [vmem:[#allocation6 + $0xab4] sm:$0xf0]  ;;  %v8184_v18 = vld [vmem:[#allocation6 + $0xdc] sm:$0xf] }
 0x2c4   :  { %v7127_v33 = vld [vmem:[#allocation6 + $0xc98] sm:$0xf]  ;;  %v6872_v52 = vor.u32 %v8500_v32, %v6871_v39  ;;  %4024 = vmatpush.bf16.msrb.mxu0 %v6616_v49  ;;  %v6012_v39 = vor.u32 %v8280_v19, %v6009_v23  ;;  %v5721_v32 = vld [vmem:[#allocation6 + $0x1b8] sm:$0xf0] }
 0x2c5   :  { %v8564_v34 = vld [vmem:[#allocation6 + $0xcb4] sm:$0xf0]  ;;  %v6489_v49 = vld [vmem:[#allocation6 + $0x7b8] sm:$0xf0]  ;;  %v5724_v51 = vor.u32 %v8208_v31, %v5721_v32 }
 0x2c6   :  { %v7383_v45 = vld [vmem:[#allocation6 + $0xe98] sm:$0xf]  ;;  %v7128_v53 = vor.u32 %v8564_v34, %v7127_v33  ;;  %4037 = vmatpush.bf16.msrb.mxu1 %v6872_v52  ;;  %v8272_v33 = vld [vmem:[#allocation6 + $0x39c] sm:$0xf]  ;;  %v6524_v34 = vor.u32 %v8408_v28, %v6521_v35 }
 0x2c7   :  { %v8628_v48 = vld [vmem:[#allocation6 + $0xeb4] sm:$0xf0]  ;;  %v5980_v52 = vor.u32 %v8272_v33, %v5977_v8  ;;  %v5625_v19 = vld [vmem:[#allocation6 + $0xf8] sm:$0xf0]  ;;  %v3846_v8 = vpop.f32.mrf.mxu2 }
 0x2c8   :  { %v6583_v54 = vld [vmem:[#allocation6 + $0x858] sm:$0xf]  ;;  %v7384_v58 = vor.u32 %v8628_v48, %v7383_v45  ;;  %4050 = vmatpush.bf16.msrb.mxu2 %v7128_v53  ;;  %v6233_v45 = vld [vmem:[#allocation6 + $0x5b8] sm:$0xf0] }
 0x2c9   :  { %v8428_v55 = vld [vmem:[#allocation6 + $0x874] sm:$0xf0]  ;;  %v8400_v48 = vld [vmem:[#allocation6 + $0x79c] sm:$0xf]  ;;  %v6236_v53 = vor.u32 %v8336_v43, %v6233_v45 }
 0x2ca   :  { %v6839_v56 = vld [vmem:[#allocation6 + $0xa58] sm:$0xf]  ;;  %v6584_v0 = vor.u32 %v8428_v55, %v6583_v54  ;;  %4063 = vmatpush.bf16.msrb.mxu3 %v7384_v58  ;;  %v8200_v54 = vld [vmem:[#allocation6 + $0x15c] sm:$0xf]  ;;  %v6492_v57 = vor.u32 %v8400_v48, %v6489_v49 }
 0x2cb   :  { %v8492_v59 = vld [vmem:[#allocation6 + $0xa74] sm:$0xf0]  ;;  %v5689_v55 = vld [vmem:[#allocation6 + $0x178] sm:$0xf0] }
 0x2cc   :  { %v7095_v60 = vld [vmem:[#allocation6 + $0xc58] sm:$0xf]  ;;  %v6840_v3 = vor.u32 %v8492_v59, %v6839_v56  ;;  %4025 = vmatpush.bf16.msrb.mxu0 %v6584_v0  ;;  %v8264_v56 = vld [vmem:[#allocation6 + $0x35c] sm:$0xf] }
 0x2cd   :  { %v8556_v61 = vld [vmem:[#allocation6 + $0xc74] sm:$0xf0]  ;;  %v5945_v58 = vld [vmem:[#allocation6 + $0x378] sm:$0xf0] }
 0x2ce   :  { %v7351_v62 = vld [vmem:[#allocation6 + $0xe58] sm:$0xf]  ;;  %v7096_v5 = vor.u32 %v8556_v61, %v7095_v60  ;;  %4038 = vmatpush.bf16.msrb.mxu1 %v6840_v3  ;;  %v8328_v59 = vld [vmem:[#allocation6 + $0x55c] sm:$0xf]  ;;  %v5948_v0 = vor.u32 %v8264_v56, %v5945_v58 }
 0x2cf   :  { %v8620_v63 = vld [vmem:[#allocation6 + $0xe74] sm:$0xf0]  ;;  %v6201_v60 = vld [vmem:[#allocation6 + $0x578] sm:$0xf0] }
 0x2d0   :  { %v6551_v1 = vld [vmem:[#allocation6 + $0x818] sm:$0xf]  ;;  %v7352_v12 = vor.u32 %v8620_v63, %v7351_v62  ;;  %4051 = vmatpush.bf16.msrb.mxu2 %v7096_v5  ;;  %v8392_v61 = vld [vmem:[#allocation6 + $0x75c] sm:$0xf]  ;;  %v5692_v63 = vor.u32 %v8200_v54, %v5689_v55 }
 0x2d1   :  { %v8420_v2 = vld [vmem:[#allocation6 + $0x834] sm:$0xf0]  ;;  %v6457_v62 = vld [vmem:[#allocation6 + $0x778] sm:$0xf0] }
 0x2d2   :  { %v6807_v7 = vld [vmem:[#allocation6 + $0xa18] sm:$0xf]  ;;  %v6552_v22 = vor.u32 %v8420_v2, %v6551_v1  ;;  %4064 = vmatpush.bf16.msrb.mxu3 %v7352_v12  ;;  %v6204_v1 = vor.u32 %v8328_v59, %v6201_v60  ;;  %v8192_v2 = vld [vmem:[#allocation6 + $0x11c] sm:$0xf] }
 0x2d3   :  { %v8484_v9 = vld [vmem:[#allocation6 + $0xa34] sm:$0xf0]  ;;  %v5657_v3 = vld [vmem:[#allocation6 + $0x138] sm:$0xf0] }
 0x2d4   :  { %v7063_v10 = vld [vmem:[#allocation6 + $0xc18] sm:$0xf]  ;;  %v6808_v26 = vor.u32 %v8484_v9, %v6807_v7  ;;  %4026 = vmatpush.bf16.msrb.mxu0 %v6552_v22  ;;  %v8256_v5 = vld [vmem:[#allocation6 + $0x31c] sm:$0xf]  ;;  %v6460_v7 = vor.u32 %v8392_v61, %v6457_v62  ;;  %v3835_v62 = vpop.f32.mrf.mxu1 }
 0x2d5   :  { %v8548_v13 = vld [vmem:[#allocation6 + $0xc34] sm:$0xf0]  ;;  %v5913_v9 = vld [vmem:[#allocation6 + $0x338] sm:$0xf0] }
 0x2d6   :  { %v7319_v14 = vld [vmem:[#allocation6 + $0xe18] sm:$0xf]  ;;  %v7064_v27 = vor.u32 %v8548_v13, %v7063_v10  ;;  %4039 = vmatpush.bf16.msrb.mxu1 %v6808_v26  ;;  %v8320_v10 = vld [vmem:[#allocation6 + $0x51c] sm:$0xf]  ;;  %v5916_v16 = vor.u32 %v8256_v5, %v5913_v9 }
 0x2d7   :  { %v8612_v15 = vld [vmem:[#allocation6 + $0xe34] sm:$0xf0]  ;;  %4027 = vmatmul.bf16.vlgmr.msrb.gmra.mxu0 %v9310_v41  ;;  %v8384_v12 = vld [vmem:[#allocation6 + $0x71c] sm:$0xf]  ;;  %v6172_v17 = vor.u32 %v8320_v10, %v6169_v11 }
 0x2d8   :  { %v7320_v29 = vor.u32 %v8612_v15, %v7319_v14  ;;  %4052 = vmatpush.bf16.msrb.mxu2 %v7064_v27  ;;  %4071 = vmatpush.bf16.msra.mxu0 %v5756_v40  ;;  %v6425_v13 = vld [vmem:[#allocation6 + $0x738] sm:$0xf0]  ;;  %v5660_v14 = vor.u32 %v8192_v2, %v5657_v3  ;;  %v3820_v15 = vpop.f32.mrf.mxu0 }
 0x2d9   :  { %4040 = vmatmul.bf16.vlgmr.msrb.gmra.mxu1 %v9314_v44  ;;  %v8248_v22 = vld [vmem:[#allocation6 + $0x2dc] sm:$0xf]  ;;  %v3821_v23 = vadd.f32 %v3820_v15, %v9384_v50  ;;  %v6428_v25 = vor.u32 %v8384_v12, %v6425_v13 }
 0x2da   :  { %4065 = vmatpush.bf16.msrb.mxu3 %v7320_v29  ;;  %4084 = vmatpush.bf16.msra.mxu1 %v6012_v39  ;;  %v5881_v26 = vld [vmem:[#allocation6 + $0x2f8] sm:$0xf0]  ;;  %v5628_v39 = vor.u32 %v8184_v18, %v5625_v19 }
 0x2db   :  { %4053 = vmatmul.bf16.vlgmr.msrb.gmra.mxu2 %v9308_v38  ;;  %v8312_v27 = vld [vmem:[#allocation6 + $0x4dc] sm:$0xf]  ;;  %v3834_v40 = vadd.f32 %v3833_v24, %v3821_v23 }
 0x2dc   :  { %4097 = vmatpush.bf16.msra.mxu2 %v6268_v30  ;;  %4072 = vmatpush.bf16.msra.mxu0 %v5724_v51  ;;  %v6137_v28 = vld [vmem:[#allocation6 + $0x4f8] sm:$0xf0]  ;;  %v5884_v30 = vor.u32 %v8248_v22, %v5881_v26  ;;  %v3859_v51 = vpop.f32.mrf.mxu3 }
 0x2dd   :  { %4066 = vmatmul.bf16.vlgmr.msrb.gmra.mxu3 %v9312_v42  ;;  %v8376_v35 = vld [vmem:[#allocation6 + $0x6dc] sm:$0xf]  ;;  %v6140_v31 = vor.u32 %v8312_v27, %v6137_v28  ;;  %v3847_v49 = vadd.f32 %v3846_v8, %v3834_v40 }
 0x2de   :  { %4110 = vmatpush.bf16.msra.mxu3 %v6524_v34  ;;  %4085 = vmatpush.bf16.msra.mxu1 %v5980_v52  ;;  %v6393_v29 = vld [vmem:[#allocation6 + $0x6f8] sm:$0xf0] }
 0x2df   :  { %v8176_v32 = vld [vmem:[#allocation6 + $0x9c] sm:$0xf]  ;;  %v6396_v50 = vor.u32 %v8376_v35, %v6393_v29  ;;  %v9391_v55 = vadd.f32 %v3859_v51, %v3847_v49 }
 0x2e0   :  { %4098 = vmatpush.bf16.msra.mxu2 %v6236_v53  ;;  %4073 = vmatpush.bf16.msra.mxu0 %v5692_v63  ;;  %v5593_v33 = vld [vmem:[#allocation6 + $0xb8] sm:$0xf0]  ;;  %v3822_v56 = vpop.f32.mrf.mxu0 }
 0x2e1   :  { %v8240_v34 = vld [vmem:[#allocation6 + $0x29c] sm:$0xf]  ;;  %v5596_v54 = vor.u32 %v8176_v32, %v5593_v33 }
 0x2e2   :  { %4111 = vmatpush.bf16.msra.mxu3 %v6492_v57  ;;  %4086 = vmatpush.bf16.msra.mxu1 %v5948_v0  ;;  %v5849_v43 = vld [vmem:[#allocation6 + $0x2b8] sm:$0xf0] }
 0x2e3   :  { %v8304_v45 = vld [vmem:[#allocation6 + $0x49c] sm:$0xf]  ;;  %v5852_v57 = vor.u32 %v8240_v34, %v5849_v43 }
 0x2e4   :  { %4099 = vmatpush.bf16.msra.mxu2 %v6204_v1  ;;  %4074 = vmatpush.bf16.msra.mxu0 %v5660_v14  ;;  %v6105_v48 = vld [vmem:[#allocation6 + $0x4b8] sm:$0xf0]  ;;  %v3861_v23 = vpop.f32.mrf.mxu3 }
 0x2e5   :  { %v8368_v52 = vld [vmem:[#allocation6 + $0x69c] sm:$0xf]  ;;  %v6108_v58 = vor.u32 %v8304_v45, %v6105_v48 }
 0x2e6   :  { %4112 = vmatpush.bf16.msra.mxu3 %v6460_v7  ;;  %4087 = vmatpush.bf16.msra.mxu1 %v5916_v16  ;;  %v6361_v53 = vld [vmem:[#allocation6 + $0x6b8] sm:$0xf0]  ;;  %v3848_v16 = vpop.f32.mrf.mxu2 }
 0x2e7   :  { %v8168_v59 = vld [vmem:[#allocation6 + $0x5c] sm:$0xf]  ;;  %v6364_v63 = vor.u32 %v8368_v52, %v6361_v53 }
 0x2e8   :  { %4100 = vmatpush.bf16.msra.mxu2 %v6172_v17  ;;  %4075 = vmatpush.bf16.msra.mxu0 %v5628_v39  ;;  %v5561_v60 = vld [vmem:[#allocation6 + $0x78] sm:$0xf0] }
 0x2e9   :  { %v8232_v61 = vld [vmem:[#allocation6 + $0x25c] sm:$0xf]  ;;  %v5564_v7 = vor.u32 %v8168_v59, %v5561_v60 }
 0x2ea   :  { %4113 = vmatpush.bf16.msra.mxu3 %v6428_v25  ;;  %4088 = vmatpush.bf16.msra.mxu1 %v5884_v30  ;;  %v5817_v0 = vld [vmem:[#allocation6 + $0x278] sm:$0xf0] }
 0x2eb   :  { %v8296_v1 = vld [vmem:[#allocation6 + $0x45c] sm:$0xf]  ;;  %v5820_v11 = vor.u32 %v8232_v61, %v5817_v0 }
 0x2ec   :  { %4101 = vmatpush.bf16.msra.mxu2 %v6140_v31  ;;  %v6073_v2 = vld [vmem:[#allocation6 + $0x478] sm:$0xf0]  ;;  %4076 = vmatpush.bf16.msra.mxu0 %v5596_v54 }
 0x2ed   :  { %v8360_v3 = vld [vmem:[#allocation6 + $0x65c] sm:$0xf]  ;;  %v6076_v12 = vor.u32 %v8296_v1, %v6073_v2 }
 0x2ee   :  { %4114 = vmatpush.bf16.msra.mxu3 %v6396_v50  ;;  %v6329_v5 = vld [vmem:[#allocation6 + $0x678] sm:$0xf0]  ;;  %4089 = vmatpush.bf16.msra.mxu1 %v5852_v57 }
 0x2ef   :  { %v8160_v9 = vld [vmem:[#allocation6 + $0x1c] sm:$0xf]  ;;  %v6332_v17 = vor.u32 %v8360_v3, %v6329_v5 }
 0x2f0   :  { %v5529_v10 = vld [vmem:[#allocation6 + $0x38] sm:$0xf0]  ;;  %4102 = vmatpush.bf16.msra.mxu2 %v6108_v58  ;;  %4077 = vmatpush.bf16.msra.mxu0 %v5564_v7 }
 0x2f1   :  { %v8224_v13 = vld [vmem:[#allocation6 + $0x21c] sm:$0xf]  ;;  %v5532_v27 = vor.u32 %v8160_v9, %v5529_v10 }
 0x2f2   :  { %v5785_v14 = vld [vmem:[#allocation6 + $0x238] sm:$0xf0]  ;;  %4115 = vmatpush.bf16.msra.mxu3 %v6364_v63  ;;  %4090 = vmatpush.bf16.msra.mxu1 %v5820_v11 }
 0x2f3   :  { %v8288_v15 = vld [vmem:[#allocation6 + $0x41c] sm:$0xf]  ;;  %v5788_v40 = vor.u32 %v8224_v13, %v5785_v14 }
 0x2f4   :  { %v6041_v18 = vld [vmem:[#allocation6 + $0x438] sm:$0xf0]  ;;  %4103 = vmatpush.bf16.msra.mxu2 %v6076_v12  ;;  %4078 = vmatpush.bf16.msra.mxu0 %v5532_v27 }
 0x2f5   :  { %v8352_v19 = vld [vmem:[#allocation6 + $0x61c] sm:$0xf]  ;;  %v6044_v39 = vor.u32 %v8288_v15, %v6041_v18 }
 0x2f6   :  { %v6297_v22 = vld [vmem:[#allocation6 + $0x638] sm:$0xf0]  ;;  %4116 = vmatpush.bf16.msra.mxu3 %v6332_v17  ;;  %4091 = vmatpush.bf16.msra.mxu1 %v5788_v40  ;;  %v3872_v17 = vpop.f32.mrf.mxu0 }
 0x2f7   :  { %v8472_v24 = vld [vmem:[#allocation6 + $0x9dc] sm:$0xf]  ;;  %v6300_v32 = vor.u32 %v8352_v19, %v6297_v22  ;;  %4079 = vmatmul.bf16.vlgmr.msra.gmra.mxu0 %v9301_v20 }
 0x2f8   :  { %v6777_v25 = vld [vmem:[#allocation6 + $0x9f8] sm:$0xf0]  ;;  %4104 = vmatpush.bf16.msra.mxu2 %v6044_v39 }
 0x2f9   :  { %v8536_v26 = vld [vmem:[#allocation6 + $0xbdc] sm:$0xf]  ;;  %v6780_v33 = vor.u32 %v8472_v24, %v6777_v25  ;;  %4092 = vmatmul.bf16.vlgmr.msra.gmra.mxu1 %v9304_v21  ;;  %v3885_v24 = vpop.f32.mrf.mxu1 }
 0x2fa   :  { %v7033_v28 = vld [vmem:[#allocation6 + $0xbf8] sm:$0xf0]  ;;  %4117 = vmatpush.bf16.msra.mxu3 %v6300_v32 }
 0x2fb   :  { %v8600_v35 = vld [vmem:[#allocation6 + $0xddc] sm:$0xf]  ;;  %v7036_v34 = vor.u32 %v8536_v26, %v7033_v28  ;;  %4123 = vmatpush.bf16.msrb.mxu0 %v6780_v33  ;;  %4105 = vmatmul.bf16.vlgmr.msra.gmra.mxu2 %v9296_v4 }
 0x2fc   :  { %v7289_v29 = vld [vmem:[#allocation6 + $0xdf8] sm:$0xf0] }
 0x2fd   :  { %v8664_v30 = vld [vmem:[#allocation6 + $0xfdc] sm:$0xf]  ;;  %v7292_v8 = vor.u32 %v8600_v35, %v7289_v29  ;;  %4136 = vmatpush.bf16.msrb.mxu1 %v7036_v34  ;;  %4118 = vmatmul.bf16.vlgmr.msra.gmra.mxu3 %v9298_v6  ;;  %v9397_v35 = vadd.f32 %v3885_v24, %v3872_v17  ;;  %v7735_v24 = vld [vmem:[#allocation9 + $0x170] sm:$0xf] }
 0x2fe   :  { %v7545_v31 = vld [vmem:[#allocation6 + $0xff8] sm:$0xf0] }
 0x2ff   :  { %v8464_v50 = vld [vmem:[#allocation6 + $0x99c] sm:$0xf]  ;;  %v7548_v48 = vor.u32 %v8664_v30, %v7545_v31  ;;  %4149 = vmatpush.bf16.msrb.mxu2 %v7292_v8  ;;  %v9399_v8 = vpop.f32.mrf.mxu2 }
 0x300   :  { %v6745_v43 = vld [vmem:[#allocation6 + $0x9b8] sm:$0xf0] }
 0x301   :  { %v8528_v45 = vld [vmem:[#allocation6 + $0xb9c] sm:$0xf]  ;;  %v6748_v56 = vor.u32 %v8464_v50, %v6745_v43  ;;  %4162 = vmatpush.bf16.msrb.mxu3 %v7548_v48 }
 0x302   :  { %v7001_v49 = vld [vmem:[#allocation6 + $0xbb8] sm:$0xf0] }
 0x303   :  { %v8592_v51 = vld [vmem:[#allocation6 + $0xd9c] sm:$0xf]  ;;  %v7004_v57 = vor.u32 %v8528_v45, %v7001_v49  ;;  %4124 = vmatpush.bf16.msrb.mxu0 %v6748_v56  ;;  %v9401_v49 = vpop.f32.mrf.mxu3 }
 0x304   :  { %v7257_v52 = vld [vmem:[#allocation6 + $0xdb8] sm:$0xf0] }
 0x305   :  { %v8656_v53 = vld [vmem:[#allocation6 + $0xf9c] sm:$0xf]  ;;  %v7260_v58 = vor.u32 %v8592_v51, %v7257_v52  ;;  %4137 = vmatpush.bf16.msrb.mxu1 %v7004_v57 }
 0x306   :  { %v7513_v54 = vld [vmem:[#allocation6 + $0xfb8] sm:$0xf0] }
 0x307   :  { %v8456_v59 = vld [vmem:[#allocation6 + $0x95c] sm:$0xf]  ;;  %v7516_v62 = vor.u32 %v8656_v53, %v7513_v54  ;;  %4150 = vmatpush.bf16.msrb.mxu2 %v7260_v58  ;;  %v3874_v54 = vpop.f32.mrf.mxu0 }
 0x308   :  { %v6713_v60 = vld [vmem:[#allocation6 + $0x978] sm:$0xf0] }
 0x309   :  { %v8520_v61 = vld [vmem:[#allocation6 + $0xb5c] sm:$0xf]  ;;  %v6716_v5 = vor.u32 %v8456_v59, %v6713_v60  ;;  %4163 = vmatpush.bf16.msrb.mxu3 %v7516_v62 }
 0x30a   :  { %v6969_v63 = vld [vmem:[#allocation6 + $0xb78] sm:$0xf0] }
 0x30b   :  { %v8584_v0 = vld [vmem:[#allocation6 + $0xd5c] sm:$0xf]  ;;  %v6972_v7 = vor.u32 %v8520_v61, %v6969_v63  ;;  %4125 = vmatpush.bf16.msrb.mxu0 %v6716_v5  ;;  %v3887_v61 = vpop.f32.mrf.mxu1  ;;  %v3913_v17 = vpop.f32.mrf.mxu3 }
 0x30c   :  { %v7225_v1 = vld [vmem:[#allocation6 + $0xd78] sm:$0xf0]  ;;  %v8696_v61 = vld [vmem:[#allocation9 + $0xd4] sm:$0xf0] }
 0x30d   :  { %v8648_v2 = vld [vmem:[#allocation6 + $0xf5c] sm:$0xf]  ;;  %v7228_v9 = vor.u32 %v8584_v0, %v7225_v1  ;;  %4138 = vmatpush.bf16.msrb.mxu1 %v6972_v7 }
 0x30e   :  { %v7481_v3 = vld [vmem:[#allocation6 + $0xf78] sm:$0xf0] }
 0x30f   :  { %v8448_v10 = vld [vmem:[#allocation6 + $0x91c] sm:$0xf]  ;;  %v7484_v12 = vor.u32 %v8648_v2, %v7481_v3  ;;  %4151 = vmatpush.bf16.msrb.mxu2 %v7228_v9 }
 0x310   :  { %v6681_v11 = vld [vmem:[#allocation6 + $0x938] sm:$0xf0] }
 0x311   :  { %v8512_v4 = vld [vmem:[#allocation6 + $0xb1c] sm:$0xf]  ;;  %v6684_v6 = vor.u32 %v8448_v10, %v6681_v11  ;;  %4164 = vmatpush.bf16.msrb.mxu3 %v7484_v12 }
 0x312   :  { %v6937_v13 = vld [vmem:[#allocation6 + $0xb38] sm:$0xf0] }
 0x313   :  { %v8576_v14 = vld [vmem:[#allocation6 + $0xd1c] sm:$0xf]  ;;  %v6940_v21 = vor.u32 %v8512_v4, %v6937_v13  ;;  %4126 = vmatpush.bf16.msrb.mxu0 %v6684_v6  ;;  %v9409_v17 = vpop.f32.mrf.mxu1 }
 0x314   :  { %v7193_v15 = vld [vmem:[#allocation6 + $0xd38] sm:$0xf0] }
 0x315   :  { %v8640_v16 = vld [vmem:[#allocation6 + $0xf1c] sm:$0xf]  ;;  %v7196_v18 = vor.u32 %v8576_v14, %v7193_v15  ;;  %4139 = vmatpush.bf16.msrb.mxu1 %v6940_v21  ;;  %v3900_v14 = vpop.f32.mrf.mxu2  ;;  %v7607_v21 = vld [vmem:[#allocation9 + $0x70] sm:$0xf] }
 0x316   :  { %v7449_v20 = vld [vmem:[#allocation6 + $0xf38] sm:$0xf0]  ;;  %v9407_v14 = vpop.f32.mrf.mxu0 }
 0x317   :  { %v8440_v19 = vld [vmem:[#allocation6 + $0x8dc] sm:$0xf]  ;;  %v7452_v25 = vor.u32 %v8640_v16, %v7449_v20  ;;  %4152 = vmatpush.bf16.msrb.mxu2 %v7196_v18  ;;  %v8684_v18 = vld [vmem:[#allocation9 + $0x74] sm:$0xf0] }
 0x318   :  { %v6649_v22 = vld [vmem:[#allocation6 + $0x8f8] sm:$0xf0] }
 0x319   :  { %v8504_v23 = vld [vmem:[#allocation6 + $0xadc] sm:$0xf]  ;;  %v6652_v39 = vor.u32 %v8440_v19, %v6649_v22  ;;  %4165 = vmatpush.bf16.msrb.mxu3 %v7452_v25  ;;  %v7671_v19 = vld [vmem:[#allocation9 + $0xf0] sm:$0xf]  ;;  %v8716_v25 = vld [vmem:[#allocation9 + $0x174] sm:$0xf0] }
 0x31a   :  { %v6905_v26 = vld [vmem:[#allocation6 + $0xaf8] sm:$0xf0] }
 0x31b   :  { %v8568_v27 = vld [vmem:[#allocation6 + $0xcdc] sm:$0xf]  ;;  %v6908_v30 = vor.u32 %v8504_v23, %v6905_v26  ;;  %4127 = vmatpush.bf16.msrb.mxu0 %v6652_v39  ;;  %v8700_v23 = vld [vmem:[#allocation9 + $0xf4] sm:$0xf0]  ;;  %v7608_v39 = vor.u32 %v8684_v18, %v7607_v21 }
 0x31c   :  { %v7161_v28 = vld [vmem:[#allocation6 + $0xcf8] sm:$0xf0]  ;;  %v8692_v18 = vld [vmem:[#allocation9 + $0xb4] sm:$0xf0] }
 0x31d   :  { %v8632_v29 = vld [vmem:[#allocation6 + $0xedc] sm:$0xf]  ;;  %v7164_v31 = vor.u32 %v8568_v27, %v7161_v28  ;;  %4140 = vmatpush.bf16.msrb.mxu1 %v6908_v30  ;;  %v7799_v28 = vld [vmem:[#allocation9 + $0x1f0] sm:$0xf]  ;;  %v7672_v30 = vor.u32 %v8700_v23, %v7671_v19 }
 0x31e   :  { %v7417_v40 = vld [vmem:[#allocation6 + $0xef8] sm:$0xf0]  ;;  %v7703_v19 = vld [vmem:[#allocation9 + $0x130] sm:$0xf] }
 0x31f   :  { %v8432_v32 = vld [vmem:[#allocation6 + $0x89c] sm:$0xf]  ;;  %v7420_v50 = vor.u32 %v8632_v29, %v7417_v40  ;;  %4153 = vmatpush.bf16.msrb.mxu2 %v7164_v31  ;;  %v8732_v29 = vld [vmem:[#allocation9 + $0x1f4] sm:$0xf0]  ;;  %v7736_v31 = vor.u32 %v8716_v25, %v7735_v24  ;;  %v7767_v23 = vld [vmem:[#allocation9 + $0x1b0] sm:$0xf] }
 0x320   :  { %v6617_v33 = vld [vmem:[#allocation6 + $0x8b8] sm:$0xf0]  ;;  %v8724_v24 = vld [vmem:[#allocation9 + $0x1b4] sm:$0xf0] }
 0x321   :  { %v8496_v34 = vld [vmem:[#allocation6 + $0xa9c] sm:$0xf]  ;;  %v6620_v53 = vor.u32 %v8432_v32, %v6617_v33  ;;  %4166 = vmatpush.bf16.msrb.mxu3 %v7420_v50  ;;  %v7599_v32 = vld [vmem:[#allocation9 + $0x60] sm:$0xf]  ;;  %v8682_v33 = vld [vmem:[#allocation9 + $0x64] sm:$0xf0]  ;;  %v7800_v50 = vor.u32 %v8732_v29, %v7799_v28 }
 0x322   :  { %v6873_v43 = vld [vmem:[#allocation6 + $0xab8] sm:$0xf0]  ;;  %v7567_v28 = vld [vmem:[#allocation9 + $0x20] sm:$0xf]  ;;  %v8674_v29 = vld [vmem:[#allocation9 + $0x24] sm:$0xf0] }
 0x323   :  { %v8560_v45 = vld [vmem:[#allocation6 + $0xc9c] sm:$0xf]  ;;  %v6876_v56 = vor.u32 %v8496_v34, %v6873_v43  ;;  %4128 = vmatpush.bf16.msrb.mxu0 %v6620_v53  ;;  %v7663_v34 = vld [vmem:[#allocation9 + $0xe0] sm:$0xf]  ;;  %v8698_v43 = vld [vmem:[#allocation9 + $0xe4] sm:$0xf0]  ;;  %v7600_v53 = vor.u32 %v8682_v33, %v7599_v32 }
 0x324   :  { %v7129_v48 = vld [vmem:[#allocation6 + $0xcb8] sm:$0xf0]  ;;  %v7664_v54 = vor.u32 %v8698_v43, %v7663_v34  ;;  %v7695_v32 = vld [vmem:[#allocation9 + $0x120] sm:$0xf]  ;;  %v8706_v33 = vld [vmem:[#allocation9 + $0x124] sm:$0xf0]  ;;  %v9413_v34 = vpop.f32.mrf.mxu3 }
 0x325   :  { %v8624_v51 = vld [vmem:[#allocation6 + $0xe9c] sm:$0xf]  ;;  %v7132_v57 = vor.u32 %v8560_v45, %v7129_v48  ;;  %4141 = vmatpush.bf16.msrb.mxu1 %v6876_v56  ;;  %v7727_v45 = vld [vmem:[#allocation9 + $0x160] sm:$0xf]  ;;  %v8714_v48 = vld [vmem:[#allocation9 + $0x164] sm:$0xf0] }
 0x326   :  { %v7385_v52 = vld [vmem:[#allocation6 + $0xeb8] sm:$0xf0]  ;;  %v7728_v56 = vor.u32 %v8714_v48, %v7727_v45  ;;  %v8722_v43 = vld [vmem:[#allocation9 + $0x1a4] sm:$0xf0]  ;;  %v9415_v45 = vld [vmem:[#allocation8] sm:$0xff]  ;;  %v7568_v48 = vor.u32 %v8674_v29, %v7567_v28 }
 0x327   :  { %v8424_v58 = vld [vmem:[#allocation6 + $0x85c] sm:$0xf]  ;;  %v7388_v62 = vor.u32 %v8624_v51, %v7385_v52  ;;  %4154 = vmatpush.bf16.msrb.mxu2 %v7132_v57  ;;  %v7791_v51 = vld [vmem:[#allocation9 + $0x1e0] sm:$0xf]  ;;  %v8730_v52 = vld [vmem:[#allocation9 + $0x1e4] sm:$0xf0] }
 0x328   :  { %v6585_v59 = vld [vmem:[#allocation6 + $0x878] sm:$0xf0]  ;;  %v7591_v57 = vld [vmem:[#allocation9 + $0x50] sm:$0xf] }
 0x329   :  { %v8488_v60 = vld [vmem:[#allocation6 + $0xa5c] sm:$0xf]  ;;  %v6588_v5 = vor.u32 %v8424_v58, %v6585_v59  ;;  %4167 = vmatpush.bf16.msrb.mxu3 %v7388_v62  ;;  %v8680_v58 = vld [vmem:[#allocation9 + $0x54] sm:$0xf0]  ;;  %v7655_v59 = vld [vmem:[#allocation9 + $0xd0] sm:$0xf] }
 0x32a   :  { %v6841_v63 = vld [vmem:[#allocation6 + $0xa78] sm:$0xf0]  ;;  %v7719_v62 = vld [vmem:[#allocation9 + $0x150] sm:$0xf] }
 0x32b   :  { %v8552_v0 = vld [vmem:[#allocation6 + $0xc5c] sm:$0xf]  ;;  %v6844_v10 = vor.u32 %v8488_v60, %v6841_v63  ;;  %4129 = vmatpush.bf16.msrb.mxu0 %v6588_v5  ;;  %v7792_v60 = vor.u32 %v8730_v52, %v7791_v51  ;;  %v8712_v63 = vld [vmem:[#allocation9 + $0x154] sm:$0xf0]  ;;  %v3926_v51 = vpop.f32.mrf.mxu0 }
 0x32c   :  { %v7097_v1 = vld [vmem:[#allocation6 + $0xc78] sm:$0xf0]  ;;  %v7720_v5 = vor.u32 %v8712_v63, %v7719_v62  ;;  %v8704_v62 = vld [vmem:[#allocation9 + $0x114] sm:$0xf0]  ;;  %v207_v63 = vperm.slane %v9415_v45, 0 }
 0x32d   :  { %v8616_v2 = vld [vmem:[#allocation6 + $0xe5c] sm:$0xf]  ;;  %v7100_v11 = vor.u32 %v8552_v0, %v7097_v1  ;;  %4142 = vmatpush.bf16.msrb.mxu1 %v6844_v10  ;;  %v7783_v0 = vld [vmem:[#allocation9 + $0x1d0] sm:$0xf]  ;;  %v8728_v1 = vld [vmem:[#allocation9 + $0x1d4] sm:$0xf0] }
 0x32e   :  { %v7353_v3 = vld [vmem:[#allocation6 + $0xe78] sm:$0xf0]  ;;  %v7784_v10 = vor.u32 %v8728_v1, %v7783_v0  ;;  %v208_v0 = vperm.slane %v9415_v45, 1  ;;  %v7751_v1 = vld [vmem:[#allocation9 + $0x190] sm:$0xf] }
 0x32f   :  { %v8416_v7 = vld [vmem:[#allocation6 + $0x81c] sm:$0xf]  ;;  %v7356_v15 = vor.u32 %v8616_v2, %v7353_v3  ;;  %4155 = vmatpush.bf16.msrb.mxu2 %v7100_v11  ;;  %v7592_v2 = vor.u32 %v8680_v58, %v7591_v57  ;;  %v7656_v3 = vor.u32 %v8696_v61, %v7655_v59  ;;  %v8694_v11 = vld [vmem:[#allocation9 + $0xc4] sm:$0xf0]  ;;  %v7623_v57 = vld [vmem:[#allocation9 + $0x90] sm:$0xf]  ;;  %v3939_v58 = vpop.f32.mrf.mxu1 }
 0x330   :  { %v6553_v9 = vld [vmem:[#allocation6 + $0x838] sm:$0xf0]  ;;  %v7687_v61 = vld [vmem:[#allocation9 + $0x110] sm:$0xf]  ;;  %v4176_v28 = vadd.f32 %v9352_v37, %v208_v0  ;;  %v7983_v51 = vld [vmem:[#allocation9 + $0x360] sm:$0xf] }
 0x331   :  { %v8480_v4 = vld [vmem:[#allocation6 + $0xa1c] sm:$0xf]  ;;  %v6556_v22 = vor.u32 %v8416_v7, %v6553_v9  ;;  %4168 = vmatpush.bf16.msrb.mxu3 %v7356_v15  ;;  %v7583_v7 = vld [vmem:[#allocation9 + $0x40] sm:$0xf]  ;;  %v7847_v58 = vld [vmem:[#allocation9 + $0x250] sm:$0xf] }
 0x332   :  { %v6809_v12 = vld [vmem:[#allocation6 + $0xa38] sm:$0xf0]  ;;  %v7647_v9 = vld [vmem:[#allocation9 + $0xc0] sm:$0xf]  ;;  %v9427_v37 = vpack.c.bf16 %v4176_v28, %v4176_v28  ;;  %v8776_v0 = vld [vmem:[#allocation9 + $0x354] sm:$0xf0] }
 0x333   :  { %v8544_v13 = vld [vmem:[#allocation6 + $0xc1c] sm:$0xf]  ;;  %v6812_v26 = vor.u32 %v8480_v4, %v6809_v12  ;;  %4130 = vmatpush.bf16.msrb.mxu0 %v6556_v22  ;;  %v7711_v4 = vld [vmem:[#allocation9 + $0x140] sm:$0xf]  ;;  %v8708_v22 = vld [vmem:[#allocation9 + $0x134] sm:$0xf0] }
 0x334   :  { %v7065_v16 = vld [vmem:[#allocation6 + $0xc38] sm:$0xf0]  ;;  %v7775_v12 = vld [vmem:[#allocation9 + $0x1c0] sm:$0xf] }
 0x335   :  { %v8608_v20 = vld [vmem:[#allocation6 + $0xe1c] sm:$0xf]  ;;  %v7068_v27 = vor.u32 %v8544_v13, %v7065_v16  ;;  %4143 = vmatpush.bf16.msrb.mxu1 %v6812_v26  ;;  %v7575_v16 = vld [vmem:[#allocation9 + $0x30] sm:$0xf]  ;;  %v7951_v28 = vld [vmem:[#allocation9 + $0x320] sm:$0xf] }
 0x336   :  { %v7321_v6 = vld [vmem:[#allocation6 + $0xe38] sm:$0xf0]  ;;  %4131 = vmatmul.bf16.vlgmr.msrb.gmra.mxu0 %v9310_v41  ;;  %v8678_v41 = vld [vmem:[#allocation9 + $0x44] sm:$0xf0] }
 0x337   :  { %v7324_v40 = vor.u32 %v8608_v20, %v7321_v6  ;;  %4156 = vmatpush.bf16.msrb.mxu2 %v7068_v27  ;;  %4984 = vmatpush.bf16.msra.mxu0 %v7608_v39  ;;  %v7584_v13 = vor.u32 %v8678_v41, %v7583_v7  ;;  %v8676_v20 = vld [vmem:[#allocation9 + $0x34] sm:$0xf0]  ;;  %v7639_v6 = vld [vmem:[#allocation9 + $0xb0] sm:$0xf]  ;;  %v7704_v27 = vor.u32 %v8708_v22, %v7703_v19  ;;  %v9411_v39 = vpop.f32.mrf.mxu2  ;;  %v7551_v41 = vld [vmem:[#allocation9] sm:$0xf] }
 0x338   :  { %4144 = vmatmul.bf16.vlgmr.msrb.gmra.mxu1 %v9314_v44  ;;  %v8710_v44 = vld [vmem:[#allocation9 + $0x144] sm:$0xf0]  ;;  %v7576_v25 = vor.u32 %v8676_v20, %v7575_v16  ;;  %v7640_v26 = vor.u32 %v8692_v18, %v7639_v6  ;;  %v3965_v20 = vpop.f32.mrf.mxu3  ;;  %v7863_v6 = vld [vmem:[#allocation9 + $0x270] sm:$0xf]  ;;  %v8764_v22 = vld [vmem:[#allocation9 + $0x2f4] sm:$0xf0] }
 0x339   :  { %4169 = vmatpush.bf16.msrb.mxu3 %v7324_v40  ;;  %4997 = vmatpush.bf16.msra.mxu1 %v7672_v30  ;;  %v7712_v15 = vor.u32 %v8710_v44, %v7711_v4  ;;  %v7631_v40 = vld [vmem:[#allocation9 + $0xa0] sm:$0xf]  ;;  %v7768_v30 = vor.u32 %v8724_v24, %v7767_v23  ;;  %v8686_v44 = vld [vmem:[#allocation9 + $0x84] sm:$0xf0]  ;;  %v7927_v18 = vld [vmem:[#allocation9 + $0x2f0] sm:$0xf] }
 0x33a   :  { %4157 = vmatmul.bf16.vlgmr.msrb.gmra.mxu2 %v9308_v38  ;;  %v8726_v38 = vld [vmem:[#allocation9 + $0x1c4] sm:$0xf0]  ;;  %v7615_v4 = vld [vmem:[#allocation9 + $0x80] sm:$0xf]  ;;  %v7991_v23 = vld [vmem:[#allocation9 + $0x370] sm:$0xf] }
 0x33b   :  { %5010 = vmatpush.bf16.msra.mxu2 %v7736_v31  ;;  %4985 = vmatpush.bf16.msra.mxu0 %v7600_v53  ;;  %v7776_v21 = vor.u32 %v8726_v38, %v7775_v12  ;;  %v8690_v31 = vld [vmem:[#allocation9 + $0xa4] sm:$0xf0]  ;;  %v7696_v53 = vor.u32 %v8706_v33, %v7695_v32  ;;  %v7679_v12 = vld [vmem:[#allocation9 + $0x100] sm:$0xf]  ;;  %v8780_v24 = vld [vmem:[#allocation9 + $0x374] sm:$0xf0]  ;;  %v7928_v32 = vor.u32 %v8764_v22, %v7927_v18 }
 0x33c   :  { %4170 = vmatmul.bf16.vlgmr.msrb.gmra.mxu3 %v9312_v42  ;;  %v7648_v42 = vor.u32 %v8694_v11, %v7647_v9  ;;  %v7632_v52 = vor.u32 %v8690_v31, %v7631_v40  ;;  %v8670_v9 = vld [vmem:[#allocation9 + $0x4] sm:$0xf0]  ;;  %v7688_v11 = vor.u32 %v8704_v62, %v7687_v61  ;;  %v7992_v33 = vor.u32 %v8780_v24, %v7991_v23  ;;  %v8760_v62 = vld [vmem:[#allocation9 + $0x2d4] sm:$0xf0]  ;;  %v7823_v22 = vld [vmem:[#allocation9 + $0x220] sm:$0xf] }
 0x33d   :  { %5023 = vmatpush.bf16.msra.mxu3 %v7800_v50  ;;  %4998 = vmatpush.bf16.msra.mxu1 %v7664_v54  ;;  %v7759_v50 = vld [vmem:[#allocation9 + $0x1a0] sm:$0xf]  ;;  %v7559_v54 = vld [vmem:[#allocation9 + $0x10] sm:$0xf]  ;;  %v8718_v16 = vld [vmem:[#allocation9 + $0x184] sm:$0xf0]  ;;  %v7552_v19 = vor.u32 %v8670_v9, %v7551_v41  ;;  %v3899_v61 = vadd.f32 %v9399_v8, %v9397_v35 }
 0x33e   :  { %v7760_v59 = vor.u32 %v8722_v43, %v7759_v50  ;;  %v7855_v50 = vld [vmem:[#allocation9 + $0x260] sm:$0xf]  ;;  %v8746_v43 = vld [vmem:[#allocation9 + $0x264] sm:$0xf0]  ;;  %v8756_v20 = vld [vmem:[#allocation9 + $0x2b4] sm:$0xf0] }
 0x33f   :  { %5011 = vmatpush.bf16.msra.mxu2 %v7728_v56  ;;  %4986 = vmatpush.bf16.msra.mxu0 %v7592_v2  ;;  %v8672_v56 = vld [vmem:[#allocation9 + $0x14] sm:$0xf0]  ;;  %v3952_v38 = vpop.f32.mrf.mxu2  ;;  %v7903_v35 = vld [vmem:[#allocation9 + $0x2c0] sm:$0xf]  ;;  %v3912_v8 = vadd.f32 %v9401_v49, %v3899_v61  ;;  %v8758_v41 = vld [vmem:[#allocation9 + $0x2c4] sm:$0xf0] }
 0x340   :  { %v8720_v2 = vld [vmem:[#allocation9 + $0x194] sm:$0xf0]  ;;  %v7560_v7 = vor.u32 %v8672_v56, %v7559_v54  ;;  %v7967_v9 = vld [vmem:[#allocation9 + $0x340] sm:$0xf]  ;;  %v7831_v38 = vld [vmem:[#allocation9 + $0x230] sm:$0xf] }
 0x341   :  { %5024 = vmatpush.bf16.msra.mxu3 %v7792_v60  ;;  %4999 = vmatpush.bf16.msra.mxu1 %v7656_v3  ;;  %v8688_v60 = vld [vmem:[#allocation9 + $0x94] sm:$0xf0]  ;;  %v209_v3 = vperm.slane %v9415_v45, 2  ;;  %v7959_v49 = vld [vmem:[#allocation9 + $0x330] sm:$0xf] }
 0x342   :  { %v8738_v23 = vld [vmem:[#allocation9 + $0x224] sm:$0xf0]  ;;  %v7887_v24 = vld [vmem:[#allocation9 + $0x2a0] sm:$0xf] }
 0x343   :  { %5012 = vmatpush.bf16.msra.mxu2 %v7720_v5  ;;  %4987 = vmatpush.bf16.msra.mxu0 %v7584_v13  ;;  %v210_v5 = vperm.slane %v9415_v45, 3  ;;  %v7752_v13 = vor.u32 %v8720_v2, %v7751_v1  ;;  %v4177_v29 = vadd.f32 %v9365_v36, %v209_v3 }
 0x345   :  { %5025 = vmatpush.bf16.msra.mxu3 %v7784_v10  ;;  %5000 = vmatpush.bf16.msra.mxu1 %v7648_v42  ;;  %v7624_v10 = vor.u32 %v8688_v60, %v7623_v57  ;;  %v8702_v42 = vld [vmem:[#allocation9 + $0x104] sm:$0xf0]  ;;  %v4178_v31 = vadd.f32 %v9378_v46, %v210_v5  ;;  %v9429_v36 = vpack.c.bf16 %v4177_v29, %v4177_v29  ;;  %v7911_v60 = vld [vmem:[#allocation9 + $0x2d0] sm:$0xf]  ;;  %v7839_v5 = vld [vmem:[#allocation9 + $0x240] sm:$0xf] }
 0x346   :  { %v7856_v46 = vor.u32 %v8746_v43, %v7855_v50  ;;  %v7912_v2 = vor.u32 %v8760_v62, %v7911_v60  ;;  %v8770_v29 = vld [vmem:[#allocation9 + $0x324] sm:$0xf0]  ;;  %v8736_v50 = vld [vmem:[#allocation9 + $0x214] sm:$0xf0]  ;;  %v7879_v43 = vld [vmem:[#allocation9 + $0x290] sm:$0xf] }
 0x347   :  { %5013 = vmatpush.bf16.msra.mxu2 %v7712_v15  ;;  %4988 = vmatpush.bf16.msra.mxu0 %v7576_v25  ;;  %v7743_v15 = vld [vmem:[#allocation9 + $0x180] sm:$0xf]  ;;  %v4175_v25 = vadd.f32 %v9339_v47, %v207_v63  ;;  %v8762_v47 = vld [vmem:[#allocation9 + $0x2e4] sm:$0xf0]  ;;  %v9431_v54 = vpack.c.bf16 %v4178_v31, %v4178_v31  ;;  %v7975_v63 = vld [vmem:[#allocation9 + $0x350] sm:$0xf] }
 0x348   :  { %v7744_v40 = vor.u32 %v8718_v16, %v7743_v15  ;;  %v7976_v3 = vor.u32 %v8776_v0, %v7975_v63  ;;  %v9442_v15 = vpop.f32.mrf.mxu1  ;;  %v3925_v16 = vadd.f32 %v9407_v14, %v3912_v8  ;;  %v9448_v14 = vpop.f32.mrf.mxu3  ;;  %v7871_v60 = vld [vmem:[#allocation9 + $0x280] sm:$0xf]  ;;  %v8750_v63 = vld [vmem:[#allocation9 + $0x284] sm:$0xf0]  ;;  %v7673_v8 = vld [vmem:[#allocation9 + $0xf8] sm:$0xf0] }
 0x349   :  { %5026 = vmatpush.bf16.msra.mxu3 %v7776_v21  ;;  %5001 = vmatpush.bf16.msra.mxu1 %v7640_v26  ;;  %v8748_v21 = vld [vmem:[#allocation9 + $0x274] sm:$0xf0]  ;;  %v7616_v26 = vor.u32 %v8686_v44, %v7615_v4  ;;  %v9440_v4 = vpop.f32.mrf.mxu0  ;;  %v7904_v44 = vor.u32 %v8758_v41, %v7903_v35  ;;  %v7935_v0 = vld [vmem:[#allocation9 + $0x300] sm:$0xf]  ;;  %v8055_v41 = vld [vmem:[#allocation9 + $0x3f0] sm:$0xf] }
 0x34b   :  { %5014 = vmatpush.bf16.msra.mxu2 %v7704_v27  ;;  %4989 = vmatpush.bf16.msra.mxu0 %v7568_v48  ;;  %v7680_v27 = vor.u32 %v8702_v42, %v7679_v12  ;;  %v7919_v48 = vld [vmem:[#allocation9 + $0x2e0] sm:$0xf]  ;;  %v7895_v42 = vld [vmem:[#allocation9 + $0x2b0] sm:$0xf] }
 0x34c   :  { %v7920_v56 = vor.u32 %v8762_v47, %v7919_v48  ;;  %v7896_v18 = vor.u32 %v8756_v20, %v7895_v42 }
 0x34d   :  { %5027 = vmatpush.bf16.msra.mxu3 %v7768_v30  ;;  %5002 = vmatpush.bf16.msra.mxu1 %v7632_v52  ;;  %v7864_v30 = vor.u32 %v8748_v21, %v7863_v6  ;;  %v8778_v52 = vld [vmem:[#allocation9 + $0x364] sm:$0xf0]  ;;  %v8772_v6 = vld [vmem:[#allocation9 + $0x334] sm:$0xf0] }
 0x34e   :  { %v7984_v57 = vor.u32 %v8778_v52, %v7983_v51  ;;  %v8752_v51 = vld [vmem:[#allocation9 + $0x294] sm:$0xf0] }
 0x34f   :  { %5015 = vmatpush.bf16.msra.mxu2 %v7696_v53  ;;  %4990 = vmatpush.bf16.msra.mxu0 %v7560_v7  ;;  %v9425_v53 = vpack.c.bf16 %v4175_v25, %v4175_v25  ;;  %v8742_v7 = vld [vmem:[#allocation9 + $0x244] sm:$0xf0]  ;;  %v9445_v25 = vpop.f32.mrf.mxu2  ;;  %v8768_v52 = vld [vmem:[#allocation9 + $0x314] sm:$0xf0]  ;;  %v7880_v61 = vor.u32 %v8752_v51, %v7879_v43  ;;  %v8039_v43 = vld [vmem:[#allocation9 + $0x3d0] sm:$0xf] }
 0x350   :  { %v3991_v48 = vpop.f32.mrf.mxu1  ;;  %v4017_v35 = vpop.f32.mrf.mxu3  ;;  %v7721_v51 = vld [vmem:[#allocation9 + $0x158] sm:$0xf0] }
 0x351   :  { %5028 = vmatpush.bf16.msra.mxu3 %v7760_v59  ;;  %5003 = vmatpush.bf16.msra.mxu1 %v7624_v10  ;;  %v8744_v59 = vld [vmem:[#allocation9 + $0x254] sm:$0xf0]  ;;  %v8774_v10 = vld [vmem:[#allocation9 + $0x344] sm:$0xf0]  ;;  %v8691_v35 = vld [vmem:[#allocation9 + $0xb4] sm:$0xf] }
 0x352   :  { %v7848_v1 = vor.u32 %v8744_v59, %v7847_v58  ;;  %v7968_v12 = vor.u32 %v8774_v10, %v7967_v9  ;;  %v7807_v58 = vld [vmem:[#allocation9 + $0x200] sm:$0xf]  ;;  %v8734_v59 = vld [vmem:[#allocation9 + $0x204] sm:$0xf0]  ;;  %v8796_v9 = vld [vmem:[#allocation9 + $0x3f4] sm:$0xf0] }
 0x353   :  { %5016 = vmatpush.bf16.msra.mxu2 %v7688_v11  ;;  %4991 = vmatpush.bf16.msra.mxu0 %v7552_v19  ;;  %v7840_v11 = vor.u32 %v8742_v7, %v7839_v5  ;;  %v7960_v19 = vor.u32 %v8772_v6, %v7959_v49  ;;  %v7609_v5 = vld [vmem:[#allocation9 + $0x78] sm:$0xf0]  ;;  %v8699_v7 = vld [vmem:[#allocation9 + $0xf4] sm:$0xf]  ;;  %v7808_v10 = vor.u32 %v8734_v59, %v7807_v58  ;;  %v8681_v49 = vld [vmem:[#allocation9 + $0x64] sm:$0xf] }
 0x354   :  { %v7676_v20 = vor.u32 %v8699_v7, %v7673_v8  ;;  %v7601_v6 = vld [vmem:[#allocation9 + $0x68] sm:$0xf0]  ;;  %v8792_v48 = vld [vmem:[#allocation9 + $0x3d4] sm:$0xf0]  ;;  %v8693_v58 = vld [vmem:[#allocation9 + $0xc4] sm:$0xf] }
 0x355   :  { %5029 = vmatpush.bf16.msra.mxu3 %v7752_v13  ;;  %5004 = vmatpush.bf16.msra.mxu1 %v7616_v26  ;;  %v8740_v13 = vld [vmem:[#allocation9 + $0x234] sm:$0xf0]  ;;  %v3938_v26 = vadd.f32 %v9409_v17, %v3925_v16  ;;  %v7943_v17 = vld [vmem:[#allocation9 + $0x310] sm:$0xf]  ;;  %v7577_v7 = vld [vmem:[#allocation9 + $0x38] sm:$0xf0] }
 0x356   :  { %4992 = vmatmul.bf16.vlgmr.msra.gmra.mxu0 %v9425_v53  ;;  %v7832_v21 = vor.u32 %v8740_v13, %v7831_v38  ;;  %v7944_v62 = vor.u32 %v8768_v52, %v7943_v17  ;;  %v7872_v13 = vor.u32 %v8750_v63, %v7871_v60  ;;  %v8040_v17 = vor.u32 %v8792_v48, %v8039_v43  ;;  %v7649_v60 = vld [vmem:[#allocation9 + $0xc8] sm:$0xf0]  ;;  %v8709_v63 = vld [vmem:[#allocation9 + $0x144] sm:$0xf]  ;;  %v7625_v48 = vld [vmem:[#allocation9 + $0x98] sm:$0xf0] }
 0x357   :  { %5017 = vmatpush.bf16.msra.mxu2 %v7680_v27  ;;  %5036 = vmatpush.bf16.msrb.mxu0 %v7864_v30  ;;  %v8754_v27 = vld [vmem:[#allocation9 + $0x2a4] sm:$0xf0]  ;;  %v3978_v30 = vpop.f32.mrf.mxu0  ;;  %v3951_v47 = vadd.f32 %v9411_v39, %v3938_v26  ;;  %v4004_v39 = vpop.f32.mrf.mxu2 }
 0x358   :  { %5005 = vmatmul.bf16.vlgmr.msra.gmra.mxu1 %v9427_v37  ;;  %v7888_v31 = vor.u32 %v8754_v27, %v7887_v24  ;;  %v8713_v24 = vld [vmem:[#allocation9 + $0x164] sm:$0xf]  ;;  %v8794_v26 = vld [vmem:[#allocation9 + $0x3e4] sm:$0xf0] }
 0x359   :  { %5030 = vmatpush.bf16.msra.mxu3 %v7744_v40  ;;  %5049 = vmatpush.bf16.msrb.mxu1 %v7928_v32  ;;  %v7824_v40 = vor.u32 %v8738_v23, %v7823_v22  ;;  %v7952_v32 = vor.u32 %v8770_v29, %v7951_v28  ;;  %v7665_v22 = vld [vmem:[#allocation9 + $0xe8] sm:$0xf0]  ;;  %v8047_v23 = vld [vmem:[#allocation9 + $0x3e0] sm:$0xf] }
 0x35a   :  { %5018 = vmatmul.bf16.vlgmr.msra.gmra.mxu2 %v9429_v36  ;;  %v8048_v28 = vor.u32 %v8794_v26, %v8047_v23  ;;  %v8705_v26 = vld [vmem:[#allocation9 + $0x124] sm:$0xf] }
 0x35b   :  { %5062 = vmatpush.bf16.msrb.mxu2 %v7992_v33  ;;  %5037 = vmatpush.bf16.msrb.mxu0 %v7856_v46  ;;  %v7815_v33 = vld [vmem:[#allocation9 + $0x210] sm:$0xf]  ;;  %v211_v46 = vperm.slane %v9415_v45, 4 }
 0x35c   :  { %5031 = vmatmul.bf16.vlgmr.msra.gmra.mxu3 %v9431_v54 }
 0x35d   :  { %5050 = vmatpush.bf16.msrb.mxu1 %v7920_v56  ;;  %v212_v56 = vperm.slane %v9415_v45, 5  ;;  %v4179_v38 = vadd.f32 %v9391_v55, %v211_v46  ;;  %v7729_v55 = vld [vmem:[#allocation9 + $0x168] sm:$0xf0] }
 0x35f   :  { %5063 = vmatpush.bf16.msrb.mxu2 %v7984_v57  ;;  %5038 = vmatpush.bf16.msrb.mxu0 %v7848_v1  ;;  %v7816_v57 = vor.u32 %v8736_v50, %v7815_v33  ;;  %v8766_v1 = vld [vmem:[#allocation9 + $0x304] sm:$0xf0]  ;;  %v9457_v27 = vpack.c.bf16 %v4179_v38, %v4179_v38  ;;  %v7732_v33 = vor.u32 %v8713_v24, %v7729_v55  ;;  %v7657_v50 = vld [vmem:[#allocation9 + $0xd8] sm:$0xf0]  ;;  %v213_v24 = vperm.slane %v9415_v45, 6 }
 0x360   :  { %v7936_v42 = vor.u32 %v8766_v1, %v7935_v0  ;;  %v7713_v0 = vld [vmem:[#allocation9 + $0x148] sm:$0xf0]  ;;  %v4067_v55 = vpop.f32.mrf.mxu3 }
 0x361   :  { %5051 = vmatpush.bf16.msrb.mxu1 %v7912_v2  ;;  %v3964_v2 = vadd.f32 %v9413_v34, %v3951_v47  ;;  %v8711_v47 = vld [vmem:[#allocation9 + $0x154] sm:$0xf]  ;;  %v7716_v8 = vor.u32 %v8709_v63, %v7713_v0  ;;  %v8701_v0 = vld [vmem:[#allocation9 + $0x104] sm:$0xf] }
 0x362   :  { %v7724_v59 = vor.u32 %v8711_v47, %v7721_v51  ;;  %v8007_v51 = vld [vmem:[#allocation9 + $0x390] sm:$0xf] }
 0x363   :  { %5064 = vmatpush.bf16.msrb.mxu2 %v7976_v3  ;;  %5039 = vmatpush.bf16.msrb.mxu0 %v7840_v11  ;;  %v8683_v3 = vld [vmem:[#allocation9 + $0x74] sm:$0xf]  ;;  %v4180_v16 = vadd.f32 %v3964_v2, %v212_v56  ;;  %v8677_v56 = vld [vmem:[#allocation9 + $0x44] sm:$0xf]  ;;  %v7652_v2 = vor.u32 %v8693_v58, %v7649_v60  ;;  %v7617_v60 = vld [vmem:[#allocation9 + $0x88] sm:$0xf0] }
 0x364   :  { %v8715_v11 = vld [vmem:[#allocation9 + $0x174] sm:$0xf]  ;;  %v7612_v34 = vor.u32 %v8683_v3, %v7609_v5  ;;  %v4028_v3 = vpop.f32.mrf.mxu0  ;;  %v8669_v58 = vld [vmem:[#allocation9 + $0x4] sm:$0xf] }
 0x365   :  { %5052 = vmatpush.bf16.msrb.mxu1 %v7904_v44  ;;  %v7737_v44 = vld [vmem:[#allocation9 + $0x178] sm:$0xf0]  ;;  %v9459_v29 = vpack.c.bf16 %v4180_v16, %v4180_v16  ;;  %v8675_v5 = vld [vmem:[#allocation9 + $0x34] sm:$0xf] }
 0x367   :  { %5065 = vmatpush.bf16.msrb.mxu2 %v7968_v12  ;;  %5040 = vmatpush.bf16.msrb.mxu0 %v7832_v21  ;;  %v8056_v12 = vor.u32 %v8796_v9, %v8055_v41  ;;  %v3990_v21 = vadd.f32 %v9442_v15, %v9440_v4  ;;  %v8679_v4 = vld [vmem:[#allocation9 + $0x54] sm:$0xf]  ;;  %v7593_v15 = vld [vmem:[#allocation9 + $0x58] sm:$0xf0]  ;;  %v4041_v41 = vpop.f32.mrf.mxu1 }
 0x368   :  { %v7596_v52 = vor.u32 %v8679_v4, %v7593_v15  ;;  %v7641_v9 = vld [vmem:[#allocation9 + $0xb8] sm:$0xf0] }
 0x369   :  { %5053 = vmatpush.bf16.msrb.mxu1 %v7896_v18  ;;  %5075 = vmatpush.bf16.msrb.mxu3 %v8056_v12  ;;  %v7740_v18 = vor.u32 %v8715_v11, %v7737_v44  ;;  %v8788_v11 = vld [vmem:[#allocation9 + $0x3b4] sm:$0xf0]  ;;  %v8707_v44 = vld [vmem:[#allocation9 + $0x134] sm:$0xf]  ;;  %v7705_v12 = vld [vmem:[#allocation9 + $0x138] sm:$0xf0]  ;;  %v7644_v16 = vor.u32 %v8691_v35, %v7641_v9 }
 0x36a   :  { %v8782_v35 = vld [vmem:[#allocation9 + $0x384] sm:$0xf0]  ;;  %v8731_v9 = vld [vmem:[#allocation9 + $0x1f4] sm:$0xf] }
 0x36b   :  { %5066 = vmatpush.bf16.msrb.mxu2 %v7960_v19  ;;  %5041 = vmatpush.bf16.msrb.mxu0 %v7824_v40  ;;  %v8697_v19 = vld [vmem:[#allocation9 + $0xe4] sm:$0xf]  ;;  %v7604_v40 = vor.u32 %v8681_v49, %v7601_v6  ;;  %v7708_v6 = vor.u32 %v8707_v44, %v7705_v12  ;;  %v8779_v44 = vld [vmem:[#allocation9 + $0x374] sm:$0xf]  ;;  %v7993_v12 = vld [vmem:[#allocation9 + $0x378] sm:$0xf0] }
 0x36c   :  { %v7668_v30 = vor.u32 %v8697_v19, %v7665_v22  ;;  %v8689_v49 = vld [vmem:[#allocation9 + $0xa4] sm:$0xf]  ;;  %v8015_v19 = vld [vmem:[#allocation9 + $0x3a0] sm:$0xf]  ;;  %v8786_v22 = vld [vmem:[#allocation9 + $0x3a4] sm:$0xf0] }
 0x36d   :  { %5054 = vmatpush.bf16.msrb.mxu1 %v7888_v31  ;;  %v8695_v31 = vld [vmem:[#allocation9 + $0xd4] sm:$0xf]  ;;  %5076 = vmatpush.bf16.msrb.mxu3 %v8048_v28  ;;  %v7697_v28 = vld [vmem:[#allocation9 + $0x128] sm:$0xf0] }
 0x36e   :  { %v7660_v46 = vor.u32 %v8695_v31, %v7657_v50  ;;  %v8671_v31 = vld [vmem:[#allocation9 + $0x14] sm:$0xf]  ;;  %v4030_v50 = vpop.f32.mrf.mxu0  ;;  %v7700_v43 = vor.u32 %v8705_v26, %v7697_v28 }
 0x36f   :  { %5067 = vmatpush.bf16.msrb.mxu2 %v7952_v32  ;;  %5042 = vmatpush.bf16.msrb.mxu0 %v7816_v57  ;;  %v4003_v32 = vadd.f32 %v9445_v25, %v3990_v21  ;;  %v7585_v57 = vld [vmem:[#allocation9 + $0x48] sm:$0xf0]  ;;  %v4054_v21 = vpop.f32.mrf.mxu2  ;;  %v4043_v47 = vpop.f32.mrf.mxu1  ;;  %v7913_v50 = vld [vmem:[#allocation9 + $0x2d8] sm:$0xf0] }
 0x370   :  { %v7588_v39 = vor.u32 %v8677_v56, %v7585_v57  ;;  %v7689_v56 = vld [vmem:[#allocation9 + $0x118] sm:$0xf0] }
 0x371   :  { %5055 = vmatpush.bf16.msrb.mxu1 %v7880_v61  ;;  %v4016_v25 = vadd.f32 %v9448_v14, %v4003_v32  ;;  %v8031_v61 = vld [vmem:[#allocation9 + $0x3c0] sm:$0xf]  ;;  %5077 = vmatpush.bf16.msrb.mxu3 %v8040_v17  ;;  %v7561_v32 = vld [vmem:[#allocation9 + $0x18] sm:$0xf0]  ;;  %v8784_v17 = vld [vmem:[#allocation9 + $0x394] sm:$0xf0] }
 0x372   :  { %v8008_v57 = vor.u32 %v8784_v17, %v8007_v51  ;;  %v8725_v17 = vld [vmem:[#allocation9 + $0x1c4] sm:$0xf] }
 0x373   :  { %5068 = vmatpush.bf16.msrb.mxu2 %v7944_v62  ;;  %5043 = vmatpush.bf16.msrb.mxu0 %v7808_v10  ;;  %v8790_v62 = vld [vmem:[#allocation9 + $0x3c4] sm:$0xf0]  ;;  %v4029_v14 = vadd.f32 %v4028_v3, %v4016_v25  ;;  %v8023_v10 = vld [vmem:[#allocation9 + $0x3b0] sm:$0xf]  ;;  %v7553_v25 = vld [vmem:[#allocation9 + $0x8] sm:$0xf0] }
 0x374   :  { %v8032_v1 = vor.u32 %v8790_v62, %v8031_v61  ;;  %v8024_v38 = vor.u32 %v8788_v11, %v8023_v10  ;;  %v7564_v62 = vor.u32 %v8671_v31, %v7561_v32  ;;  %v7865_v3 = vld [vmem:[#allocation9 + $0x278] sm:$0xf0]  ;;  %v8743_v31 = vld [vmem:[#allocation9 + $0x254] sm:$0xf] }
 0x375   :  { %5056 = vmatpush.bf16.msrb.mxu1 %v7872_v13  ;;  %v4042_v13 = vadd.f32 %v4041_v41, %v4029_v14  ;;  %v4069_v14 = vpop.f32.mrf.mxu3  ;;  %v7801_v10 = vld [vmem:[#allocation9 + $0x1f8] sm:$0xf0] }
 0x376   :  { %5044 = vmatmul.bf16.vlgmr.msrb.gmra.mxu0 %v9457_v27  ;;  %5078 = vmatpush.bf16.msrb.mxu3 %v8032_v1  ;;  %v7681_v1 = vld [vmem:[#allocation9 + $0x108] sm:$0xf0]  ;;  %v7929_v11 = vld [vmem:[#allocation9 + $0x2f8] sm:$0xf0] }
 0x377   :  { %5069 = vmatpush.bf16.msrb.mxu2 %v7936_v42  ;;  %5088 = vmatpush.bf16.msra.mxu0 %v7612_v34  ;;  %v7580_v42 = vor.u32 %v8675_v5, %v7577_v7  ;;  %v8673_v34 = vld [vmem:[#allocation9 + $0x24] sm:$0xf]  ;;  %v4055_v23 = vadd.f32 %v4054_v21, %v4042_v13  ;;  %v4056_v5 = vpop.f32.mrf.mxu2  ;;  %v7999_v7 = vld [vmem:[#allocation9 + $0x380] sm:$0xf]  ;;  %v7556_v13 = vor.u32 %v8669_v58, %v7553_v25  ;;  %v7849_v32 = vld [vmem:[#allocation9 + $0x258] sm:$0xf0] }
 0x378   :  { %5057 = vmatmul.bf16.vlgmr.msrb.gmra.mxu1 %v9459_v29  ;;  %v8000_v41 = vor.u32 %v8782_v35, %v7999_v7  ;;  %v7996_v21 = vor.u32 %v8779_v44, %v7993_v12  ;;  %v7852_v51 = vor.u32 %v8743_v31, %v7849_v32  ;;  %v7841_v58 = vld [vmem:[#allocation9 + $0x248] sm:$0xf0]  ;;  %v8757_v25 = vld [vmem:[#allocation9 + $0x2c4] sm:$0xf]  ;;  %v8723_v5 = vld [vmem:[#allocation9 + $0x1b4] sm:$0xf] }
 0x379   :  { %5101 = vmatpush.bf16.msra.mxu1 %v7676_v20  ;;  %v7569_v20 = vld [vmem:[#allocation9 + $0x28] sm:$0xf0]  ;;  %v7769_v7 = vld [vmem:[#allocation9 + $0x1b8] sm:$0xf0] }
 0x37a   :  { %5079 = vmatpush.bf16.msrb.mxu3 %v8024_v38  ;;  %v7572_v4 = vor.u32 %v8673_v34, %v7569_v20  ;;  %v7804_v38 = vor.u32 %v8731_v9, %v7801_v10  ;;  %v8745_v20 = vld [vmem:[#allocation9 + $0x264] sm:$0xf]  ;;  %v7897_v35 = vld [vmem:[#allocation9 + $0x2b8] sm:$0xf0]  ;;  %v7772_v9 = vor.u32 %v8723_v5, %v7769_v7  ;;  %v7825_v44 = vld [vmem:[#allocation9 + $0x228] sm:$0xf0] }
 0x37b   :  { %5114 = vmatpush.bf16.msra.mxu2 %v7740_v18  ;;  %5089 = vmatpush.bf16.msra.mxu0 %v7604_v40  ;;  %v7633_v18 = vld [vmem:[#allocation9 + $0xa8] sm:$0xf0]  ;;  %v8016_v40 = vor.u32 %v8786_v22, %v8015_v19  ;;  %v8729_v19 = vld [vmem:[#allocation9 + $0x1e4] sm:$0xf]  ;;  %v7961_v14 = vld [vmem:[#allocation9 + $0x338] sm:$0xf0] }
 0x37c   :  { %v7636_v15 = vor.u32 %v8689_v49, %v7633_v18  ;;  %v7857_v49 = vld [vmem:[#allocation9 + $0x268] sm:$0xf0]  ;;  %v8761_v18 = vld [vmem:[#allocation9 + $0x2e4] sm:$0xf] }
 0x37d   :  { %5102 = vmatpush.bf16.msra.mxu1 %v7668_v30  ;;  %v4068_v30 = vadd.f32 %v4067_v55, %v4055_v23  ;;  %v7793_v22 = vld [vmem:[#allocation9 + $0x1e8] sm:$0xf0]  ;;  %v7860_v28 = vor.u32 %v8745_v20, %v7857_v49 }
 0x37e   :  { %5080 = vmatpush.bf16.msrb.mxu3 %v8016_v40  ;;  %v7921_v23 = vld [vmem:[#allocation9 + $0x2e8] sm:$0xf0]  ;;  %v7796_v26 = vor.u32 %v8729_v19, %v7793_v22  ;;  %v8727_v40 = vld [vmem:[#allocation9 + $0x1d4] sm:$0xf]  ;;  %v7817_v22 = vld [vmem:[#allocation9 + $0x218] sm:$0xf0] }
 0x37f   :  { %5115 = vmatpush.bf16.msra.mxu2 %v7732_v33  ;;  %5090 = vmatpush.bf16.msra.mxu0 %v7596_v52  ;;  %v8687_v33 = vld [vmem:[#allocation9 + $0x94] sm:$0xf]  ;;  %v4181_v52 = vadd.f32 %v4068_v30, %v213_v24  ;;  %v8777_v24 = vld [vmem:[#allocation9 + $0x364] sm:$0xf]  ;;  %v7985_v55 = vld [vmem:[#allocation9 + $0x368] sm:$0xf0]  ;;  %v4106_v49 = vpop.f32.mrf.mxu2 }
 0x380   :  { %v7628_v63 = vor.u32 %v8687_v33, %v7625_v48  ;;  %v7785_v30 = vld [vmem:[#allocation9 + $0x1d8] sm:$0xf0]  ;;  %v8759_v33 = vld [vmem:[#allocation9 + $0x2d4] sm:$0xf]  ;;  %v7953_v20 = vld [vmem:[#allocation9 + $0x328] sm:$0xf0] }
 0x381   :  { %5103 = vmatpush.bf16.msra.mxu1 %v7660_v46  ;;  %v8703_v46 = vld [vmem:[#allocation9 + $0x114] sm:$0xf]  ;;  %v9466_v61 = vpack.c.bf16 %v4181_v52, %v4181_v52  ;;  %v7977_v48 = vld [vmem:[#allocation9 + $0x358] sm:$0xf0]  ;;  %v7788_v47 = vor.u32 %v8727_v40, %v7785_v30  ;;  %v7777_v52 = vld [vmem:[#allocation9 + $0x1c8] sm:$0xf0] }
 0x382   :  { %5081 = vmatpush.bf16.msrb.mxu3 %v8008_v57  ;;  %v8741_v57 = vld [vmem:[#allocation9 + $0x244] sm:$0xf]  ;;  %v8735_v19 = vld [vmem:[#allocation9 + $0x214] sm:$0xf]  ;;  %v7753_v40 = vld [vmem:[#allocation9 + $0x198] sm:$0xf0] }
 0x383   :  { %5116 = vmatpush.bf16.msra.mxu2 %v7724_v59  ;;  %5091 = vmatpush.bf16.msra.mxu0 %v7588_v39  ;;  %v8685_v59 = vld [vmem:[#allocation9 + $0x84] sm:$0xf]  ;;  %v8747_v39 = vld [vmem:[#allocation9 + $0x274] sm:$0xf]  ;;  %v7881_v30 = vld [vmem:[#allocation9 + $0x298] sm:$0xf0] }
 0x384   :  { %5070 = vmatmul.bf16.vlgmr.msrb.gmra.mxu2 %v9466_v61  ;;  %v7868_v34 = vor.u32 %v8747_v39, %v7865_v3  ;;  %v9471_v3 = vpop.f32.mrf.mxu0 }
 0x385   :  { %5104 = vmatpush.bf16.msra.mxu1 %v7652_v2  ;;  %v7692_v2 = vor.u32 %v8703_v46, %v7689_v56  ;;  %v7916_v46 = vor.u32 %v8759_v33, %v7913_v50  ;;  %v7820_v33 = vor.u32 %v8735_v19, %v7817_v22  ;;  %v8733_v50 = vld [vmem:[#allocation9 + $0x204] sm:$0xf] }
 0x386   :  { %5082 = vmatpush.bf16.msrb.mxu3 %v8000_v41  ;;  %v9474_v41 = vpop.f32.mrf.mxu1 }
 0x387   :  { %5117 = vmatpush.bf16.msra.mxu2 %v7716_v8  ;;  %5092 = vmatpush.bf16.msra.mxu0 %v7580_v42  ;;  %v8763_v8 = vld [vmem:[#allocation9 + $0x2f4] sm:$0xf]  ;;  %v7620_v42 = vor.u32 %v8685_v59, %v7617_v60  ;;  %v7905_v59 = vld [vmem:[#allocation9 + $0x2c8] sm:$0xf0] }
 0x388   :  { %v7969_v60 = vld [vmem:[#allocation9 + $0x348] sm:$0xf0] }
 0x389   :  { %5105 = vmatpush.bf16.msra.mxu1 %v7644_v16  ;;  %v7684_v16 = vor.u32 %v8701_v0, %v7681_v1  ;;  %v7833_v0 = vld [vmem:[#allocation9 + $0x238] sm:$0xf0]  ;;  %v7908_v1 = vor.u32 %v8757_v25, %v7905_v59 }
 0x38a   :  { %5127 = vmatpush.bf16.msra.mxu3 %v7804_v38 }
 0x38b   :  { %5118 = vmatpush.bf16.msra.mxu2 %v7708_v6  ;;  %5093 = vmatpush.bf16.msra.mxu0 %v7572_v4  ;;  %v7932_v6 = vor.u32 %v8763_v8, %v7929_v11  ;;  %v7924_v4 = vor.u32 %v8761_v18, %v7921_v23  ;;  %v8771_v8 = vld [vmem:[#allocation9 + $0x334] sm:$0xf]  ;;  %v8737_v11 = vld [vmem:[#allocation9 + $0x224] sm:$0xf] }
 0x38c   :  { %v7964_v38 = vor.u32 %v8771_v8, %v7961_v14  ;;  %v7828_v18 = vor.u32 %v8737_v11, %v7825_v44  ;;  %v214_v8 = vperm.slane %v9415_v45, 7 }
 0x38d   :  { %5106 = vmatpush.bf16.msra.mxu1 %v7636_v15  ;;  %v7988_v15 = vor.u32 %v8777_v24, %v7985_v55  ;;  %v8751_v55 = vld [vmem:[#allocation9 + $0x294] sm:$0xf] }
 0x38e   :  { %5128 = vmatpush.bf16.msra.mxu3 %v7796_v26  ;;  %v4082_v26 = vpop.f32.mrf.mxu0  ;;  %v4095_v31 = vpop.f32.mrf.mxu1 }
 0x38f   :  { %5119 = vmatpush.bf16.msra.mxu2 %v7700_v43  ;;  %5094 = vmatpush.bf16.msra.mxu0 %v7564_v62  ;;  %v8775_v43 = vld [vmem:[#allocation9 + $0x354] sm:$0xf]  ;;  %v7844_v62 = vor.u32 %v8741_v57, %v7841_v58  ;;  %v7937_v57 = vld [vmem:[#allocation9 + $0x308] sm:$0xf0]  ;;  %v4108_v58 = vpop.f32.mrf.mxu2 }
 0x390   :  { %v7980_v56 = vor.u32 %v8775_v43, %v7977_v48  ;;  %v7809_v43 = vld [vmem:[#allocation9 + $0x208] sm:$0xf0]  ;;  %v7884_v48 = vor.u32 %v8751_v55, %v7881_v30  ;;  %v8785_v55 = vld [vmem:[#allocation9 + $0x3a4] sm:$0xf] }
 0x391   :  { %5107 = vmatpush.bf16.msra.mxu1 %v7628_v63  ;;  %v8739_v63 = vld [vmem:[#allocation9 + $0x234] sm:$0xf]  ;;  %v8017_v26 = vld [vmem:[#allocation9 + $0x3a8] sm:$0xf0] }
 0x392   :  { %5129 = vmatpush.bf16.msra.mxu3 %v7788_v47  ;;  %v7836_v10 = vor.u32 %v8739_v63, %v7833_v0  ;;  %v8020_v30 = vor.u32 %v8785_v55, %v8017_v26  ;;  %v8812_v26 = vld [vmem:[#allocation15 + $0x38] sm:$0xff] }
 0x393   :  { %5120 = vmatpush.bf16.msra.mxu2 %v7692_v2  ;;  %5095 = vmatpush.bf16.msra.mxu0 %v7556_v13  ;;  %v8755_v2 = vld [vmem:[#allocation9 + $0x2b4] sm:$0xf]  ;;  %v8753_v13 = vld [vmem:[#allocation9 + $0x2a4] sm:$0xf] }
 0x394   :  { %v7900_v12 = vor.u32 %v8755_v2, %v7897_v35 }
 0x395   :  { %5108 = vmatpush.bf16.msra.mxu1 %v7620_v42  ;;  %v8721_v42 = vld [vmem:[#allocation9 + $0x1a4] sm:$0xf] }
 0x396   :  { %5096 = vmatmul.bf16.vlgmr.msra.gmra.mxu0 %v9425_v53  ;;  %v8773_v53 = vld [vmem:[#allocation9 + $0x344] sm:$0xf] }
 0x397   :  { %5121 = vmatpush.bf16.msra.mxu2 %v7684_v16  ;;  %5140 = vmatpush.bf16.msrb.mxu0 %v7868_v34  ;;  %v7972_v39 = vor.u32 %v8773_v53, %v7969_v60  ;;  %v7761_v16 = vld [vmem:[#allocation9 + $0x1a8] sm:$0xf0]  ;;  %v7812_v53 = vor.u32 %v8733_v50, %v7809_v43 }
 0x398   :  { %5109 = vmatmul.bf16.vlgmr.msra.gmra.mxu1 %v9427_v37  ;;  %v7780_v37 = vor.u32 %v8725_v17, %v7777_v52  ;;  %v7889_v34 = vld [vmem:[#allocation9 + $0x2a8] sm:$0xf0]  ;;  %v8717_v17 = vld [vmem:[#allocation9 + $0x184] sm:$0xf] }
 0x399   :  { %5153 = vmatpush.bf16.msrb.mxu1 %v7932_v6  ;;  %v4119_v6 = vpop.f32.mrf.mxu3  ;;  %v7892_v23 = vor.u32 %v8753_v13, %v7889_v34  ;;  %v7745_v52 = vld [vmem:[#allocation9 + $0x188] sm:$0xf0]  ;;  %v8041_v34 = vld [vmem:[#allocation9 + $0x3d8] sm:$0xf0] }
 0x39a   :  { %5122 = vmatmul.bf16.vlgmr.msra.gmra.mxu2 %v9429_v36  ;;  %5130 = vmatpush.bf16.msra.mxu3 %v7780_v37  ;;  %v8769_v36 = vld [vmem:[#allocation9 + $0x324] sm:$0xf]  ;;  %v7748_v59 = vor.u32 %v8717_v17, %v7745_v52 }
 0x39b   :  { %5166 = vmatpush.bf16.msrb.mxu2 %v7996_v21  ;;  %5141 = vmatpush.bf16.msrb.mxu0 %v7860_v28  ;;  %v7764_v21 = vor.u32 %v8721_v42, %v7761_v16  ;;  %v7956_v24 = vor.u32 %v8769_v36, %v7953_v20  ;;  %v8719_v28 = vld [vmem:[#allocation9 + $0x194] sm:$0xf]  ;;  %v8789_v36 = vld [vmem:[#allocation9 + $0x3c4] sm:$0xf]  ;;  %v8033_v20 = vld [vmem:[#allocation9 + $0x3c8] sm:$0xf0] }
 0x39c   :  { %v7756_v32 = vor.u32 %v8719_v28, %v7753_v40  ;;  %v8791_v16 = vld [vmem:[#allocation9 + $0x3d4] sm:$0xf] }
 0x39d   :  { %5154 = vmatpush.bf16.msrb.mxu1 %v7924_v4  ;;  %v8767_v4 = vld [vmem:[#allocation9 + $0x314] sm:$0xf]  ;;  %v8044_v45 = vor.u32 %v8791_v16, %v8041_v34 }
 0x39e   :  { %5131 = vmatpush.bf16.msra.mxu3 %v7772_v9  ;;  %v8818_v34 = vld [vmem:[#allocation18 + $0x28] sm:$0xff] }
 0x39f   :  { %5167 = vmatpush.bf16.msrb.mxu2 %v7988_v15  ;;  %5142 = vmatpush.bf16.msrb.mxu0 %v7852_v51  ;;  %v7945_v15 = vld [vmem:[#allocation9 + $0x318] sm:$0xf0]  ;;  %v8749_v51 = vld [vmem:[#allocation9 + $0x284] sm:$0xf] }
 0x3a0   :  { %v7948_v47 = vor.u32 %v8767_v4, %v7945_v15  ;;  %v8783_v4 = vld [vmem:[#allocation9 + $0x394] sm:$0xf]  ;;  %v8009_v15 = vld [vmem:[#allocation9 + $0x398] sm:$0xf0] }
 0x3a1   :  { %5155 = vmatpush.bf16.msrb.mxu1 %v7916_v46  ;;  %v7873_v46 = vld [vmem:[#allocation9 + $0x288] sm:$0xf0]  ;;  %v4121_v25 = vpop.f32.mrf.mxu3 }
 0x3a2   :  { %5132 = vmatpush.bf16.msra.mxu3 %v7764_v21  ;;  %v7876_v60 = vor.u32 %v8749_v51, %v7873_v46  ;;  %v8787_v21 = vld [vmem:[#allocation9 + $0x3b4] sm:$0xf]  ;;  %v8001_v51 = vld [vmem:[#allocation9 + $0x388] sm:$0xf0] }
 0x3a3   :  { %5168 = vmatpush.bf16.msrb.mxu2 %v7980_v56  ;;  %5143 = vmatpush.bf16.msrb.mxu0 %v7844_v62  ;;  %v8765_v56 = vld [vmem:[#allocation9 + $0x304] sm:$0xf]  ;;  %v4094_v62 = vadd.f32 %v9474_v41, %v9471_v3  ;;  %v8795_v41 = vld [vmem:[#allocation9 + $0x3f4] sm:$0xf] }
 0x3a4   :  { %v7940_v37 = vor.u32 %v8765_v56, %v7937_v57 }
 0x3a5   :  { %5156 = vmatpush.bf16.msrb.mxu1 %v7908_v1  ;;  %v4107_v63 = vadd.f32 %v4106_v49, %v4094_v62  ;;  %v4338_v49 = vld [vmem:[#allocation11] sm:$0x3] }
 0x3a6   :  { %5133 = vmatpush.bf16.msra.mxu3 %v7756_v32  ;;  %v4340_v19 = vperm.slane %v4338_v49, 0 }
 0x3a7   :  { %5169 = vmatpush.bf16.msrb.mxu2 %v7972_v39  ;;  %5144 = vmatpush.bf16.msrb.mxu0 %v7836_v10  ;;  %v4120_v0 = vadd.f32 %v4119_v6, %v4107_v63  ;;  %v8036_v6 = vor.u32 %v8789_v36, %v8033_v20  ;;  %v8817_v36 = vld [vmem:[#allocation18 + $0x20] sm:$0xff]  ;;  %v8816_v20 = vld [vmem:[#allocation18 + $0x18] sm:$0xff] }
 0x3a9   :  { %5157 = vmatpush.bf16.msrb.mxu1 %v7900_v12  ;;  %v8049_v12 = vld [vmem:[#allocation9 + $0x3e8] sm:$0xf0] }
 0x3aa   :  { %5134 = vmatpush.bf16.msra.mxu3 %v7748_v59 }
 0x3ab   :  { %5170 = vmatpush.bf16.msrb.mxu2 %v7964_v38  ;;  %5145 = vmatpush.bf16.msrb.mxu0 %v7828_v18  ;;  %v8025_v18 = vld [vmem:[#allocation9 + $0x3b8] sm:$0xf0] }
 0x3ac   :  { %v8028_v22 = vor.u32 %v8787_v21, %v8025_v18  ;;  %v8814_v18 = vld [vmem:[#allocation18 + $0x8] sm:$0xff] }
 0x3ad   :  { %5158 = vmatpush.bf16.msrb.mxu1 %v7892_v23 }
 0x3af   :  { %5171 = vmatpush.bf16.msrb.mxu2 %v7956_v24  ;;  %5146 = vmatpush.bf16.msrb.mxu0 %v7820_v33  ;;  %v8012_v33 = vor.u32 %v8783_v4, %v8009_v15  ;;  %v8809_v4 = vld [vmem:[#allocation15 + $0x20] sm:$0xff] }
 0x3b1   :  { %5159 = vmatpush.bf16.msrb.mxu1 %v7884_v48 }
 0x3b3   :  { %5172 = vmatpush.bf16.msrb.mxu2 %v7948_v47  ;;  %5147 = vmatpush.bf16.msrb.mxu0 %v7812_v53  ;;  %v4132_v1 = vpop.f32.mrf.mxu0  ;;  %v8781_v47 = vld [vmem:[#allocation9 + $0x384] sm:$0xf] }
 0x3b4   :  { %v4133_v2 = vadd.f32 %v4132_v1, %v4120_v0  ;;  %v8004_v52 = vor.u32 %v8781_v47, %v8001_v51  ;;  %v8804_v1 = vld [vmem:[#allocation12 + $0x38] sm:$0xff] }
 0x3b5   :  { %5160 = vmatpush.bf16.msrb.mxu1 %v7876_v60  ;;  %v4145_v39 = vpop.f32.mrf.mxu1  ;;  %v4341_v60 = vperm.slane %v4338_v49, 1  ;;  %v8815_v49 = vld [vmem:[#allocation18 + $0x10] sm:$0xff] }
 0x3b6   :  { %5148 = vmatmul.bf16.vlgmr.msrb.gmra.mxu0 %v9457_v27  ;;  %v4146_v5 = vadd.f32 %v4145_v39, %v4133_v2  ;;  %v8057_v27 = vld [vmem:[#allocation9 + $0x3f8] sm:$0xf0] }
 0x3b7   :  { %5173 = vmatpush.bf16.msrb.mxu2 %v7940_v37  ;;  %5263 = vmatpush.bf16.msra.mxu0 %v8804_v1 }
 0x3b8   :  { %5161 = vmatmul.bf16.vlgmr.msrb.gmra.mxu1 %v9459_v29  ;;  %v8060_v29 = vor.u32 %v8795_v41, %v8057_v27  ;;  %v8799_v41 = vld [vmem:[#allocation12 + $0x10] sm:$0xff] }
 0x3b9   :  { %5346 = vmatpush.bf16.msra.mxu1 %v8812_v26 }
 0x3ba   :  { %5174 = vmatmul.bf16.vlgmr.msrb.gmra.mxu2 %v9466_v61  ;;  %v8793_v61 = vld [vmem:[#allocation9 + $0x3e4] sm:$0xf] }
 0x3bb   :  { %v4134_v9 = vpop.f32.mrf.mxu0  ;;  %v8052_v42 = vor.u32 %v8793_v61, %v8049_v12  ;;  %v8797_v61 = vld [vmem:[#allocation12] sm:$0xff] }
 0x3bc   :  { %v8820_v12 = vld [vmem:[#allocation18 + $0x38] sm:$0xff] }
 0x3bd   :  { %v4158_v7 = vpop.f32.mrf.mxu2  ;;  %v4147_v10 = vpop.f32.mrf.mxu1  ;;  %5439 = vmatpush.bf16.msra.mxu2 %v8820_v12 }
 0x3be   :  { %v4159_v35 = vadd.f32 %v4158_v7, %v4146_v5  ;;  %v8803_v5 = vld [vmem:[#allocation12 + $0x30] sm:$0xff] }
 0x3bf   :  { %v4171_v14 = vpop.f32.mrf.mxu3  ;;  %5264 = vmatpush.bf16.msra.mxu0 %v8803_v5 }
 0x3c0   :  { %v4172_v3 = vadd.f32 %v4171_v14, %v4159_v35  ;;  %v8801_v14 = vld [vmem:[#allocation12 + $0x20] sm:$0xff] }
 0x3c2   :  { %v4182_v11 = vadd.f32 %v4172_v3, %v214_v8  ;;  %v8802_v8 = vld [vmem:[#allocation12 + $0x28] sm:$0xff]  ;;  %v8800_v3 = vld [vmem:[#allocation12 + $0x18] sm:$0xff] }
 0x3c3   :  { %5265 = vmatpush.bf16.msra.mxu0 %v8802_v8 }
 0x3c4   :  { %v4209_v44 = vpack.c.bf16 %v4182_v11, %v4182_v11  ;;  %v8798_v11 = vld [vmem:[#allocation12 + $0x8] sm:$0xff] }
 0x3c5   :  { %v4160_v38 = vpop.f32.mrf.mxu2 }
 0x3c6   :  { %5083 = vmatmul.bf16.vlgmr.msrb.gmra.mxu3 %v4209_v44 }
 0x3c7   :  { %v4173_v13 = vpop.f32.mrf.mxu3  ;;  %5179 = vmatpush.bf16.msrb.mxu3 %v8060_v29  ;;  %5266 = vmatpush.bf16.msra.mxu0 %v8801_v14 }
 0x3c8   :  { %v8819_v13 = vld [vmem:[#allocation18 + $0x30] sm:$0xff] }
 0x3c9   :  { %5440 = vmatpush.bf16.msra.mxu2 %v8819_v13 }
 0x3cb   :  { %5180 = vmatpush.bf16.msrb.mxu3 %v8052_v42  ;;  %5267 = vmatpush.bf16.msra.mxu0 %v8800_v3 }
 0x3cd   :  { %5441 = vmatpush.bf16.msra.mxu2 %v8818_v34 }
 0x3cf   :  { %5181 = vmatpush.bf16.msrb.mxu3 %v8044_v45  ;;  %5268 = vmatpush.bf16.msra.mxu0 %v8799_v41 }
 0x3d1   :  { %5442 = vmatpush.bf16.msra.mxu2 %v8817_v36 }
 0x3d3   :  { %5182 = vmatpush.bf16.msrb.mxu3 %v8036_v6  ;;  %v4993_v23 = vpop.f32.mrf.mxu0  ;;  %5269 = vmatpush.bf16.msra.mxu0 %v8798_v11 }
 0x3d4   :  { %v4994_v28 = vadd.f32 %v4993_v23, %v4340_v19  ;;  %v8813_v23 = vld [vmem:[#allocation18] sm:$0xff] }
 0x3d5   :  { %v5006_v24 = vpop.f32.mrf.mxu1  ;;  %5443 = vmatpush.bf16.msra.mxu2 %v8816_v20 }
 0x3d6   :  { %5135 = vmatmul.bf16.vlgmr.msra.gmra.mxu3 %v9431_v54  ;;  %v5007_v40 = vadd.f32 %v5006_v24, %v4994_v28  ;;  %v8811_v28 = vld [vmem:[#allocation15 + $0x30] sm:$0xff] }
 0x3d7   :  { %5183 = vmatpush.bf16.msrb.mxu3 %v8028_v22  ;;  %5270 = vmatpush.bf16.msra.mxu0 %v8797_v61 }
 0x3d8   :  { %5347 = vmatpush.bf16.msra.mxu1 %v8811_v28 }
 0x3d9   :  { %5444 = vmatpush.bf16.msra.mxu2 %v8815_v49 }
 0x3db   :  { %5184 = vmatpush.bf16.msrb.mxu3 %v8020_v30  ;;  %v4995_v43 = vpop.f32.mrf.mxu0 }
 0x3dd   :  { %v5019_v31 = vpop.f32.mrf.mxu2  ;;  %v5008_v48 = vpop.f32.mrf.mxu1  ;;  %5445 = vmatpush.bf16.msra.mxu2 %v8814_v18 }
 0x3de   :  { %v5020_v50 = vadd.f32 %v5019_v31, %v5007_v40  ;;  %v8810_v40 = vld [vmem:[#allocation15 + $0x28] sm:$0xff]  ;;  %v8808_v31 = vld [vmem:[#allocation15 + $0x18] sm:$0xff] }
 0x3df   :  { %v5032_v32 = vpop.f32.mrf.mxu3  ;;  %5185 = vmatpush.bf16.msrb.mxu3 %v8012_v33  ;;  %5348 = vmatpush.bf16.msra.mxu1 %v8810_v40 }
 0x3e0   :  { %v5033_v17 = vadd.f32 %v5032_v32, %v5020_v50  ;;  %v8807_v50 = vld [vmem:[#allocation15 + $0x10] sm:$0xff] }
 0x3e1   :  { %5446 = vmatpush.bf16.msra.mxu2 %v8813_v23 }
 0x3e3   :  { %5186 = vmatpush.bf16.msrb.mxu3 %v8004_v52  ;;  %5349 = vmatpush.bf16.msra.mxu1 %v8809_v4 }
 0x3e5   :  { %v5021_v46 = vpop.f32.mrf.mxu2 }
 0x3e6   :  { %5187 = vmatmul.bf16.vlgmr.msrb.gmra.mxu3 %v4209_v44 }
 0x3e7   :  { %v5034_v56 = vpop.f32.mrf.mxu3  ;;  %5350 = vmatpush.bf16.msra.mxu1 %v8808_v31 }
 0x3e8   :  { %v8806_v56 = vld [vmem:[#allocation15 + $0x8] sm:$0xff] }
 0x3eb   :  { %5351 = vmatpush.bf16.msra.mxu1 %v8807_v50 }
 0x3ef   :  { %5352 = vmatpush.bf16.msra.mxu1 %v8806_v56 }
 0x3f3   :  { %v5045_v54 = vpop.f32.mrf.mxu0 }
 0x3f4   :  { %v5046_v57 = vadd.f32 %v5045_v54, %v5033_v17  ;;  %v8805_v54 = vld [vmem:[#allocation15] sm:$0xff] }
 0x3f5   :  { %v5058_v58 = vpop.f32.mrf.mxu1  ;;  %5353 = vmatpush.bf16.msra.mxu1 %v8805_v54 }
 0x3f6   :  { %v5059_v25 = vadd.f32 %v5058_v58, %v5046_v57  ;;  %v8840_v57 = vld [vmem:[#allocation14] ss:$0 sm:$0xff] }
 0x3fb   :  { %v5047_v59 = vpop.f32.mrf.mxu0 }
 0x3fd   :  { %v5060_v53 = vpop.f32.mrf.mxu1 }
 0x407   :  { %v5071_v37 = vpop.f32.mrf.mxu2 }
 0x408   :  { %v5072_v6 = vadd.f32 %v5071_v37, %v5059_v25 }
 0x40f   :  { %v5073_v2 = vpop.f32.mrf.mxu2 }
 0x413   :  { %v5097_v62 = vpop.f32.mrf.mxu0 }
 0x414   :  { %v5098_v0 = vadd.f32 %v5097_v62, %v4341_v60 }
 0x415   :  { %v5110_v63 = vpop.f32.mrf.mxu1 }
 0x416   :  { %v5111_v39 = vadd.f32 %v5110_v63, %v5098_v0  ;;  %v8842_v63 = vld [vmem:[#allocation17] ss:$0 sm:$0xff] }
 0x41b   :  { %v5099_v7 = vpop.f32.mrf.mxu0 }
 0x41d   :  { %v5112_v35 = vpop.f32.mrf.mxu1  ;;  %v5123_v9 = vpop.f32.mrf.mxu2 }
 0x41e   :  { %v5124_v10 = vadd.f32 %v5123_v9, %v5111_v39  ;;  %v8841_v39 = vld [vmem:[#allocation20] ss:$0 sm:$0xff] }
 0x425   :  { %v5125_v27 = vpop.f32.mrf.mxu2 }
 0x433   :  { %v5149_v29 = vpop.f32.mrf.mxu0 }
 0x435   :  { %v5162_v44 = vpop.f32.mrf.mxu1 }
 0x43b   :  { %v5151_v42 = vpop.f32.mrf.mxu0 }
 0x43d   :  { %v5175_v38 = vpop.f32.mrf.mxu2  ;;  %v5164_v16 = vpop.f32.mrf.mxu1 }
 0x445   :  { %v5177_v45 = vpop.f32.mrf.mxu2 }
 0x449   :  { %v5084_v21 = vpop.f32.mrf.mxu3 }
 0x44a   :  { %v5085_v19 = vadd.f32 %v5084_v21, %v5072_v6 }
 0x44c   :  { %v5192_v22 = vmax.f32 %v5085_v19, 0.0 }
 0x44e   :  { %v5194_v24 = vpack.c.bf16 %v5192_v22, %v5192_v22 }
 0x450   :  { %5271 = vmatmul.bf16.vlgmr.msra.gmra.mxu0 %v5194_v24 }
 0x451   :  { %v5086_v55 = vpop.f32.mrf.mxu3 }
 0x459   :  { %v5136_v30 = vpop.f32.mrf.mxu3 }
 0x45a   :  { %v5137_v15 = vadd.f32 %v5136_v30, %v5124_v10 }
 0x45c   :  { %v5150_v32 = vadd.f32 %v5149_v29, %v5137_v15 }
 0x45e   :  { %v5163_v43 = vadd.f32 %v5162_v44, %v5150_v32 }
 0x460   :  { %v5176_v48 = vadd.f32 %v5175_v38, %v5163_v43 }
 0x461   :  { %v5138_v33 = vpop.f32.mrf.mxu3 }
 0x469   :  { %v5188_v47 = vpop.f32.mrf.mxu3 }
 0x46a   :  { %v5189_v51 = vadd.f32 %v5188_v47, %v5176_v48 }
 0x46c   :  { %v5193_v17 = vmax.f32 %v5189_v51, 0.0 }
 0x46e   :  { %v5370_v52 = vpack.c.bf16 %v5193_v17, %v5193_v17 }
 0x470   :  { %5447 = vmatmul.bf16.vlgmr.msra.gmra.mxu2 %v5370_v52 }
 0x471   :  { %v5190_v46 = vpop.f32.mrf.mxu3 }
 0x4cd   :  { %v5272_v58 = vpop.f32.mrf.mxu0 }
 0x4ce   :  { %v5273_v25 = vadd.f32 %v8840_v57, %v5272_v58 }
 0x4d0   :  { %v5276_v59 = vmax.f32 %v5273_v25, 0.0 }
 0x4d2   :  { %v5277_v53 = vpack.c.bf16 %v5276_v59, %v5276_v59 }
 0x4d4   :  { %5354 = vmatmul.bf16.vlgmr.msra.gmra.mxu1 %v5277_v53 }
 0x4d5   :  { %v5274_v60 = vpop.f32.mrf.mxu0 }
 0x4f3   :  { %v5448_v37 = vpop.f32.mrf.mxu2 }
 0x4f4   :  { %v5449_v5 = vadd.f32 %v8841_v39, %v5448_v37 }
 0x4fb   :  { %v5450_v62 = vpop.f32.mrf.mxu2 }
 0x551   :  { %v5355_v0 = vpop.f32.mrf.mxu1 }
 0x552   :  { %v5356_v1 = vadd.f32 %v8842_v63, %v5355_v0 }
 0x554   :  { %5359 = vmax.xlane.f32.xlu0 %v5356_v1 }
 0x559   :  { %v5357_v2 = vpop.f32.mrf.mxu1 }
 0x55c   :  { %5452 = vmax.xlane.f32.xlu0 %v5449_v5 }
 0x5c7   :  { %v5360_v7 = vpop.xlane.xlu0 %5359 }
 0x5c8   :  { %v5361_v35 = vsub.f32 %v5356_v1, %v5360_v7 }
 0x5ca   :  { %v5362_v8 = vmul.f32 1.442695, %v5361_v35 }
 0x5cc   :  { %8843 = vpow2.f32 %v5362_v8 }
 0x5cf   :  { %v5453_v14 = vpop.xlane.xlu0 %5452 }
 0x5d0   :  { %v5454_v9 = vsub.f32 %v5449_v5, %v5453_v14 }
 0x5d2   :  { %v8844_v10 = vpop.eup %8843  ;;  %v5455_v3 = vmul.f32 1.442695, %v5454_v9 }
 0x5d3   :  { %5364 = vadd.xlane.f32.xlu1 %v8844_v10 }
 0x5d4   :  { %8845 = vpow2.f32 %v5455_v3 }
 0x5da   :  { %v8846_v41 = vpop.eup %8845 }
 0x5db   :  { %5457 = vadd.xlane.f32.xlu1 %v8846_v41 }
 0x646   :  { %v5365_v27 = vpop.xlane.xlu1 %5364 }
 0x647   :  { %8847 = vlog2.f32 %v5365_v27 }
 0x64d   :  { %v8848_v11 = vpop.eup %8847 }
 0x64e   :  { %v5367_v29 = vmul.f32 0.6931472, %v8848_v11  ;;  %v5458_v44 = vpop.xlane.xlu1 %5457 }
 0x64f   :  { %8849 = vlog2.f32 %v5458_v44 }
 0x650   :  { %v5368_v61 = vsub.f32 %v5361_v35, %v5367_v29 }
 0x652   :  { %5369 = vst [vmem:[#allocation21] sm:$0xff] %v5368_v61 }
 0x653   :  { %5473 = dma.vmem_to_hbm [thread:$0]  %s5469_s10, 128, %s5471_s1, [#allocation5]  }
 0x655   :  { %v8850_v12 = vpop.eup %8849 }
 0x656   :  { %v5460_v38 = vmul.f32 0.6931472, %v8850_v12 }
 0x658   :  { %v5461_v13 = vsub.f32 %v5454_v9, %v5460_v38 }
 0x65a   :  { %5462 = vst [vmem:[#allocation22] sm:$0xff] %v5461_v13 }
 0x65b   :  { %5484 = dma.vmem_to_hbm [thread:$0]  %s5480_s18, 128, %s5482_s20, [#allocation23]  }
 0x65c   :  { %9175 = dma.done.wait [#allocation5], 128  }
 0x65d   :  { %9176 = vsyncadd [#allocation5], 4294967168 }
 0x65e   :  { %9177 = dma.done.wait [#allocation23], 128  }
 0x65f   :  { %9178 = vsyncadd [#allocation23], 4294967168 }
 0x660   :  { %5493 = vsyncpa [#allocation4], 1 }
 0x661   :  { %5494 = vsyncpa [#allocation7], 1 }
 0x662   :  { %5495 = vsyncpa [#allocation10], 1 }
 0x663   :  { %5496 = vsyncpa [#allocation13], 1 }
 0x664   :  { %5497 = vsyncpa [#allocation16], 1 }
 0x665   :  { %5498 = vsyncpa [#allocation19], 1 }
 0x666   :  { %5499 = vsyncpa [#allocation5], 1 }
 0x667   :  { %5500 = vsyncpa [#allocation23], 1 }

</bundles_post_ra>
